<compile_context>
chip_gen: v5e
topology: v5e:2x2
jax: 0.10.0
libtpu: 0.0.40
codegen_flags: <defaults>
</compile_context>

<pallas_src>
import jax
import jax.numpy as jnp
from jax import lax
from jax.experimental import pallas as pl
from jax.experimental.pallas import tpu as pltpu

# ---- small, self-consistent config (scaled down from the reference) ----
VOCAB_SIZE = 65
VOCAB_PAD = 128                 # lane-dense lm_head output; sliced back to 65 outside
N_EMBD = 64
N_HEAD = 4
HEAD_SIZE = N_EMBD // N_HEAD
N_LAYER = 2
BLOCK_SIZE = 16                 # max sequence length (positional table size)
LN_EPS = 1e-5
NEG_INF = -1e30                 # large finite mask value (exp -> 0, never NaN)

VEC_PAD = 4 * N_EMBD            # widest packed vector (ffwd b1 = 256); multiple of 128
ROWS_PER_LAYER = 7              # ln1_g, ln1_b, bproj, ln2_g, ln2_b, b1, b2
VEC_ROWS = N_LAYER * ROWS_PER_LAYER + 3   # + ln_f_g, ln_f_b, b_lm

# Batch-folded single grid step: best on single-TensorCore v5e/v6e.
# TODO(synk): on v7x (2 TensorCores/chip) set N_BATCH_BLOCKS = 2 so the
#             "parallel" grid axis shards the batch across both cores.
N_BATCH_BLOCKS = 1


def _layernorm(x, gamma, beta):
    # x: (N, C) f32; gamma/beta: (1, C) f32. Stats kept in f32.
    mu = jnp.mean(x, axis=-1, keepdims=True)
    var = jnp.mean((x - mu) ** 2, axis=-1, keepdims=True)
    return (x - mu) * lax.rsqrt(var + LN_EPS) * gamma + beta


# ---------------------------------------------------------------------------
# Fused Pallas kernel: full forward pass for one batch-block per grid step.
#   refs = (x, wqkv[L,C,3C], wproj[L,C,C], w1[L,C,4C], w2[L,4C,C],
#           w_lm[C,128], vecs[17,256], out)
# ---------------------------------------------------------------------------
def fused_forward_kernel(x_ref, wqkv_ref, wproj_ref, w1_ref, w2_ref,
                         w_lm_ref, vecs_ref, o_ref):
    Bb, T, C = x_ref.shape
    N = Bb * T
    G = Bb * N_HEAD

    x = x_ref[...].reshape(N, C)                 # (N, C) f32, flattened batch*time
    vecs = vecs_ref[...]                         # (VEC_ROWS, VEC_PAD) f32

    # additive causal mask, built + fully broadcast ONCE (hoisted out of layer loop)
    row = lax.broadcasted_iota(jnp.int32, (T, T), 0)
    col = lax.broadcasted_iota(jnp.int32, (T, T), 1)
    mask = jnp.where(col <= row, 0.0, NEG_INF).astype(jnp.float32)
    mask = jnp.broadcast_to(mask[None], (G, T, T))

    scale = float(N_EMBD) ** -0.5                # reference scales by C**-0.5, C = n_embd

    def heads(y):
        # (N, H*hs) -> (B*H, T, hs): one reshape + transpose instead of
        # per-head column slices + stack.
        return (y.reshape(Bb, T, N_HEAD, HEAD_SIZE)
                 .transpose(0, 2, 1, 3)
                 .reshape(G, T, HEAD_SIZE))

    for l in range(N_LAYER):                     # static unrolled layer loop
        r = l * ROWS_PER_LAYER
        ln1_g, ln1_b = vecs[r + 0:r + 1, :C], vecs[r + 1:r + 2, :C]
        bproj        = vecs[r + 2:r + 3, :C]
        ln2_g, ln2_b = vecs[r + 3:r + 4, :C], vecs[r + 4:r + 5, :C]
        b1           = vecs[r + 5:r + 6, :4 * C]
        b2           = vecs[r + 6:r + 7, :C]

        # ---- self-attention branch: sa(ln1(x)) ----
        xn = _layernorm(x, ln1_g, ln1_b).astype(jnp.bfloat16)
        qkv = jnp.dot(xn, wqkv_ref[l],
                      preferred_element_type=jnp.float32)       # (N, 3C), fused QKV
        qkv16 = qkv.astype(jnp.bfloat16)
        q = heads(qkv16[:, :C])
        k = heads(qkv16[:, C:2 * C])
        v = heads(qkv16[:, 2 * C:])

        wei = jnp.einsum('gqd,gkd->gqk', q, k,
                         preferred_element_type=jnp.float32) * scale + mask
        # No row-max subtraction: scores are tiny at these scales and the mask
        # is a finite -1e30 (exp underflows to 0), so exp cannot overflow.
        p = jnp.exp(wei)
        p = p * pl.reciprocal(jnp.sum(p, axis=-1, keepdims=True), approx=True)

        att = jnp.einsum('gqk,gkd->gqd', p.astype(jnp.bfloat16), v,
                         preferred_element_type=jnp.float32)    # (G, T, hs)
        att = (att.reshape(Bb, N_HEAD, T, HEAD_SIZE)
                  .transpose(0, 2, 1, 3)
                  .reshape(N, C))

        sa = jnp.dot(att.astype(jnp.bfloat16), wproj_ref[l],
                     preferred_element_type=jnp.float32) + bproj
        x = x + sa                               # dropout = eval-mode identity

        # ---- feed-forward branch: ffwd(ln2(x)) ----
        xn2 = _layernorm(x, ln2_g, ln2_b).astype(jnp.bfloat16)
        h = jnp.dot(xn2, w1_ref[l], preferred_element_type=jnp.float32) + b1
        h = jnp.maximum(h, 0.0)
        ff = jnp.dot(h.astype(jnp.bfloat16), w2_ref[l],
                     preferred_element_type=jnp.float32) + b2
        x = x + ff

    # ---- final LayerNorm + lm_head (vocab padded to 128 lanes) ----
    rf = N_LAYER * ROWS_PER_LAYER
    lnf_g, lnf_b = vecs[rf:rf + 1, :C], vecs[rf + 1:rf + 2, :C]
    b_lm = vecs[rf + 2:rf + 3, :VOCAB_PAD]
    xn = _layernorm(x, lnf_g, lnf_b).astype(jnp.bfloat16)
    logits = jnp.dot(xn, w_lm_ref[...], preferred_element_type=jnp.float32) + b_lm
    o_ref[...] = logits.reshape(Bb, T, VOCAB_PAD).astype(o_ref.dtype)


# ---------------------------------------------------------------------------
# Parameters (deterministic, synthetic) in packed layout, and the forward pass.
# ---------------------------------------------------------------------------
def init_params(key):
    keys = iter(jax.random.split(key, 16))

    def nrm(shape, scale=0.02, dtype=jnp.bfloat16):
        return (scale * jax.random.normal(next(keys), shape, jnp.float32)).astype(dtype)

    wqkv, wproj, w1, w2 = [], [], [], []
    for _ in range(N_LAYER):
        wqkv.append(nrm((N_EMBD, 3 * N_EMBD)))          # fused [Wq | Wk | Wv], bf16
        wproj.append(nrm((N_EMBD, N_EMBD)))
        w1.append(nrm((N_EMBD, 4 * N_EMBD)))
        w2.append(nrm((4 * N_EMBD, N_EMBD)))

    w_lm = nrm((N_EMBD, VOCAB_SIZE))
    w_lm = jnp.pad(w_lm, ((0, 0), (0, VOCAB_PAD - VOCAB_SIZE)))   # zero vocab-pad cols

    # Pack every LN gamma/beta and bias into ONE (VEC_ROWS, VEC_PAD) f32 array.
    # Row layout per layer: [ln1_g, ln1_b, bproj, ln2_g, ln2_b, b1, b2];
    # tail: [ln_f_g, ln_f_b, b_lm].  Gammas = 1, betas/biases = 0.
    vecs = jnp.zeros((VEC_ROWS, VEC_PAD), jnp.float32)
    for l in range(N_LAYER):
        r = l * ROWS_PER_LAYER
        vecs = vecs.at[r + 0, :N_EMBD].set(1.0)         # ln1 gamma
        vecs = vecs.at[r + 3, :N_EMBD].set(1.0)         # ln2 gamma
    vecs = vecs.at[N_LAYER * ROWS_PER_LAYER, :N_EMBD].set(1.0)    # ln_f gamma

    return {
        "tok_emb": nrm((VOCAB_SIZE, N_EMBD), 1.0, jnp.float32),
        "pos_emb": nrm((BLOCK_SIZE, N_EMBD), 1.0, jnp.float32),
        "wqkv": jnp.stack(wqkv),
        "wproj": jnp.stack(wproj),
        "w1": jnp.stack(w1),
        "w2": jnp.stack(w2),
        "w_lm": w_lm,
        "vecs": vecs,
    }


def bigram_lm_forward(idx, params):
    """idx: (B, T) int32 tokens. Returns (logits (B, T, VOCAB_SIZE), None)."""
    B, T = idx.shape
    C = N_EMBD
    assert B % N_BATCH_BLOCKS == 0
    Bb = B // N_BATCH_BLOCKS

    # embedding gathers: plain-JAX glue (no clean BlockSpec gather path needed)
    tok_emb = params["tok_emb"][idx]                    # (B, T, C)
    pos_emb = params["pos_emb"][:T]                     # (T, C)
    x = (tok_emb + pos_emb[None, :, :]).astype(jnp.float32)

    weights = [params["wqkv"], params["wproj"], params["w1"], params["w2"],
               params["w_lm"], params["vecs"]]
    # Constant index_map -> weights stay VMEM-resident across grid steps.
    weight_specs = [
        pl.BlockSpec(w.shape, lambda b, _nd=w.ndim: (0,) * _nd) for w in weights
    ]

    logits_pad = pl.pallas_call(
        fused_forward_kernel,
        out_shape=jax.ShapeDtypeStruct((B, T, VOCAB_PAD), jnp.float32),
        grid=(N_BATCH_BLOCKS,),
        in_specs=[pl.BlockSpec((Bb, T, C), lambda b: (b, 0, 0))] + weight_specs,
        out_specs=pl.BlockSpec((Bb, T, VOCAB_PAD), lambda b: (b, 0, 0)),
        compiler_params=pltpu.CompilerParams(
            dimension_semantics=("parallel",)),         # shards across TCs on v7x
    )(x, *weights)

    logits = logits_pad[:, :, :VOCAB_SIZE]              # drop padded vocab columns
    return logits, None


if __name__ == "__main__":
    key = jax.random.PRNGKey(0)
    pkey, dkey = jax.random.split(key)
    params = init_params(pkey)

    B, T = 2, 8
    idx = jax.random.randint(dkey, (B, T), 0, VOCAB_SIZE, dtype=jnp.int32)

    fwd = jax.jit(bigram_lm_forward)
    logits, loss = fwd(idx, params)
    logits = jax.block_until_ready(logits)

    assert logits.shape == (B, T, VOCAB_SIZE), logits.shape
    assert loss is None
    assert bool(jnp.all(jnp.isfinite(logits)))
    print("KERNEL_OK")
</pallas_src>

<mosaic_0001>
module attributes {stable_mosaic.version = 11 : i64} {
  func.func @fused_forward_kernel(%arg0: i32, %arg1: memref<2x8x64xf32, #tpu.memory_space<vmem>>, %arg2: memref<2x64x192xbf16, #tpu.memory_space<vmem>>, %arg3: memref<2x64x64xbf16, #tpu.memory_space<vmem>>, %arg4: memref<2x64x256xbf16, #tpu.memory_space<vmem>>, %arg5: memref<2x256x64xbf16, #tpu.memory_space<vmem>>, %arg6: memref<64x128xbf16, #tpu.memory_space<vmem>>, %arg7: memref<17x256xf32, #tpu.memory_space<vmem>>, %arg8: memref<2x8x128xf32, #tpu.memory_space<vmem>>) attributes {dimension_semantics = [#tpu.dimension_semantics<parallel>], iteration_bounds = array<i64: 1>, scalar_prefetch = 0 : i64, scratch_operands = 0 : i64, tpu.core_type = #tpu.core_type<tc>, window_params = [{transform_indices = @transform_0, window_bounds = array<i64: 2, 8, 64>}, {pipeline_mode = #tpu.pipeline_mode<synchronous>, transform_indices = @transform_1, window_bounds = array<i64: 2, 64, 192>}, {pipeline_mode = #tpu.pipeline_mode<synchronous>, transform_indices = @transform_2, window_bounds = array<i64: 2, 64, 64>}, {pipeline_mode = #tpu.pipeline_mode<synchronous>, transform_indices = @transform_3, window_bounds = array<i64: 2, 64, 256>}, {pipeline_mode = #tpu.pipeline_mode<synchronous>, transform_indices = @transform_4, window_bounds = array<i64: 2, 256, 64>}, {pipeline_mode = #tpu.pipeline_mode<synchronous>, transform_indices = @transform_5, window_bounds = array<i64: 64, 128>}, {pipeline_mode = #tpu.pipeline_mode<synchronous>, transform_indices = @transform_6, window_bounds = array<i64: 17, 256>}, {transform_indices = @transform_7, window_bounds = array<i64: 2, 8, 128>}]} {
    %c0 = arith.constant 0 : index
    %c0_0 = arith.constant 0 : index
    %c0_1 = arith.constant 0 : index
    %0 = vector.load %arg1[%c0, %c0_0, %c0_1] : memref<2x8x64xf32, #tpu.memory_space<vmem>>, vector<2x8x64xf32>
    %1 = vector.shape_cast %0 : vector<2x8x64xf32> to vector<16x64xf32>
    %c0_2 = arith.constant 0 : index
    %c0_3 = arith.constant 0 : index
    %2 = vector.load %arg7[%c0_2, %c0_3] : memref<17x256xf32, #tpu.memory_space<vmem>>, vector<17x256xf32>
    %3 = tpu.iota {dimensions = array<i32: 0>} : vector<8x8xi32>
    %4 = tpu.iota {dimensions = array<i32: 1>} : vector<8x8xi32>
    %5 = arith.cmpi sle, %4, %3 : vector<8x8xi32>
    %cst = arith.constant 0.000000e+00 : f32
    %cst_4 = arith.constant -1.000000e+30 : f32
    %6 = vector.broadcast %cst : f32 to vector<8x8xf32>
    %7 = vector.broadcast %cst_4 : f32 to vector<8x8xf32>
    %8 = arith.select %5, %6, %7 : vector<8x8xi1>, vector<8x8xf32>
    %9 = vector.shape_cast %8 : vector<8x8xf32> to vector<1x8x8xf32>
    %10 = vector.shape_cast %9 : vector<1x8x8xf32> to vector<1x8x8xf32>
    %11 = vector.broadcast %10 : vector<1x8x8xf32> to vector<8x8x8xf32>
    %12 = vector.extract_strided_slice %2 {offsets = [0, 0], sizes = [1, 64], strides = [1, 1]} : vector<17x256xf32> to vector<1x64xf32>
    %13 = vector.extract_strided_slice %2 {offsets = [1, 0], sizes = [1, 64], strides = [1, 1]} : vector<17x256xf32> to vector<1x64xf32>
    %14 = vector.extract_strided_slice %2 {offsets = [2, 0], sizes = [1, 64], strides = [1, 1]} : vector<17x256xf32> to vector<1x64xf32>
    %15 = vector.extract_strided_slice %2 {offsets = [3, 0], sizes = [1, 64], strides = [1, 1]} : vector<17x256xf32> to vector<1x64xf32>
    %16 = vector.extract_strided_slice %2 {offsets = [4, 0], sizes = [1, 64], strides = [1, 1]} : vector<17x256xf32> to vector<1x64xf32>
    %17 = vector.extract_strided_slice %2 {offsets = [5, 0], sizes = [1, 256], strides = [1, 1]} : vector<17x256xf32> to vector<1x256xf32>
    %18 = vector.extract_strided_slice %2 {offsets = [6, 0], sizes = [1, 64], strides = [1, 1]} : vector<17x256xf32> to vector<1x64xf32>
    %cst_5 = arith.constant dense<0.000000e+00> : vector<16xf32>
    %19 = vector.multi_reduction <add>, %1, %cst_5 [1] : vector<16x64xf32> to vector<16xf32>
    %20 = vector.shape_cast %19 : vector<16xf32> to vector<16x1xf32>
    %cst_6 = arith.constant 6.400000e+01 : f32
    %21 = vector.broadcast %cst_6 : f32 to vector<16x1xf32>
    %22 = arith.divf %20, %21 : vector<16x1xf32>
    %23 = vector.broadcast %22 : vector<16x1xf32> to vector<16x64xf32>
    %24 = arith.subf %1, %23 : vector<16x64xf32>
    %25 = arith.mulf %24, %24 : vector<16x64xf32>
    %cst_7 = arith.constant dense<0.000000e+00> : vector<16xf32>
    %26 = vector.multi_reduction <add>, %25, %cst_7 [1] : vector<16x64xf32> to vector<16xf32>
    %27 = vector.shape_cast %26 : vector<16xf32> to vector<16x1xf32>
    %cst_8 = arith.constant 6.400000e+01 : f32
    %28 = vector.broadcast %cst_8 : f32 to vector<16x1xf32>
    %29 = arith.divf %27, %28 : vector<16x1xf32>
    %30 = vector.broadcast %22 : vector<16x1xf32> to vector<16x64xf32>
    %31 = arith.subf %1, %30 : vector<16x64xf32>
    %cst_9 = arith.constant 9.99999974E-6 : f32
    %32 = vector.broadcast %cst_9 : f32 to vector<16x1xf32>
    %33 = arith.addf %29, %32 : vector<16x1xf32>
    %34 = math.rsqrt %33 : vector<16x1xf32>
    %35 = vector.broadcast %34 : vector<16x1xf32> to vector<16x64xf32>
    %36 = arith.mulf %31, %35 : vector<16x64xf32>
    %37 = vector.broadcast %12 : vector<1x64xf32> to vector<16x64xf32>
    %38 = arith.mulf %36, %37 : vector<16x64xf32>
    %39 = vector.broadcast %13 : vector<1x64xf32> to vector<16x64xf32>
    %40 = arith.addf %38, %39 : vector<16x64xf32>
    %41 = arith.truncf %40 : vector<16x64xf32> to vector<16x64xbf16>
    %c0_10 = arith.constant 0 : index
    %c0_11 = arith.constant 0 : index
    %c0_12 = arith.constant 0 : index
    %42 = vector.load %arg2[%c0_10, %c0_11, %c0_12] : memref<2x64x192xbf16, #tpu.memory_space<vmem>>, vector<1x64x192xbf16>
    %43 = vector.shape_cast %42 : vector<1x64x192xbf16> to vector<64x192xbf16>
    %cst_13 = arith.constant dense<0.000000e+00> : vector<16x192xf32>
    %44 = tpu.matmul %41, %43, %cst_13 {dimension_numbers = #tpu.dot_dimension_numbers<[1], [0], [0], [1], [0, 0, 1, 1], [], []>} : vector<16x64xbf16>, vector<64x192xbf16>, vector<16x192xf32> -> vector<16x192xf32>
    %45 = arith.truncf %44 : vector<16x192xf32> to vector<16x192xbf16>
    %46 = vector.extract_strided_slice %45 {offsets = [0, 0], sizes = [16, 64], strides = [1, 1]} : vector<16x192xbf16> to vector<16x64xbf16>
    %47 = vector.shape_cast %46 : vector<16x64xbf16> to vector<2x8x4x16xbf16>
    %48 = tpu.transpose %47, [0, 2, 1, 3] : vector<2x8x4x16xbf16> -> vector<2x4x8x16xbf16>
    %49 = vector.shape_cast %48 : vector<2x4x8x16xbf16> to vector<8x8x16xbf16>
    %50 = vector.extract_strided_slice %45 {offsets = [0, 64], sizes = [16, 64], strides = [1, 1]} : vector<16x192xbf16> to vector<16x64xbf16>
    %51 = vector.shape_cast %50 : vector<16x64xbf16> to vector<2x8x4x16xbf16>
    %52 = tpu.transpose %51, [0, 2, 1, 3] : vector<2x8x4x16xbf16> -> vector<2x4x8x16xbf16>
    %53 = vector.shape_cast %52 : vector<2x4x8x16xbf16> to vector<8x8x16xbf16>
    %54 = vector.extract_strided_slice %45 {offsets = [0, 128], sizes = [16, 64], strides = [1, 1]} : vector<16x192xbf16> to vector<16x64xbf16>
    %55 = vector.shape_cast %54 : vector<16x64xbf16> to vector<2x8x4x16xbf16>
    %56 = tpu.transpose %55, [0, 2, 1, 3] : vector<2x8x4x16xbf16> -> vector<2x4x8x16xbf16>
    %57 = vector.shape_cast %56 : vector<2x4x8x16xbf16> to vector<8x8x16xbf16>
    "tpu.trace_start"() <{level = 10 : i32, message = "gqd,gkd->gqk"}> : () -> ()
    %cst_14 = arith.constant dense<0.000000e+00> : vector<8x8x8xf32>
    %58 = tpu.matmul %49, %53, %cst_14 {dimension_numbers = #tpu.dot_dimension_numbers<[2], [2], [1], [1], [0, 0, 0, 1, 1, 1], [0], [0]>} : vector<8x8x16xbf16>, vector<8x8x16xbf16>, vector<8x8x8xf32> -> vector<8x8x8xf32>
    "tpu.trace_stop"() : () -> ()
    %cst_15 = arith.constant 1.250000e-01 : f32
    %59 = vector.broadcast %cst_15 : f32 to vector<8x8x8xf32>
    %60 = arith.mulf %58, %59 : vector<8x8x8xf32>
    %61 = arith.addf %60, %11 : vector<8x8x8xf32>
    %62 = math.exp %61 : vector<8x8x8xf32>
    %cst_16 = arith.constant dense<0.000000e+00> : vector<8x8xf32>
    %63 = vector.multi_reduction <add>, %62, %cst_16 [2] : vector<8x8x8xf32> to vector<8x8xf32>
    %64 = vector.shape_cast %63 : vector<8x8xf32> to vector<8x8x1xf32>
    %65 = tpu.reciprocal %64 {approx = true} : vector<8x8x1xf32> -> vector<8x8x1xf32>
    %66 = vector.broadcast %65 : vector<8x8x1xf32> to vector<8x8x8xf32>
    %67 = arith.mulf %62, %66 : vector<8x8x8xf32>
    %68 = arith.truncf %67 : vector<8x8x8xf32> to vector<8x8x8xbf16>
    "tpu.trace_start"() <{level = 10 : i32, message = "gqk,gkd->gqd"}> : () -> ()
    %cst_17 = arith.constant dense<0.000000e+00> : vector<8x8x16xf32>
    %69 = tpu.matmul %68, %57, %cst_17 {dimension_numbers = #tpu.dot_dimension_numbers<[2], [1], [1], [2], [0, 0, 0, 1, 1, 2], [0], [0]>} : vector<8x8x8xbf16>, vector<8x8x16xbf16>, vector<8x8x16xf32> -> vector<8x8x16xf32>
    "tpu.trace_stop"() : () -> ()
    %70 = vector.shape_cast %69 : vector<8x8x16xf32> to vector<2x4x8x16xf32>
    %71 = tpu.transpose %70, [0, 2, 1, 3] : vector<2x4x8x16xf32> -> vector<2x8x4x16xf32>
    %72 = vector.shape_cast %71 : vector<2x8x4x16xf32> to vector<16x64xf32>
    %73 = arith.truncf %72 : vector<16x64xf32> to vector<16x64xbf16>
    %c0_18 = arith.constant 0 : index
    %c0_19 = arith.constant 0 : index
    %c0_20 = arith.constant 0 : index
    %74 = vector.load %arg3[%c0_18, %c0_19, %c0_20] : memref<2x64x64xbf16, #tpu.memory_space<vmem>>, vector<1x64x64xbf16>
    %75 = vector.shape_cast %74 : vector<1x64x64xbf16> to vector<64x64xbf16>
    %cst_21 = arith.constant dense<0.000000e+00> : vector<16x64xf32>
    %76 = tpu.matmul %73, %75, %cst_21 {dimension_numbers = #tpu.dot_dimension_numbers<[1], [0], [0], [1], [0, 0, 1, 1], [], []>} : vector<16x64xbf16>, vector<64x64xbf16>, vector<16x64xf32> -> vector<16x64xf32>
    %77 = vector.broadcast %14 : vector<1x64xf32> to vector<16x64xf32>
    %78 = arith.addf %76, %77 : vector<16x64xf32>
    %79 = arith.addf %1, %78 : vector<16x64xf32>
    %cst_22 = arith.constant dense<0.000000e+00> : vector<16xf32>
    %80 = vector.multi_reduction <add>, %79, %cst_22 [1] : vector<16x64xf32> to vector<16xf32>
    %81 = vector.shape_cast %80 : vector<16xf32> to vector<16x1xf32>
    %cst_23 = arith.constant 6.400000e+01 : f32
    %82 = vector.broadcast %cst_23 : f32 to vector<16x1xf32>
    %83 = arith.divf %81, %82 : vector<16x1xf32>
    %84 = vector.broadcast %83 : vector<16x1xf32> to vector<16x64xf32>
    %85 = arith.subf %79, %84 : vector<16x64xf32>
    %86 = arith.mulf %85, %85 : vector<16x64xf32>
    %cst_24 = arith.constant dense<0.000000e+00> : vector<16xf32>
    %87 = vector.multi_reduction <add>, %86, %cst_24 [1] : vector<16x64xf32> to vector<16xf32>
    %88 = vector.shape_cast %87 : vector<16xf32> to vector<16x1xf32>
    %cst_25 = arith.constant 6.400000e+01 : f32
    %89 = vector.broadcast %cst_25 : f32 to vector<16x1xf32>
    %90 = arith.divf %88, %89 : vector<16x1xf32>
    %91 = vector.broadcast %83 : vector<16x1xf32> to vector<16x64xf32>
    %92 = arith.subf %79, %91 : vector<16x64xf32>
    %cst_26 = arith.constant 9.99999974E-6 : f32
    %93 = vector.broadcast %cst_26 : f32 to vector<16x1xf32>
    %94 = arith.addf %90, %93 : vector<16x1xf32>
    %95 = math.rsqrt %94 : vector<16x1xf32>
    %96 = vector.broadcast %95 : vector<16x1xf32> to vector<16x64xf32>
    %97 = arith.mulf %92, %96 : vector<16x64xf32>
    %98 = vector.broadcast %15 : vector<1x64xf32> to vector<16x64xf32>
    %99 = arith.mulf %97, %98 : vector<16x64xf32>
    %100 = vector.broadcast %16 : vector<1x64xf32> to vector<16x64xf32>
    %101 = arith.addf %99, %100 : vector<16x64xf32>
    %102 = arith.truncf %101 : vector<16x64xf32> to vector<16x64xbf16>
    %c0_27 = arith.constant 0 : index
    %c0_28 = arith.constant 0 : index
    %c0_29 = arith.constant 0 : index
    %103 = vector.load %arg4[%c0_27, %c0_28, %c0_29] : memref<2x64x256xbf16, #tpu.memory_space<vmem>>, vector<1x64x256xbf16>
    %104 = vector.shape_cast %103 : vector<1x64x256xbf16> to vector<64x256xbf16>
    %cst_30 = arith.constant dense<0.000000e+00> : vector<16x256xf32>
    %105 = tpu.matmul %102, %104, %cst_30 {dimension_numbers = #tpu.dot_dimension_numbers<[1], [0], [0], [1], [0, 0, 1, 1], [], []>} : vector<16x64xbf16>, vector<64x256xbf16>, vector<16x256xf32> -> vector<16x256xf32>
    %106 = vector.broadcast %17 : vector<1x256xf32> to vector<16x256xf32>
    %107 = arith.addf %105, %106 : vector<16x256xf32>
    %cst_31 = arith.constant 0.000000e+00 : f32
    %108 = vector.broadcast %cst_31 : f32 to vector<16x256xf32>
    %109 = arith.maximumf %107, %108 : vector<16x256xf32>
    %110 = arith.truncf %109 : vector<16x256xf32> to vector<16x256xbf16>
    %c0_32 = arith.constant 0 : index
    %c0_33 = arith.constant 0 : index
    %c0_34 = arith.constant 0 : index
    %111 = vector.load %arg5[%c0_32, %c0_33, %c0_34] : memref<2x256x64xbf16, #tpu.memory_space<vmem>>, vector<1x256x64xbf16>
    %112 = vector.shape_cast %111 : vector<1x256x64xbf16> to vector<256x64xbf16>
    %cst_35 = arith.constant dense<0.000000e+00> : vector<16x64xf32>
    %113 = tpu.matmul %110, %112, %cst_35 {dimension_numbers = #tpu.dot_dimension_numbers<[1], [0], [0], [1], [0, 0, 1, 1], [], []>} : vector<16x256xbf16>, vector<256x64xbf16>, vector<16x64xf32> -> vector<16x64xf32>
    %114 = vector.broadcast %18 : vector<1x64xf32> to vector<16x64xf32>
    %115 = arith.addf %113, %114 : vector<16x64xf32>
    %116 = arith.addf %79, %115 : vector<16x64xf32>
    %117 = vector.extract_strided_slice %2 {offsets = [7, 0], sizes = [1, 64], strides = [1, 1]} : vector<17x256xf32> to vector<1x64xf32>
    %118 = vector.extract_strided_slice %2 {offsets = [8, 0], sizes = [1, 64], strides = [1, 1]} : vector<17x256xf32> to vector<1x64xf32>
    %119 = vector.extract_strided_slice %2 {offsets = [9, 0], sizes = [1, 64], strides = [1, 1]} : vector<17x256xf32> to vector<1x64xf32>
    %120 = vector.extract_strided_slice %2 {offsets = [10, 0], sizes = [1, 64], strides = [1, 1]} : vector<17x256xf32> to vector<1x64xf32>
    %121 = vector.extract_strided_slice %2 {offsets = [11, 0], sizes = [1, 64], strides = [1, 1]} : vector<17x256xf32> to vector<1x64xf32>
    %122 = vector.extract_strided_slice %2 {offsets = [12, 0], sizes = [1, 256], strides = [1, 1]} : vector<17x256xf32> to vector<1x256xf32>
    %123 = vector.extract_strided_slice %2 {offsets = [13, 0], sizes = [1, 64], strides = [1, 1]} : vector<17x256xf32> to vector<1x64xf32>
    %cst_36 = arith.constant dense<0.000000e+00> : vector<16xf32>
    %124 = vector.multi_reduction <add>, %116, %cst_36 [1] : vector<16x64xf32> to vector<16xf32>
    %125 = vector.shape_cast %124 : vector<16xf32> to vector<16x1xf32>
    %cst_37 = arith.constant 6.400000e+01 : f32
    %126 = vector.broadcast %cst_37 : f32 to vector<16x1xf32>
    %127 = arith.divf %125, %126 : vector<16x1xf32>
    %128 = vector.broadcast %127 : vector<16x1xf32> to vector<16x64xf32>
    %129 = arith.subf %116, %128 : vector<16x64xf32>
    %130 = arith.mulf %129, %129 : vector<16x64xf32>
    %cst_38 = arith.constant dense<0.000000e+00> : vector<16xf32>
    %131 = vector.multi_reduction <add>, %130, %cst_38 [1] : vector<16x64xf32> to vector<16xf32>
    %132 = vector.shape_cast %131 : vector<16xf32> to vector<16x1xf32>
    %cst_39 = arith.constant 6.400000e+01 : f32
    %133 = vector.broadcast %cst_39 : f32 to vector<16x1xf32>
    %134 = arith.divf %132, %133 : vector<16x1xf32>
    %135 = vector.broadcast %127 : vector<16x1xf32> to vector<16x64xf32>
    %136 = arith.subf %116, %135 : vector<16x64xf32>
    %cst_40 = arith.constant 9.99999974E-6 : f32
    %137 = vector.broadcast %cst_40 : f32 to vector<16x1xf32>
    %138 = arith.addf %134, %137 : vector<16x1xf32>
    %139 = math.rsqrt %138 : vector<16x1xf32>
    %140 = vector.broadcast %139 : vector<16x1xf32> to vector<16x64xf32>
    %141 = arith.mulf %136, %140 : vector<16x64xf32>
    %142 = vector.broadcast %117 : vector<1x64xf32> to vector<16x64xf32>
    %143 = arith.mulf %141, %142 : vector<16x64xf32>
    %144 = vector.broadcast %118 : vector<1x64xf32> to vector<16x64xf32>
    %145 = arith.addf %143, %144 : vector<16x64xf32>
    %146 = arith.truncf %145 : vector<16x64xf32> to vector<16x64xbf16>
    %c1 = arith.constant 1 : index
    %c0_41 = arith.constant 0 : index
    %c0_42 = arith.constant 0 : index
    %147 = vector.load %arg2[%c1, %c0_41, %c0_42] : memref<2x64x192xbf16, #tpu.memory_space<vmem>>, vector<1x64x192xbf16>
    %148 = vector.shape_cast %147 : vector<1x64x192xbf16> to vector<64x192xbf16>
    %cst_43 = arith.constant dense<0.000000e+00> : vector<16x192xf32>
    %149 = tpu.matmul %146, %148, %cst_43 {dimension_numbers = #tpu.dot_dimension_numbers<[1], [0], [0], [1], [0, 0, 1, 1], [], []>} : vector<16x64xbf16>, vector<64x192xbf16>, vector<16x192xf32> -> vector<16x192xf32>
    %150 = arith.truncf %149 : vector<16x192xf32> to vector<16x192xbf16>
    %151 = vector.extract_strided_slice %150 {offsets = [0, 0], sizes = [16, 64], strides = [1, 1]} : vector<16x192xbf16> to vector<16x64xbf16>
    %152 = vector.shape_cast %151 : vector<16x64xbf16> to vector<2x8x4x16xbf16>
    %153 = tpu.transpose %152, [0, 2, 1, 3] : vector<2x8x4x16xbf16> -> vector<2x4x8x16xbf16>
    %154 = vector.shape_cast %153 : vector<2x4x8x16xbf16> to vector<8x8x16xbf16>
    %155 = vector.extract_strided_slice %150 {offsets = [0, 64], sizes = [16, 64], strides = [1, 1]} : vector<16x192xbf16> to vector<16x64xbf16>
    %156 = vector.shape_cast %155 : vector<16x64xbf16> to vector<2x8x4x16xbf16>
    %157 = tpu.transpose %156, [0, 2, 1, 3] : vector<2x8x4x16xbf16> -> vector<2x4x8x16xbf16>
    %158 = vector.shape_cast %157 : vector<2x4x8x16xbf16> to vector<8x8x16xbf16>
    %159 = vector.extract_strided_slice %150 {offsets = [0, 128], sizes = [16, 64], strides = [1, 1]} : vector<16x192xbf16> to vector<16x64xbf16>
    %160 = vector.shape_cast %159 : vector<16x64xbf16> to vector<2x8x4x16xbf16>
    %161 = tpu.transpose %160, [0, 2, 1, 3] : vector<2x8x4x16xbf16> -> vector<2x4x8x16xbf16>
    %162 = vector.shape_cast %161 : vector<2x4x8x16xbf16> to vector<8x8x16xbf16>
    "tpu.trace_start"() <{level = 10 : i32, message = "gqd,gkd->gqk"}> : () -> ()
    %cst_44 = arith.constant dense<0.000000e+00> : vector<8x8x8xf32>
    %163 = tpu.matmul %154, %158, %cst_44 {dimension_numbers = #tpu.dot_dimension_numbers<[2], [2], [1], [1], [0, 0, 0, 1, 1, 1], [0], [0]>} : vector<8x8x16xbf16>, vector<8x8x16xbf16>, vector<8x8x8xf32> -> vector<8x8x8xf32>
    "tpu.trace_stop"() : () -> ()
    %cst_45 = arith.constant 1.250000e-01 : f32
    %164 = vector.broadcast %cst_45 : f32 to vector<8x8x8xf32>
    %165 = arith.mulf %163, %164 : vector<8x8x8xf32>
    %166 = arith.addf %165, %11 : vector<8x8x8xf32>
    %167 = math.exp %166 : vector<8x8x8xf32>
    %cst_46 = arith.constant dense<0.000000e+00> : vector<8x8xf32>
    %168 = vector.multi_reduction <add>, %167, %cst_46 [2] : vector<8x8x8xf32> to vector<8x8xf32>
    %169 = vector.shape_cast %168 : vector<8x8xf32> to vector<8x8x1xf32>
    %170 = tpu.reciprocal %169 {approx = true} : vector<8x8x1xf32> -> vector<8x8x1xf32>
    %171 = vector.broadcast %170 : vector<8x8x1xf32> to vector<8x8x8xf32>
    %172 = arith.mulf %167, %171 : vector<8x8x8xf32>
    %173 = arith.truncf %172 : vector<8x8x8xf32> to vector<8x8x8xbf16>
    "tpu.trace_start"() <{level = 10 : i32, message = "gqk,gkd->gqd"}> : () -> ()
    %cst_47 = arith.constant dense<0.000000e+00> : vector<8x8x16xf32>
    %174 = tpu.matmul %173, %162, %cst_47 {dimension_numbers = #tpu.dot_dimension_numbers<[2], [1], [1], [2], [0, 0, 0, 1, 1, 2], [0], [0]>} : vector<8x8x8xbf16>, vector<8x8x16xbf16>, vector<8x8x16xf32> -> vector<8x8x16xf32>
    "tpu.trace_stop"() : () -> ()
    %175 = vector.shape_cast %174 : vector<8x8x16xf32> to vector<2x4x8x16xf32>
    %176 = tpu.transpose %175, [0, 2, 1, 3] : vector<2x4x8x16xf32> -> vector<2x8x4x16xf32>
    %177 = vector.shape_cast %176 : vector<2x8x4x16xf32> to vector<16x64xf32>
    %178 = arith.truncf %177 : vector<16x64xf32> to vector<16x64xbf16>
    %c1_48 = arith.constant 1 : index
    %c0_49 = arith.constant 0 : index
    %c0_50 = arith.constant 0 : index
    %179 = vector.load %arg3[%c1_48, %c0_49, %c0_50] : memref<2x64x64xbf16, #tpu.memory_space<vmem>>, vector<1x64x64xbf16>
    %180 = vector.shape_cast %179 : vector<1x64x64xbf16> to vector<64x64xbf16>
    %cst_51 = arith.constant dense<0.000000e+00> : vector<16x64xf32>
    %181 = tpu.matmul %178, %180, %cst_51 {dimension_numbers = #tpu.dot_dimension_numbers<[1], [0], [0], [1], [0, 0, 1, 1], [], []>} : vector<16x64xbf16>, vector<64x64xbf16>, vector<16x64xf32> -> vector<16x64xf32>
    %182 = vector.broadcast %119 : vector<1x64xf32> to vector<16x64xf32>
    %183 = arith.addf %181, %182 : vector<16x64xf32>
    %184 = arith.addf %116, %183 : vector<16x64xf32>
    %cst_52 = arith.constant dense<0.000000e+00> : vector<16xf32>
    %185 = vector.multi_reduction <add>, %184, %cst_52 [1] : vector<16x64xf32> to vector<16xf32>
    %186 = vector.shape_cast %185 : vector<16xf32> to vector<16x1xf32>
    %cst_53 = arith.constant 6.400000e+01 : f32
    %187 = vector.broadcast %cst_53 : f32 to vector<16x1xf32>
    %188 = arith.divf %186, %187 : vector<16x1xf32>
    %189 = vector.broadcast %188 : vector<16x1xf32> to vector<16x64xf32>
    %190 = arith.subf %184, %189 : vector<16x64xf32>
    %191 = arith.mulf %190, %190 : vector<16x64xf32>
    %cst_54 = arith.constant dense<0.000000e+00> : vector<16xf32>
    %192 = vector.multi_reduction <add>, %191, %cst_54 [1] : vector<16x64xf32> to vector<16xf32>
    %193 = vector.shape_cast %192 : vector<16xf32> to vector<16x1xf32>
    %cst_55 = arith.constant 6.400000e+01 : f32
    %194 = vector.broadcast %cst_55 : f32 to vector<16x1xf32>
    %195 = arith.divf %193, %194 : vector<16x1xf32>
    %196 = vector.broadcast %188 : vector<16x1xf32> to vector<16x64xf32>
    %197 = arith.subf %184, %196 : vector<16x64xf32>
    %cst_56 = arith.constant 9.99999974E-6 : f32
    %198 = vector.broadcast %cst_56 : f32 to vector<16x1xf32>
    %199 = arith.addf %195, %198 : vector<16x1xf32>
    %200 = math.rsqrt %199 : vector<16x1xf32>
    %201 = vector.broadcast %200 : vector<16x1xf32> to vector<16x64xf32>
    %202 = arith.mulf %197, %201 : vector<16x64xf32>
    %203 = vector.broadcast %120 : vector<1x64xf32> to vector<16x64xf32>
    %204 = arith.mulf %202, %203 : vector<16x64xf32>
    %205 = vector.broadcast %121 : vector<1x64xf32> to vector<16x64xf32>
    %206 = arith.addf %204, %205 : vector<16x64xf32>
    %207 = arith.truncf %206 : vector<16x64xf32> to vector<16x64xbf16>
    %c1_57 = arith.constant 1 : index
    %c0_58 = arith.constant 0 : index
    %c0_59 = arith.constant 0 : index
    %208 = vector.load %arg4[%c1_57, %c0_58, %c0_59] : memref<2x64x256xbf16, #tpu.memory_space<vmem>>, vector<1x64x256xbf16>
    %209 = vector.shape_cast %208 : vector<1x64x256xbf16> to vector<64x256xbf16>
    %cst_60 = arith.constant dense<0.000000e+00> : vector<16x256xf32>
    %210 = tpu.matmul %207, %209, %cst_60 {dimension_numbers = #tpu.dot_dimension_numbers<[1], [0], [0], [1], [0, 0, 1, 1], [], []>} : vector<16x64xbf16>, vector<64x256xbf16>, vector<16x256xf32> -> vector<16x256xf32>
    %211 = vector.broadcast %122 : vector<1x256xf32> to vector<16x256xf32>
    %212 = arith.addf %210, %211 : vector<16x256xf32>
    %cst_61 = arith.constant 0.000000e+00 : f32
    %213 = vector.broadcast %cst_61 : f32 to vector<16x256xf32>
    %214 = arith.maximumf %212, %213 : vector<16x256xf32>
    %215 = arith.truncf %214 : vector<16x256xf32> to vector<16x256xbf16>
    %c1_62 = arith.constant 1 : index
    %c0_63 = arith.constant 0 : index
    %c0_64 = arith.constant 0 : index
    %216 = vector.load %arg5[%c1_62, %c0_63, %c0_64] : memref<2x256x64xbf16, #tpu.memory_space<vmem>>, vector<1x256x64xbf16>
    %217 = vector.shape_cast %216 : vector<1x256x64xbf16> to vector<256x64xbf16>
    %cst_65 = arith.constant dense<0.000000e+00> : vector<16x64xf32>
    %218 = tpu.matmul %215, %217, %cst_65 {dimension_numbers = #tpu.dot_dimension_numbers<[1], [0], [0], [1], [0, 0, 1, 1], [], []>} : vector<16x256xbf16>, vector<256x64xbf16>, vector<16x64xf32> -> vector<16x64xf32>
    %219 = vector.broadcast %123 : vector<1x64xf32> to vector<16x64xf32>
    %220 = arith.addf %218, %219 : vector<16x64xf32>
    %221 = arith.addf %184, %220 : vector<16x64xf32>
    %222 = vector.extract_strided_slice %2 {offsets = [14, 0], sizes = [1, 64], strides = [1, 1]} : vector<17x256xf32> to vector<1x64xf32>
    %223 = vector.extract_strided_slice %2 {offsets = [15, 0], sizes = [1, 64], strides = [1, 1]} : vector<17x256xf32> to vector<1x64xf32>
    %224 = vector.extract_strided_slice %2 {offsets = [16, 0], sizes = [1, 128], strides = [1, 1]} : vector<17x256xf32> to vector<1x128xf32>
    %cst_66 = arith.constant dense<0.000000e+00> : vector<16xf32>
    %225 = vector.multi_reduction <add>, %221, %cst_66 [1] : vector<16x64xf32> to vector<16xf32>
    %226 = vector.shape_cast %225 : vector<16xf32> to vector<16x1xf32>
    %cst_67 = arith.constant 6.400000e+01 : f32
    %227 = vector.broadcast %cst_67 : f32 to vector<16x1xf32>
    %228 = arith.divf %226, %227 : vector<16x1xf32>
    %229 = vector.broadcast %228 : vector<16x1xf32> to vector<16x64xf32>
    %230 = arith.subf %221, %229 : vector<16x64xf32>
    %231 = arith.mulf %230, %230 : vector<16x64xf32>
    %cst_68 = arith.constant dense<0.000000e+00> : vector<16xf32>
    %232 = vector.multi_reduction <add>, %231, %cst_68 [1] : vector<16x64xf32> to vector<16xf32>
    %233 = vector.shape_cast %232 : vector<16xf32> to vector<16x1xf32>
    %cst_69 = arith.constant 6.400000e+01 : f32
    %234 = vector.broadcast %cst_69 : f32 to vector<16x1xf32>
    %235 = arith.divf %233, %234 : vector<16x1xf32>
    %236 = vector.broadcast %228 : vector<16x1xf32> to vector<16x64xf32>
    %237 = arith.subf %221, %236 : vector<16x64xf32>
    %cst_70 = arith.constant 9.99999974E-6 : f32
    %238 = vector.broadcast %cst_70 : f32 to vector<16x1xf32>
    %239 = arith.addf %235, %238 : vector<16x1xf32>
    %240 = math.rsqrt %239 : vector<16x1xf32>
    %241 = vector.broadcast %240 : vector<16x1xf32> to vector<16x64xf32>
    %242 = arith.mulf %237, %241 : vector<16x64xf32>
    %243 = vector.broadcast %222 : vector<1x64xf32> to vector<16x64xf32>
    %244 = arith.mulf %242, %243 : vector<16x64xf32>
    %245 = vector.broadcast %223 : vector<1x64xf32> to vector<16x64xf32>
    %246 = arith.addf %244, %245 : vector<16x64xf32>
    %247 = arith.truncf %246 : vector<16x64xf32> to vector<16x64xbf16>
    %c0_71 = arith.constant 0 : index
    %c0_72 = arith.constant 0 : index
    %248 = vector.load %arg6[%c0_71, %c0_72] : memref<64x128xbf16, #tpu.memory_space<vmem>>, vector<64x128xbf16>
    %cst_73 = arith.constant dense<0.000000e+00> : vector<16x128xf32>
    %249 = tpu.matmul %247, %248, %cst_73 {dimension_numbers = #tpu.dot_dimension_numbers<[1], [0], [0], [1], [0, 0, 1, 1], [], []>} : vector<16x64xbf16>, vector<64x128xbf16>, vector<16x128xf32> -> vector<16x128xf32>
    %250 = vector.broadcast %224 : vector<1x128xf32> to vector<16x128xf32>
    %251 = arith.addf %249, %250 : vector<16x128xf32>
    %252 = vector.shape_cast %251 : vector<16x128xf32> to vector<2x8x128xf32>
    %c0_74 = arith.constant 0 : index
    %c0_75 = arith.constant 0 : index
    %c0_76 = arith.constant 0 : index
    %253 = vector.load %arg8[%c0_74, %c0_75, %c0_76] : memref<2x8x128xf32, #tpu.memory_space<vmem>>, vector<2x8x128xf32>
    tpu.vector_store %arg8[%c0_74, %c0_75, %c0_76], %252 {strides = array<i32>} : memref<2x8x128xf32, #tpu.memory_space<vmem>>, vector<2x8x128xf32>,
    return
  }
  func.func @transform_0(%arg0: i32) -> (i32, i32, i32) {
    %c0_i32 = arith.constant 0 : i32
    %c0_i32_0 = arith.constant 0 : i32
    %c0_i32_1 = arith.constant 0 : i32
    return %arg0, %c0_i32, %c0_i32_0 : i32, i32, i32
  }
  func.func @transform_1(%arg0: i32) -> (i32, i32, i32) {
    %c0_i32 = arith.constant 0 : i32
    %c0_i32_0 = arith.constant 0 : i32
    %c0_i32_1 = arith.constant 0 : i32
    %c0_i32_2 = arith.constant 0 : i32
    return %c0_i32, %c0_i32_0, %c0_i32_1 : i32, i32, i32
  }
  func.func @transform_2(%arg0: i32) -> (i32, i32, i32) {
    %c0_i32 = arith.constant 0 : i32
    %c0_i32_0 = arith.constant 0 : i32
    %c0_i32_1 = arith.constant 0 : i32
    %c0_i32_2 = arith.constant 0 : i32
    return %c0_i32, %c0_i32_0, %c0_i32_1 : i32, i32, i32
  }
  func.func @transform_3(%arg0: i32) -> (i32, i32, i32) {
    %c0_i32 = arith.constant 0 : i32
    %c0_i32_0 = arith.constant 0 : i32
    %c0_i32_1 = arith.constant 0 : i32
    %c0_i32_2 = arith.constant 0 : i32
    return %c0_i32, %c0_i32_0, %c0_i32_1 : i32, i32, i32
  }
  func.func @transform_4(%arg0: i32) -> (i32, i32, i32) {
    %c0_i32 = arith.constant 0 : i32
    %c0_i32_0 = arith.constant 0 : i32
    %c0_i32_1 = arith.constant 0 : i32
    %c0_i32_2 = arith.constant 0 : i32
    return %c0_i32, %c0_i32_0, %c0_i32_1 : i32, i32, i32
  }
  func.func @transform_5(%arg0: i32) -> (i32, i32) {
    %c0_i32 = arith.constant 0 : i32
    %c0_i32_0 = arith.constant 0 : i32
    %c0_i32_1 = arith.constant 0 : i32
    return %c0_i32, %c0_i32_0 : i32, i32
  }
  func.func @transform_6(%arg0: i32) -> (i32, i32) {
    %c0_i32 = arith.constant 0 : i32
    %c0_i32_0 = arith.constant 0 : i32
    %c0_i32_1 = arith.constant 0 : i32
    return %c0_i32, %c0_i32_0 : i32, i32
  }
  func.func @transform_7(%arg0: i32) -> (i32, i32, i32) {
    %c0_i32 = arith.constant 0 : i32
    %c0_i32_0 = arith.constant 0 : i32
    %c0_i32_1 = arith.constant 0 : i32
    return %arg0, %c0_i32, %c0_i32_0 : i32, i32, i32
  }
}

</mosaic_0001>

<bundles_post_ra>
// kernel: bigram_lm_forward.1
= control target key start
LH: loop header
LB: loop body
LE: loop exit
PB: predicated region body
PF: predicated region fallthrough
CT: control target
= control target key end

     0   :  { %vm41_vm0 = vcmask 523264   ;;  %s5978_s0 = inlined_call_operand.vmem [shape: f32[2,8,64], index: 0, kind: input, shape index: {}]   ;;  %s5979_s1 = inlined_call_operand.vmem [shape: bf16[2,64,192], index: 1, kind: input, shape index: {}]   ;;  %s5980_s2 = inlined_call_operand.vmem [shape: bf16[2,64,64], index: 2, kind: input, shape index: {}]   ;;  %s5981_s3 = inlined_call_operand.vmem [shape: bf16[2,64,256], index: 3, kind: input, shape index: {}]   ;;  %s5982_s4 = inlined_call_operand.vmem [shape: bf16[2,256,64], index: 4, kind: input, shape index: {}]   ;;  %s5983_s5 = inlined_call_operand.vmem [shape: bf16[64,128], index: 5, kind: input, shape index: {}]   ;;  %s5984_s6 = inlined_call_operand.vmem [shape: f32[17,256], index: 6, kind: input, shape index: {}]   ;;  %s5985_s7 = inlined_call_operand.hbm [shape: f32[2,8,128], index: 7, kind: output, shape index: {}]  }
   0x1   :  { %v28_v0 = vld [vmem:[%s5978_s0] sm:$0xff] }
   0x2   :  { %v42_v1 = vsel %vm41_vm0, %v28_v0, 0.0 }
   0x3   :  { %12 = vsyncpa [#allocation3], 0  ;;  %43 = vadd.xlane.f32.xlu0 %v42_v1  ;;  %v29_v2 = vld [vmem:[%s5978_s0 + $0x8] sm:$0xff]  ;;  %v4497_v4 = vmov 64.0   ;;  %v3883_v21 = vld [vmem:[%s5979_s1 + $0x30] sm:$0xf] }
   0x4   :  { %v45_v3 = vsel %vm41_vm0, %v29_v2, 0.0  ;;  %4381 = vrcp.f32 %v4497_v4  ;;  %v4267_v22 = vld [vmem:[%s5979_s1 + $0x34] sm:$0xf0]  ;;  %v4266_v23 = vld [vmem:[%s5979_s1 + $0x34] sm:$0xf]  ;;  %v30_v62 = vld [vmem:[%s5984_s6] sm:$0xff] }
   0x5   :  { %v3884_v24 = vor.u32 %v4267_v22, %v3883_v21  ;;  %v3885_v25 = vld [vmem:[%s5979_s1 + $0x38] sm:$0xf0]  ;;  %v3875_v27 = vld [vmem:[%s5979_s1 + $0x20] sm:$0xf]  ;;  %v4265_v28 = vld [vmem:[%s5979_s1 + $0x24] sm:$0xf0] }
   0x6   :  { %v3888_v26 = vor.u32 %v4266_v23, %v3885_v25  ;;  %v4264_v29 = vld [vmem:[%s5979_s1 + $0x24] sm:$0xf]  ;;  %v3876_v30 = vor.u32 %v4265_v28, %v3875_v27  ;;  %v3877_v31 = vld [vmem:[%s5979_s1 + $0x28] sm:$0xf0]  ;;  %v3867_v33 = vld [vmem:[%s5979_s1 + $0x10] sm:$0xf] }
   0x7   :  { %155 = vmatpush.bf16.msra.mxu0 %v3884_v24  ;;  %v3880_v32 = vor.u32 %v4264_v29, %v3877_v31  ;;  %v4263_v34 = vld [vmem:[%s5979_s1 + $0x14] sm:$0xf0]  ;;  %v4262_v35 = vld [vmem:[%s5979_s1 + $0x14] sm:$0xf]  ;;  %v3869_v37 = vld [vmem:[%s5979_s1 + $0x18] sm:$0xf0] }
   0x8   :  { %169 = vmatpush.bf16.msra.mxu1 %v3888_v26  ;;  %v3868_v36 = vor.u32 %v4263_v34, %v3867_v33  ;;  %v3872_v38 = vor.u32 %v4262_v35, %v3869_v37  ;;  %v3859_v39 = vld [vmem:[%s5979_s1] sm:$0xf]  ;;  %v4261_v40 = vld [vmem:[%s5979_s1 + $0x4] sm:$0xf0]  ;;  %v4260_v41 = vld [vmem:[%s5979_s1 + $0x4] sm:$0xf] }
   0x9   :  { %v3860_v43 = vor.u32 %v4261_v40, %v3859_v39  ;;  %v3861_v44 = vld [vmem:[%s5979_s1 + $0x8] sm:$0xf0]  ;;  %v93_v1 = vperm.slane %v30_v62, 0  ;;  %s4498_s16 = smov 80   ;;  %s4499_s17 = smov 112   ;;  %vm230_vm8 = vcmask 1047556  }
   0xa   :  { %v4382_v5 = vpop.eup %4381  ;;  %v3864_v46 = vor.u32 %v4260_v41, %v3861_v44  ;;  %s4500_s18 = smov 96   ;;  %s4501_s19 = smov 64   ;;  %vm1141_vm9 = vcmask 1043456   ;;  %vm904_vm10 = vcmask 130048   ;;  %vm1089_vm12 = vcmask 64512  }
   0xb   :  { %46 = vadd.xlane.f32.xlu0 %v45_v3  ;;  %v49_v6 = vmul.f32 64.0, %v4382_v5  ;;  %vm53_vm1 = vweird.f32 %v4382_v5  ;;  %156 = vmatpush.bf16.msra.mxu0 %v3876_v30  ;;  %s4505_s20 = smov 32   ;;  %s4506_s21 = smov 48   ;;  %vm1538_vm13 = vcmask 261120   ;;  %vm1541_vm14 = vcmask 392192  }
   0xc   :  { %170 = vmatpush.bf16.msra.mxu1 %v3880_v32  ;;  %s4507_s22 = smov 16   ;;  %s4510_s13 = smov 8  }
   0xd   :  { %v50_v7 = vsub.f32 1.0, %v49_v6  ;;  %v96_v6 = vperm.slane %v30_v62, 1 }
   0xf   :  { %v51_v8 = vmul.f32 %v4382_v5, %v50_v7  ;;  %157 = vmatpush.bf16.msra.mxu0 %v3868_v36 }
  0x10   :  { %171 = vmatpush.bf16.msra.mxu1 %v3872_v38 }
  0x11   :  { %v52_v9 = vadd.f32 %v4382_v5, %v51_v8 }
  0x13   :  { %v4559_v10 = vsel %vm53_vm1, %v4382_v5, %v52_v9  ;;  %158 = vmatpush.bf16.msra.mxu0 %v3860_v43 }
  0x14   :  { %172 = vmatpush.bf16.msra.mxu1 %v3864_v46 }
  0x76   :  { %v44_v11 = vpop.xlane.xlu0 %43 }
  0x77   :  { %v55_v12 = vmul.f32 %v4559_v10, %v44_v11 }
  0x79   :  { %v4562_v13 = vsub.f32 %v28_v0, %v55_v12 }
  0x7b   :  { %v59_v14 = vmul.f32 %v4562_v13, %v4562_v13 }
  0x7d   :  { %v61_v15 = vsel %vm41_vm0, %v59_v14, 0.0 }
  0x7e   :  { %62 = vadd.xlane.f32.xlu1 %v61_v15  ;;  %v47_v16 = vpop.xlane.xlu0 %46 }
  0x7f   :  { %v56_v17 = vmul.f32 %v4559_v10, %v47_v16 }
  0x81   :  { %v4568_v18 = vsub.f32 %v29_v2, %v56_v17 }
  0x83   :  { %v60_v19 = vmul.f32 %v4568_v18, %v4568_v18 }
  0x85   :  { %v64_v20 = vsel %vm41_vm0, %v60_v19, 0.0 }
  0x86   :  { %65 = vadd.xlane.f32.xlu1 %v64_v20  ;;  %v4502_v20 = vmov 1983009808  }
  0x87   :  { %v221_v21 = vunpack.c.l.s4 %v4502_v20 }
  0x89   :  { %v4648_v25 = vunpack.c.0.s8 %v221_v21 }
  0xf1   :  { %v63_v42 = vpop.xlane.xlu1 %62 }
  0xf2   :  { %v67_v45 = vmul.f32 %v63_v42, %v4559_v10 }
  0xf4   :  { %v69_v47 = vadd.f32 1e-05, %v67_v45 }
  0xf6   :  { %4383 = vrsqrt.f32 %v69_v47  ;;  %vm77_vm3 = vweird.f32 %v69_v47 }
  0xf9   :  { %v66_v48 = vpop.xlane.xlu1 %65 }
  0xfa   :  { %v68_v49 = vmul.f32 %v66_v48, %v4559_v10 }
  0xfc   :  { %v4384_v50 = vpop.eup %4383  ;;  %v70_v51 = vadd.f32 1e-05, %v68_v49 }
  0xfd   :  { %v72_v52 = vmul.f32 %v4384_v50, %v69_v47  ;;  %vm78_vm2 = vweird.f32 %v4384_v50 }
  0xfe   :  { %4385 = vrsqrt.f32 %v70_v51  ;;  %vm79_vm4 = vmor %vm77_vm3, %vm78_vm2  ;;  %vm87_vm6 = vweird.f32 %v70_v51 }
  0xff   :  { %v73_v53 = vmul.f32 %v4384_v50, %v72_v52 }
 0x101   :  { %v74_v54 = vmul.f32 0.5, %v73_v53 }
 0x103   :  { %v75_v55 = vsub.f32 1.5, %v74_v54 }
 0x104   :  { %v4386_v56 = vpop.eup %4385 }
 0x105   :  { %v76_v57 = vmul.f32 %v4384_v50, %v75_v55  ;;  %v82_v58 = vmul.f32 %v4386_v56, %v70_v51  ;;  %vm88_vm5 = vweird.f32 %v4386_v56  ;;  %v4503_v55 = vmov 1934713408  }
 0x106   :  { %vm89_vm7 = vmor %vm87_vm6, %vm88_vm5 }
 0x107   :  { %v83_v59 = vmul.f32 %v4386_v56, %v82_v58  ;;  %v80_v60 = vsel %vm79_vm4, %v4384_v50, %v76_v57 }
 0x108   :  { %v91_v0 = vmul.f32 %v80_v60, %v4562_v13 }
 0x109   :  { %v84_v61 = vmul.f32 0.5, %v83_v59 }
 0x10a   :  { %v94_v5 = vmul.f32 %v93_v1, %v91_v0 }
 0x10b   :  { %v85_v63 = vsub.f32 1.5, %v84_v61 }
 0x10c   :  { %v97_v8 = vadd.f32 %v96_v6, %v94_v5 }
 0x10d   :  { %v86_v2 = vmul.f32 %v4386_v56, %v85_v63 }
 0x10f   :  { %v90_v3 = vsel %vm89_vm7, %v4386_v56, %v86_v2  ;;  %v235_v56 = vunpack.c.l.s4 %v4503_v55 }
 0x110   :  { %v92_v4 = vmul.f32 %v90_v3, %v4568_v18 }
 0x111   :  { %v4675_v3 = vunpack.c.0.s8 %v235_v56 }
 0x112   :  { %v95_v7 = vmul.f32 %v93_v1, %v92_v4 }
 0x114   :  { %v98_v9 = vadd.f32 %v96_v6, %v95_v7 }
 0x116   :  { %v99_v11 = vpack.c.bf16 %v98_v9, %v97_v8 }
 0x118   :  { %3889 = vmatmul.msk.bf16.vlgmr.msra.gmra.mxu0 %vm41_vm0, %v99_v11  ;;  %3890 = vmatmul.msk.bf16.vlgmr.msra.gmra.mxu1 %vm41_vm0, %v99_v11 }
 0x195   :  { %v160_v12 = vpop.f32.mrf.mxu0  ;;  %v174_v14 = vpop.f32.mrf.mxu1 }
 0x196   :  { %v179_v13 = vpack.c.bf16 %v174_v14, %v160_v12 }
 0x198   :  { %191 = vrot.lane.b32.xlu0 %v179_v13, %s4498_s16  ;;  %183 = vrot.lane.b32.xlu2 %v179_v13, %s4499_s17  ;;  %v198_v24 = vshrl.u32 %v179_v13, 16  ;;  %v668_v31 = vrot.slane %v179_v13, 4 }
 0x19a   :  { %v679_v49 = vshrl.u32 %v668_v31, 16 }
 0x19d   :  { %v162_v15 = vpop.f32.mrf.mxu0  ;;  %v176_v16 = vpop.f32.mrf.mxu1 }
 0x19e   :  { %v4632_v17 = vpack.c.bf16 %v176_v16, %v162_v15 }
 0x1a0   :  { %187 = vrot.lane.b32.xlu2 %v179_v13, %s4500_s18  ;;  %185 = vrot.lane.b32.xlu1 %v4632_v17, %s4499_s17  ;;  %v669_v8 = vrot.slane %v4632_v17, 4 }
 0x1a8   :  { %424 = vrot.lane.b32.xlu2 %v179_v13, %s4501_s19 }
 0x1b0   :  { %189 = vrot.lane.b32.xlu2 %v4632_v17, %s4500_s18 }
 0x1b8   :  { %193 = vrot.lane.b32.xlu2 %v4632_v17, %s4498_s16 }
 0x1f2   :  { %v184_v18 = vpop.permute.xlu2 %183 }
 0x1f3   :  { %428 = vrot.lane.b32.xlu0 %v184_v18, %s4501_s19  ;;  %v199_v22 = vshrl.u32 %v184_v18, 16  ;;  %v197_v26 = vpack.i.b16 %v184_v18, %v179_v13  ;;  %v670_v28 = vrot.slane %v184_v18, 4 }
 0x1f5   :  { %v200_v27 = vpack.i.b16 %v199_v22, %v198_v24  ;;  %v223_v29 = vperm.slane %v197_v26, %v4648_v25  ;;  %v678_v38 = vpack.i.b16 %v670_v28, %v668_v31  ;;  %v680_v44 = vshrl.u32 %v670_v28, 16 }
 0x1f6   :  { %v691_v26 = vshrl.u32 %v669_v8, 16 }
 0x1f7   :  { %v250_v30 = vperm.slane %v200_v27, %v4648_v25  ;;  %v232_v39 = vrot.slane %v223_v29, 4  ;;  %v704_v50 = vperm.slane %v678_v38, %v4648_v25  ;;  %v681_v59 = vpack.i.b16 %v680_v44, %v679_v49 }
 0x1f9   :  { %v258_v43 = vrot.slane %v250_v30, 4  ;;  %v712_v63 = vrot.slane %v704_v50, 4  ;;  %v730_v2 = vperm.slane %v681_v59, %v4648_v25 }
 0x1fa   :  { %v188_v19 = vpop.permute.xlu2 %187 }
 0x1fb   :  { %426 = vrot.lane.b32.xlu0 %v4632_v17, %s4501_s19  ;;  %432 = vrot.lane.b32.xlu2 %v188_v19, %s4501_s19  ;;  %v204_v34 = vshrl.u32 %v188_v19, 16  ;;  %v672_v40 = vrot.slane %v188_v19, 4  ;;  %v738_v15 = vrot.slane %v730_v2, 4 }
 0x1fd   :  { %v685_v60 = vshrl.u32 %v672_v40, 16 }
 0x202   :  { %v4646_v23 = vpop.permute.xlu2 %424 }
 0x20a   :  { %v192_v32 = vpop.permute.xlu0 %191  ;;  %v4652_v33 = vpop.permute.xlu2 %189 }
 0x20b   :  { %v203_v35 = vpack.i.b16 %v192_v32, %v188_v19  ;;  %v205_v36 = vshrl.u32 %v192_v32, 16  ;;  %v674_v37 = vrot.slane %v192_v32, 4  ;;  %436 = vrot.lane.b32.xlu1 %v192_v32, %s4501_s19  ;;  %v673_v1 = vrot.slane %v4652_v33, 4 }
 0x20d   :  { %v206_v41 = vpack.i.b16 %v205_v36, %v204_v34  ;;  %v228_v42 = vperm.slane %v203_v35, %v4648_v25  ;;  %v684_v48 = vpack.i.b16 %v674_v37, %v672_v40  ;;  %v686_v54 = vshrl.u32 %v674_v37, 16 }
 0x20e   :  { %v697_v12 = vshrl.u32 %v673_v1, 16 }
 0x20f   :  { %v229_v45 = vrot.slane %v228_v42, 4  ;;  %v233_v46 = vsel %vm230_vm8, %v228_v42, %v232_v39  ;;  %v255_v47 = vperm.slane %v206_v41, %v4648_v25  ;;  %v709_v62 = vperm.slane %v684_v48, %v4648_v25 }
 0x210   :  { %v687_v0 = vpack.i.b16 %v686_v54, %v685_v60  ;;  %v241_v16 = vperm.slane %v233_v46, %v4675_v3 }
 0x211   :  { %v231_v51 = vsel %vm230_vm8, %v229_v45, %v223_v29  ;;  %v256_v52 = vrot.slane %v255_v47, 4  ;;  %v259_v53 = vsel %vm230_vm8, %v255_v47, %v258_v43  ;;  %v713_v4 = vsel %vm230_vm8, %v709_v62, %v712_v63 }
 0x212   :  { %v4661_v57 = vpop.permute.xlu2 %193  ;;  %v4663_v58 = vpop.permute.xlu1 %185  ;;  %v710_v6 = vrot.slane %v709_v62, 4  ;;  %v735_v7 = vperm.slane %v687_v0, %v4648_v25  ;;  %v721_v11 = vperm.slane %v713_v4, %v4675_v3  ;;  %v267_v28 = vperm.slane %v259_v53, %v4675_v3 }
 0x213   :  { %v257_v61 = vsel %vm230_vm8, %v256_v52, %v250_v30  ;;  %438 = vrot.lane.b32.xlu0 %v4661_v57, %s4501_s19  ;;  %434 = vrot.lane.b32.xlu1 %v4652_v33, %s4501_s19  ;;  %v675_v5 = vrot.slane %v4661_v57, 4  ;;  %v671_v9 = vrot.slane %v4663_v58, 4  ;;  %v4690_v32 = vrot.slane %v241_v16, 4 }
 0x214   :  { %430 = vrot.lane.b32.xlu2 %v4663_v58, %s4501_s19  ;;  %v711_v22 = vsel %vm230_vm8, %v710_v6, %v704_v50  ;;  %v739_v24 = vsel %vm230_vm8, %v735_v7, %v738_v15  ;;  %v724_v29 = vrot.slane %v721_v11, 4  ;;  %v237_v38 = vperm.slane %v231_v51, %v4675_v3 }
 0x215   :  { %v696_v14 = vpack.i.b16 %v675_v5, %v673_v1  ;;  %v698_v13 = vshrl.u32 %v675_v5, 16  ;;  %v690_v18 = vpack.i.b16 %v671_v9, %v669_v8  ;;  %v692_v21 = vshrl.u32 %v671_v9, 16 }
 0x216   :  { %v717_v36 = vperm.slane %v711_v22, %v4675_v3  ;;  %v747_v37 = vperm.slane %v739_v24, %v4675_v3  ;;  %v736_v39 = vrot.slane %v735_v7, 4  ;;  %v4697_v42 = vrot.slane %v267_v28, 4 }
 0x217   :  { %v699_v19 = vpack.i.b16 %v698_v13, %v697_v12  ;;  %v761_v20 = vperm.slane %v696_v14, %v4648_v25  ;;  %v756_v27 = vperm.slane %v690_v18, %v4648_v25  ;;  %v693_v34 = vpack.i.b16 %v692_v21, %v691_v26 }
 0x218   :  { %v725_v43 = vsel %vm230_vm8, 0, %v724_v29  ;;  %v245_v46 = vsel %vm230_vm8, 0, %v4690_v32  ;;  %v263_v47 = vperm.slane %v257_v61, %v4675_v3  ;;  %v750_v50 = vrot.slane %v747_v37, 4 }
 0x219   :  { %v762_v30 = vrot.slane %v761_v20, 4  ;;  %v787_v31 = vperm.slane %v699_v19, %v4648_v25  ;;  %v764_v35 = vrot.slane %v756_v27, 4  ;;  %v782_v49 = vperm.slane %v693_v34, %v4648_v25 }
 0x21a   :  { %v722_v52 = vrot.slane %v717_v36, 4  ;;  %v242_v53 = vrot.slane %v237_v38, 4  ;;  %v737_v54 = vsel %vm230_vm8, %v736_v39, %v730_v2  ;;  %v809_v55 = vrot.slane %v725_v43, 4 }
 0x21b   :  { %v763_v40 = vsel %vm230_vm8, %v762_v30, %v756_v27  ;;  %v765_v41 = vsel %vm230_vm8, %v761_v20, %v764_v35  ;;  %v788_v44 = vrot.slane %v787_v31, 4  ;;  %v271_v56 = vsel %vm230_vm8, 0, %v4697_v42 }
 0x21c   :  { %v773_v45 = vperm.slane %v765_v41, %v4675_v3  ;;  %v769_v48 = vperm.slane %v763_v40, %v4675_v3  ;;  %v329_v59 = vrot.slane %v245_v46, 4  ;;  %v268_v61 = vrot.slane %v263_v47, 4 }
 0x21d   :  { %v789_v62 = vsel %vm230_vm8, %v788_v44, %v782_v49  ;;  %v790_v0 = vrot.slane %v782_v49, 4  ;;  %v723_v4 = vsel %vm230_vm8, 0, %v722_v52  ;;  %v743_v5 = vperm.slane %v737_v54, %v4675_v3 }
 0x21e   :  { %v776_v51 = vrot.slane %v773_v45, 4  ;;  %v774_v63 = vrot.slane %v769_v48, 4  ;;  %v795_v1 = vperm.slane %v789_v62, %v4675_v3  ;;  %v751_v2 = vsel %vm230_vm8, 0, %v750_v50 }
 0x21f   :  { %v804_v6 = vsel %vm230_vm8, %v724_v29, %v717_v36  ;;  %v348_v7 = vrot.slane %v271_v56, 4  ;;  %v791_v8 = vsel %vm230_vm8, %v787_v31, %v790_v0  ;;  %v810_v11 = vsel %vm230_vm8, %v809_v55, %v723_v4 }
 0x220   :  { %v777_v60 = vsel %vm230_vm8, 0, %v776_v51  ;;  %v799_v12 = vperm.slane %v791_v8, %v4675_v3  ;;  %v748_v14 = vrot.slane %v743_v5, 4  ;;  %v814_v13 = vperm.slane %v810_v11, %v4648_v25 }
 0x221   :  { %v847_v9 = vrot.slane %v777_v60, 4  ;;  %v823_v15 = vsel %vm230_vm8, %v750_v50, %v743_v5  ;;  %v800_v16 = vrot.slane %v795_v1, 4  ;;  %v808_v18 = vperm.slane %v804_v6, %v4648_v25 }
 0x222   :  { %v827_v19 = vperm.slane %v823_v15, %v4648_v25  ;;  %v828_v20 = vrot.slane %v751_v2, 4  ;;  %v802_v21 = vrot.slane %v799_v12, 4  ;;  %v749_v22 = vsel %vm230_vm8, 0, %v748_v14 }
 0x223   :  { %v815_v24 = vrot.slane %v814_v13, 4  ;;  %v775_v26 = vsel %vm230_vm8, 0, %v774_v63  ;;  %v842_v28 = vsel %vm230_vm8, %v776_v51, %v769_v48  ;;  %v243_v35 = vsel %vm230_vm8, 0, %v242_v53 }
 0x224   :  { %v829_v27 = vsel %vm230_vm8, %v828_v20, %v749_v22  ;;  %v848_v29 = vsel %vm230_vm8, %v847_v9, %v775_v26  ;;  %v803_v34 = vsel %vm230_vm8, 0, %v802_v21  ;;  %v801_v36 = vsel %vm230_vm8, 0, %v800_v16 }
 0x225   :  { %v816_v30 = vsel %vm230_vm8, %v815_v24, %v808_v18  ;;  %v833_v31 = vperm.slane %v829_v27, %v4648_v25  ;;  %v846_v37 = vperm.slane %v842_v28, %v4648_v25  ;;  %v852_v39 = vperm.slane %v848_v29, %v4648_v25 }
 0x226   :  { %v866_v40 = vrot.slane %v803_v34, 4  ;;  %v861_v43 = vsel %vm230_vm8, %v802_v21, %v795_v1  ;;  %v269_v44 = vsel %vm230_vm8, 0, %v268_v61  ;;  %v324_v45 = vsel %vm230_vm8, %v4690_v32, %v237_v38 }
 0x227   :  { %v834_v41 = vrot.slane %v833_v31, 4  ;;  %v820_v46 = vperm.slane %v816_v30, %v4675_v3  ;;  %v853_v48 = vrot.slane %v852_v39, 4  ;;  %v330_v50 = vsel %vm230_vm8, %v329_v59, %v243_v35 }
 0x228   :  { %v867_v49 = vsel %vm230_vm8, %v866_v40, %v801_v36  ;;  %v334_v53 = vperm.slane %v330_v50, %v4648_v25  ;;  %v343_v54 = vsel %vm230_vm8, %v4697_v42, %v263_v47  ;;  %v865_v38 = vperm.slane %v861_v43, %v4648_v25 }
 0x229   :  { %v835_v51 = vsel %vm230_vm8, %v834_v41, %v827_v19  ;;  %v871_v52 = vperm.slane %v867_v49, %v4648_v25  ;;  %v854_v32 = vsel %vm230_vm8, %v853_v48, %v846_v37  ;;  %v349_v56 = vsel %vm230_vm8, %v348_v7, %v269_v44 }
 0x22a   :  { %v839_v55 = vperm.slane %v835_v51, %v4675_v3  ;;  %v328_v59 = vperm.slane %v324_v45, %v4648_v25  ;;  %v335_v62 = vrot.slane %v334_v53, 4  ;;  %v353_v61 = vperm.slane %v349_v56, %v4648_v25 }
 0x22b   :  { %v872_v60 = vrot.slane %v871_v52, 4  ;;  %v347_v0 = vperm.slane %v343_v54, %v4648_v25  ;;  %v883_v1 = vshrl.u32 %v820_v46, 16  ;;  %v858_v42 = vperm.slane %v854_v32, %v4675_v3 }
 0x22c   :  { %v882_v63 = vpack.i.b16 %v839_v55, %v820_v46  ;;  %v884_v4 = vshrl.u32 %v839_v55, 16  ;;  %v336_v5 = vsel %vm230_vm8, %v335_v62, %v328_v59  ;;  %v354_v2 = vrot.slane %v353_v61, 4 }
 0x22d   :  { %v873_v47 = vsel %vm230_vm8, %v872_v60, %v865_v38  ;;  %v4760_v8 = vperm.slane %v336_v5, %v4675_v3  ;;  %v895_v13 = vshrl.u32 %v858_v42, 16  ;;  %v821_v28 = vrot.slane %v820_v46, 4 }
 0x22e   :  { %v1143_v6 = vsel %vm1141_vm9, %v882_v63, 0  ;;  %v877_v7 = vperm.slane %v873_v47, %v4675_v3  ;;  %v4762_v9 = vpack.i.b16 %v884_v4, %v883_v1  ;;  %v355_v11 = vsel %vm230_vm8, %v354_v2, %v347_v0 }
 0x22f   :  { %1152 = vmatpush.bf16.msrb.mxu0 %v1143_v6  ;;  %v4766_v14 = vperm.slane %v355_v11, %v4675_v3  ;;  %v341_v16 = vrot.slane %v4760_v8, 4  ;;  %v403_v20 = vshrl.u32 %v4760_v8, 16  ;;  %v840_v29 = vrot.slane %v839_v55, 4 }
 0x230   :  { %v894_v12 = vpack.i.b16 %v877_v7, %v858_v42  ;;  %v896_v15 = vshrl.u32 %v877_v7, 16  ;;  %v4788_v34 = vsel %vm230_vm8, 0, %v821_v28  ;;  %v859_v40 = vrot.slane %v858_v42, 4 }
 0x231   :  { %v402_v19 = vpack.i.b16 %v4766_v14, %v4760_v8  ;;  %v404_v21 = vshrl.u32 %v4766_v14, 16  ;;  %v360_v24 = vrot.slane %v4766_v14, 4  ;;  %v4780_v27 = vsel %vm230_vm8, 0, %v341_v16 }
 0x232   :  { %v1219_v18 = vsel %vm1141_vm9, %v894_v12, 0  ;;  %v4774_v22 = vpack.i.b16 %v896_v15, %v895_v13  ;;  %v4791_v35 = vsel %vm230_vm8, 0, %v840_v29  ;;  %v409_v37 = vshrl.u32 %v4780_v27, 16 }
 0x233   :  { %1228 = vmatpush.bf16.msra.mxu0 %v1219_v18  ;;  %v4777_v26 = vpack.i.b16 %v404_v21, %v403_v20  ;;  %v4783_v30 = vsel %vm230_vm8, 0, %v360_v24  ;;  %v888_v36 = vpack.i.b16 %v4791_v35, %v4788_v34  ;;  %v878_v41 = vrot.slane %v877_v7, 4 }
 0x234   :  { %v408_v31 = vpack.i.b16 %v4783_v30, %v4780_v27  ;;  %v410_v39 = vshrl.u32 %v4783_v30, 16  ;;  %v4800_v44 = vsel %vm230_vm8, 0, %v859_v40  ;;  %v889_v48 = vshrl.u32 %v4788_v34, 16 }
 0x235   :  { %v4803_v45 = vsel %vm230_vm8, 0, %v878_v41  ;;  %v890_v49 = vshrl.u32 %v4791_v35, 16  ;;  %v901_v50 = vshrl.u32 %v4800_v44, 16  ;;  %v211_v54 = vshrl.u32 %v4663_v58, 16 }
 0x236   :  { %v4797_v43 = vpack.i.b16 %v410_v39, %v409_v37  ;;  %v900_v46 = vpack.i.b16 %v4803_v45, %v4800_v44  ;;  %v902_v51 = vshrl.u32 %v4803_v45, 16  ;;  %v209_v55 = vpack.i.b16 %v4663_v58, %v4632_v17 }
 0x237   :  { %v4811_v52 = vpack.i.b16 %v890_v49, %v889_v48  ;;  %v217_v32 = vshrl.u32 %v4661_v57, 16  ;;  %v210_v38 = vshrl.u32 %v4632_v17, 16  ;;  %v216_v56 = vshrl.u32 %v4652_v33, 16 }
 0x238   :  { %v4813_v53 = vpack.i.b16 %v902_v51, %v901_v50  ;;  %v276_v59 = vperm.slane %v209_v55, %v4648_v25  ;;  %v215_v62 = vpack.i.b16 %v4661_v57, %v4652_v33  ;;  %v443_v13 = vshrl.u32 %v4646_v23, 16 }
 0x239   :  { %v212_v60 = vpack.i.b16 %v211_v54, %v210_v38  ;;  %v218_v61 = vpack.i.b16 %v217_v32, %v216_v56  ;;  %v1200_v35 = vsel %vm1141_vm9, %v4811_v52, 0  ;;  %v35_v44 = vlaneseq }
 0x23a   :  { %v284_v0 = vrot.slane %v276_v59, 4  ;;  %v281_v1 = vperm.slane %v215_v62, %v4648_v25 }
 0x23b   :  { %v302_v63 = vperm.slane %v212_v60, %v4648_v25  ;;  %v307_v58 = vperm.slane %v218_v61, %v4648_v25  ;;  %v36_v45 = vshrl.u32 %v35_v44, 7 }
 0x23c   :  { %v285_v17 = vsel %vm230_vm8, %v281_v1, %v284_v0  ;;  %v282_v5 = vrot.slane %v281_v1, 4 }
 0x23d   :  { %v310_v42 = vrot.slane %v302_v63, 4  ;;  %v308_v2 = vrot.slane %v307_v58, 4  ;;  %v293_v6 = vperm.slane %v285_v17, %v4675_v3 }
 0x23e   :  { %v283_v33 = vsel %vm230_vm8, %v282_v5, %v276_v59 }
 0x23f   :  { %v311_v7 = vsel %vm230_vm8, %v307_v58, %v310_v42  ;;  %v309_v57 = vsel %vm230_vm8, %v308_v2, %v302_v63  ;;  %v296_v15 = vrot.slane %v293_v6, 4  ;;  %v289_v18 = vperm.slane %v283_v33, %v4675_v3 }
 0x240   :  { %v319_v12 = vperm.slane %v311_v7, %v4675_v3  ;;  %v315_v20 = vperm.slane %v309_v57, %v4675_v3 }
 0x241   :  { %v297_v37 = vsel %vm230_vm8, 0, %v296_v15  ;;  %v294_v48 = vrot.slane %v289_v18, 4  ;;  %v4845_v1 = vsel %vm230_vm8, %v296_v15, %v289_v18 }
 0x242   :  { %v322_v29 = vrot.slane %v319_v12, 4  ;;  %v320_v49 = vrot.slane %v315_v20, 4  ;;  %v367_v56 = vrot.slane %v297_v37, 4 }
 0x243   :  { %v295_v63 = vsel %vm230_vm8, 0, %v294_v48 }
 0x244   :  { %v323_v38 = vsel %vm230_vm8, 0, %v322_v29  ;;  %v321_v0 = vsel %vm230_vm8, 0, %v320_v49  ;;  %v4851_v5 = vsel %vm230_vm8, %v367_v56, %v295_v63  ;;  %v4854_v2 = vsel %vm230_vm8, %v322_v29, %v315_v20 }
 0x245   :  { %v386_v6 = vrot.slane %v323_v38, 4 }
 0x255   :  { %v433_v47 = vpop.permute.xlu2 %432 }
 0x256   :  { %v449_v54 = vshrl.u32 %v433_v47, 16 }
 0x265   :  { %v429_v4 = vpop.permute.xlu0 %428 }
 0x266   :  { %v444_v11 = vshrl.u32 %v429_v4, 16  ;;  %v442_v16 = vpack.i.b16 %v429_v4, %v4646_v23 }
 0x268   :  { %v445_v28 = vpack.i.b16 %v444_v11, %v443_v13  ;;  %v468_v39 = vperm.slane %v442_v16, %v4648_v25 }
 0x26a   :  { %v494_v23 = vperm.slane %v445_v28, %v4648_v25  ;;  %v476_v60 = vrot.slane %v468_v39, 4 }
 0x26c   :  { %v502_v4 = vrot.slane %v494_v23, 4 }
 0x26d   :  { %v427_v21 = vpop.permute.xlu0 %426 }
 0x26e   :  { %v431_v24 = vpop.permute.xlu2 %430  ;;  %v455_v40 = vshrl.u32 %v427_v21, 16 }
 0x26f   :  { %v456_v41 = vshrl.u32 %v431_v24, 16  ;;  %v454_v50 = vpack.i.b16 %v431_v24, %v427_v21 }
 0x271   :  { %v457_v59 = vpack.i.b16 %v456_v41, %v455_v40  ;;  %v520_v58 = vperm.slane %v454_v50, %v4648_v25 }
 0x273   :  { %v546_v33 = vperm.slane %v457_v59, %v4648_v25  ;;  %v528_v13 = vrot.slane %v520_v58, 4 }
 0x275   :  { %v554_v49 = vrot.slane %v546_v33, 4 }
 0x27d   :  { %v437_v51 = vpop.permute.xlu1 %436 }
 0x27e   :  { %v448_v55 = vpack.i.b16 %v437_v51, %v433_v47  ;;  %v450_v32 = vshrl.u32 %v437_v51, 16 }
 0x280   :  { %v451_v62 = vpack.i.b16 %v450_v32, %v449_v54  ;;  %v473_v61 = vperm.slane %v448_v55, %v4648_v25 }
 0x282   :  { %v474_v42 = vrot.slane %v473_v61, 4  ;;  %v477_v17 = vsel %vm230_vm8, %v473_v61, %v476_v60  ;;  %v499_v47 = vperm.slane %v451_v62, %v4648_v25 }
 0x283   :  { %v485_v7 = vperm.slane %v477_v17, %v4675_v3 }
 0x284   :  { %v475_v57 = vsel %vm230_vm8, %v474_v42, %v468_v39  ;;  %v500_v11 = vrot.slane %v499_v47, 4  ;;  %v503_v12 = vsel %vm230_vm8, %v499_v47, %v502_v4  ;;  %v387_v42 = vsel %vm230_vm8, %v386_v6, %v321_v0 }
 0x285   :  { %v481_v15 = vperm.slane %v475_v57, %v4675_v3  ;;  %v488_v16 = vrot.slane %v485_v7, 4  ;;  %v511_v18 = vperm.slane %v503_v12, %v4675_v3  ;;  %v439_v21 = vpop.permute.xlu0 %438  ;;  %v435_v24 = vpop.permute.xlu1 %434 }
 0x286   :  { %v501_v20 = vsel %vm230_vm8, %v500_v11, %v494_v23  ;;  %v462_v28 = vshrl.u32 %v439_v21, 16  ;;  %v460_v29 = vpack.i.b16 %v439_v21, %v435_v24  ;;  %v461_v37 = vshrl.u32 %v435_v24, 16 }
 0x287   :  { %v486_v40 = vrot.slane %v481_v15, 4  ;;  %v489_v41 = vsel %vm230_vm8, 0, %v488_v16  ;;  %v507_v39 = vperm.slane %v501_v20, %v4675_v3  ;;  %v514_v48 = vrot.slane %v511_v18, 4 }
 0x288   :  { %v573_v50 = vrot.slane %v489_v41, 4  ;;  %v463_v51 = vpack.i.b16 %v462_v28, %v461_v37  ;;  %v525_v54 = vperm.slane %v460_v29, %v4648_v25  ;;  %v568_v23 = vsel %vm230_vm8, %v488_v16, %v481_v15 }
 0x289   :  { %v487_v55 = vsel %vm230_vm8, 0, %v486_v40  ;;  %v512_v32 = vrot.slane %v507_v39, 4  ;;  %v515_v38 = vsel %vm230_vm8, 0, %v514_v48  ;;  %v572_v15 = vperm.slane %v568_v23, %v4648_v25 }
 0x28a   :  { %v592_v56 = vrot.slane %v515_v38, 4  ;;  %v526_v60 = vrot.slane %v525_v54, 4  ;;  %v529_v59 = vsel %vm230_vm8, %v525_v54, %v528_v13  ;;  %v551_v62 = vperm.slane %v463_v51, %v4648_v25 }
 0x28b   :  { %v537_v61 = vperm.slane %v529_v59, %v4675_v3  ;;  %v513_v63 = vsel %vm230_vm8, 0, %v512_v32  ;;  %v574_v4 = vsel %vm230_vm8, %v573_v50, %v487_v55  ;;  %v587_v21 = vsel %vm230_vm8, %v514_v48, %v507_v39 }
 0x28c   :  { %v527_v17 = vsel %vm230_vm8, %v526_v60, %v520_v58  ;;  %v552_v47 = vrot.slane %v551_v62, 4  ;;  %v555_v7 = vsel %vm230_vm8, %v551_v62, %v554_v49  ;;  %v578_v57 = vperm.slane %v574_v4, %v4648_v25 }
 0x28d   :  { %v533_v11 = vperm.slane %v527_v17, %v4675_v3  ;;  %v540_v12 = vrot.slane %v537_v61, 4  ;;  %v563_v13 = vperm.slane %v555_v7, %v4675_v3  ;;  %v593_v0 = vsel %vm230_vm8, %v592_v56, %v513_v63 }
 0x28e   :  { %v553_v16 = vsel %vm230_vm8, %v552_v47, %v546_v33  ;;  %v579_v18 = vrot.slane %v578_v57, 4  ;;  %v597_v37 = vperm.slane %v593_v0, %v4648_v25  ;;  %v391_v40 = vperm.slane %v387_v42, %v4648_v25 }
 0x28f   :  { %v538_v58 = vrot.slane %v533_v11, 4  ;;  %v541_v6 = vsel %vm230_vm8, 0, %v540_v12  ;;  %v559_v24 = vperm.slane %v553_v16, %v4675_v3  ;;  %v566_v20 = vrot.slane %v563_v13, 4 }
 0x290   :  { %v611_v28 = vrot.slane %v541_v6, 4  ;;  %v580_v29 = vsel %vm230_vm8, %v579_v18, %v572_v15  ;;  %v591_v48 = vperm.slane %v587_v21, %v4648_v25  ;;  %v606_v49 = vsel %vm230_vm8, %v540_v12, %v533_v11 }
 0x291   :  { %v539_v33 = vsel %vm230_vm8, 0, %v538_v58  ;;  %v564_v41 = vrot.slane %v559_v24, 4  ;;  %v567_v39 = vsel %vm230_vm8, 0, %v566_v20  ;;  %v584_v54 = vperm.slane %v580_v29, %v4675_v3 }
 0x292   :  { %v612_v50 = vsel %vm230_vm8, %v611_v28, %v539_v33  ;;  %v630_v51 = vrot.slane %v567_v39, 4  ;;  %v625_v32 = vsel %vm230_vm8, %v566_v20, %v559_v24  ;;  %v598_v38 = vrot.slane %v597_v37, 4 }
 0x293   :  { %v565_v55 = vsel %vm230_vm8, 0, %v564_v41  ;;  %v616_v23 = vperm.slane %v612_v50, %v4648_v25  ;;  %v585_v56 = vrot.slane %v584_v54, 4  ;;  %v372_v59 = vperm.slane %v4851_v5, %v4648_v25 }
 0x294   :  { %v631_v60 = vsel %vm230_vm8, %v630_v51, %v565_v55  ;;  %v392_v62 = vrot.slane %v391_v40, 4  ;;  %v610_v61 = vperm.slane %v606_v49, %v4648_v25  ;;  %v599_v63 = vsel %vm230_vm8, %v598_v38, %v591_v48 }
 0x295   :  { %v617_v4 = vrot.slane %v616_v23, 4  ;;  %v635_v42 = vperm.slane %v631_v60, %v4648_v25  ;;  %v603_v17 = vperm.slane %v599_v63, %v4675_v3  ;;  %v629_v47 = vperm.slane %v625_v32, %v4648_v25 }
 0x296   :  { %v385_v7 = vperm.slane %v4854_v2, %v4648_v25  ;;  %v647_v57 = vshrl.u32 %v584_v54, 16  ;;  %v586_v11 = vsel %vm230_vm8, 0, %v585_v56  ;;  %v366_v21 = vperm.slane %v4845_v1, %v4648_v25 }
 0x297   :  { %v618_v5 = vsel %vm230_vm8, %v617_v4, %v610_v61  ;;  %v636_v12 = vrot.slane %v635_v42, 4  ;;  %v646_v13 = vpack.i.b16 %v603_v17, %v584_v54  ;;  %v648_v15 = vshrl.u32 %v603_v17, 16 }
 0x298   :  { %v604_v16 = vrot.slane %v603_v17, 4  ;;  %v622_v18 = vperm.slane %v618_v5, %v4675_v3  ;;  %v373_v58 = vrot.slane %v372_v59, 4  ;;  %v393_v6 = vsel %vm230_vm8, %v392_v62, %v385_v7 }
 0x299   :  { %v637_v0 = vsel %vm230_vm8, %v636_v12, %v629_v47  ;;  %v909_v2 = vsel %vm904_vm10, %v646_v13, 0  ;;  %v649_v24 = vpack.i.b16 %v648_v15, %v647_v57  ;;  %v653_v37 = vshrl.u32 %v586_v11, 16 }
 0x29a   :  { %v605_v20 = vsel %vm230_vm8, 0, %v604_v16  ;;  %v641_v28 = vperm.slane %v637_v0, %v4675_v3  ;;  %918 = vmatpush.bf16.xpose.msra.mxu2 %v909_v2  ;;  %v623_v33 = vrot.slane %v622_v18, 4  ;;  %v659_v1 = vshrl.u32 %v622_v18, 16 }
 0x29b   :  { %v652_v29 = vpack.i.b16 %v605_v20, %v586_v11  ;;  %v654_v40 = vshrl.u32 %v605_v20, 16  ;;  %v928_v41 = vsel %vm904_vm10, %v649_v24, 0  ;;  %v374_v51 = vsel %vm230_vm8, %v373_v58, %v366_v21 }
 0x29c   :  { %v660_v39 = vshrl.u32 %v641_v28, 16  ;;  %v642_v48 = vrot.slane %v641_v28, 4  ;;  %937 = vmatpush.bf16.xpose.msra.mxu3 %v928_v41  ;;  %v624_v55 = vsel %vm230_vm8, 0, %v623_v33  ;;  %v397_v38 = vperm.slane %v393_v6, %v4675_v3 }
 0x29d   :  { %v947_v49 = vsel %vm904_vm10, %v652_v29, 0  ;;  %v655_v50 = vpack.i.b16 %v654_v40, %v653_v37  ;;  %v658_v60 = vpack.i.b16 %v641_v28, %v622_v18  ;;  %v378_v62 = vperm.slane %v374_v51, %v4675_v3 }
 0x29e   :  { %v661_v54 = vpack.i.b16 %v660_v39, %v659_v1  ;;  %v643_v32 = vsel %vm230_vm8, 0, %v642_v48  ;;  %v1162_v63 = vsel %vm1141_vm9, %v4762_v9, 0  ;;  %v416_v4 = vshrl.u32 %v397_v38, 16 }
 0x29f   :  { %v966_v23 = vsel %vm904_vm10, %v655_v50, 0  ;;  %v664_v56 = vpack.i.b16 %v643_v32, %v624_v55  ;;  %v985_v42 = vsel %vm904_vm10, %v658_v60, 0  ;;  %v415_v17 = vshrl.u32 %v378_v62, 16 }
 0x2a0   :  { %v1004_v59 = vsel %vm904_vm10, %v661_v54, 0  ;;  %v1238_v9 = vsel %vm1141_vm9, %v4774_v22, 0  ;;  %v666_v8 = vshrl.u32 %v643_v32, 16  ;;  %v665_v14 = vshrl.u32 %v624_v55, 16 }
 0x2a1   :  { %1013 = vmatpush.bf16.xpose.msrb.mxu1 %v1004_v59  ;;  %v1023_v61 = vsel %vm904_vm10, %v664_v56, 0  ;;  %3891 = vmatmul.msk.bf16.vlgmr.msra.gmra.mxu2 %vm904_vm10, %v402_v19  ;;  %v417_v47 = vpack.i.b16 %v416_v4, %v415_v17  ;;  %v398_v7 = vrot.slane %v397_v38, 4  ;;  %v379_v57 = vrot.slane %v378_v62, 4 }
 0x2a2   :  { %956 = vmatpush.bf16.xpose.msrb.mxu2 %v947_v49  ;;  %v667_v19 = vpack.i.b16 %v666_v8, %v665_v14  ;;  %v414_v34 = vpack.i.b16 %v397_v38, %v378_v62  ;;  %v1276_v12 = vsel %vm1141_vm9, %v4813_v53, 0  ;;  %v4504_v13 = vmov -1e+30  }
 0x2a3   :  { %3892 = vmatmul.msk.bf16.vlgmr.msra.gmra.mxu3 %vm904_vm10, %v4777_v26  ;;  %v1181_v26 = vsel %vm1141_vm9, %v888_v36, 0  ;;  %v399_v11 = vsel %vm230_vm8, 0, %v398_v7  ;;  %v380_v27 = vsel %vm230_vm8, 0, %v379_v57 }
 0x2a4   :  { %975 = vmatpush.bf16.xpose.msrb.mxu3 %v966_v23  ;;  %v1042_v22 = vsel %vm904_vm10, %v667_v19, 0  ;;  %v420_v30 = vpack.i.b16 %v399_v11, %v380_v27  ;;  %v422_v36 = vshrl.u32 %v399_v11, 16 }
 0x2a8   :  { %3896 = vmatmul.msk.bf16.vlgmr.msrb.gmra.mxu1 %vm904_vm10, %v417_v47 }
 0x2a9   :  { %1171 = vmatpush.bf16.msra.mxu1 %v1162_v63 }
 0x2aa   :  { %1032 = vmatpush.bf16.xpose.msra.mxu2 %v1023_v61 }
 0x2ac   :  { %994 = vmatpush.bf16.xpose.msra.mxu3 %v985_v42 }
 0x2ad   :  { %1247 = vmatpush.bf16.msrb.mxu1 %v1238_v9 }
 0x2b1   :  { %3893 = vmatmul.msk.bf16.vlgmr.msrb.gmra.mxu2 %vm904_vm10, %v408_v31  ;;  %v1257_v31 = vsel %vm1141_vm9, %v900_v46, 0  ;;  %v38_v46 = vand.u32 127, %v35_v44 }
 0x2b2   :  { %1190 = vmatpush.bf16.msrb.mxu2 %v1181_v26 }
 0x2b3   :  { %3894 = vmatmul.msk.bf16.vlgmr.msrb.gmra.mxu3 %vm904_vm10, %v4797_v43  ;;  %v421_v43 = vshrl.u32 %v380_v27, 16  ;;  %vm39_vm11 = vcmp.le.s32.totalorder %v38_v46, %v36_v45 }
 0x2b4   :  { %1051 = vmatpush.bf16.xpose.msrb.mxu3 %v1042_v22  ;;  %v4964_v15 = vsel %vm39_vm11, 0.0, %v4504_v13 }
 0x2b5   :  { %v423_v5 = vpack.i.b16 %v422_v36, %v421_v43 }
 0x2c1   :  { %3897 = vmatmul.msk.bf16.vlgmr.msra.gmra.mxu2 %vm904_vm10, %v420_v30 }
 0x2c2   :  { %1266 = vmatpush.bf16.msra.mxu2 %v1257_v31 }
 0x2c3   :  { %3895 = vmatmul.msk.bf16.vlgmr.msra.gmra.mxu3 %vm904_vm10, %v414_v34 }
 0x2c4   :  { %1209 = vmatpush.bf16.msra.mxu3 %v1200_v35 }
 0x2d3   :  { %3898 = vmatmul.msk.bf16.vlgmr.msrb.gmra.mxu3 %vm904_vm10, %v423_v5 }
 0x2d4   :  { %1285 = vmatpush.bf16.msrb.mxu3 %v1276_v12 }
 0x324   :  { %v920_v16 = vpop.f32.mrf.mxu2 }
 0x325   :  { %v1015_v18 = vpop.f32.mrf.mxu1  ;;  %v1057_v52 = vmul.f32 0.125, %v920_v16 }
 0x326   :  { %v939_v21 = vpop.f32.mrf.mxu3  ;;  %v1062_v60 = vmul.f32 0.125, %v1015_v18 }
 0x327   :  { %v1065_v0 = vadd.f32 %v1057_v52, %v4964_v15  ;;  %v1058_v29 = vmul.f32 0.125, %v939_v21 }
 0x328   :  { %v1070_v42 = vadd.f32 %v1062_v60, %v4964_v15 }
 0x329   :  { %v1073_v58 = vmul.f32 1.442695, %v1065_v0  ;;  %v1066_v1 = vadd.f32 %v1058_v29, %v4964_v15 }
 0x32a   :  { %v1083_v19 = vmul.f32 1.442695, %v1070_v42 }
 0x32b   :  { %4387 = vpow2.f32 %v1073_v58  ;;  %v1075_v51 = vmul.f32 1.442695, %v1066_v1 }
 0x32c   :  { %v922_v6 = vpop.f32.mrf.mxu2 }
 0x32d   :  { %v1017_v2 = vpop.f32.mrf.mxu1 }
 0x32e   :  { %v941_v24 = vpop.f32.mrf.mxu3 }
 0x331   :  { %v4967_v53 = vpop.eup %4387 }
 0x332   :  { %v1090_v20 = vsel %vm1089_vm12, %v4967_v53, 0.0 }
 0x333   :  { %1091 = vadd.xlane.f32.xlu0 %v1090_v20 }
 0x334   :  { %v958_v28 = vpop.f32.mrf.mxu2 }
 0x335   :  { %v1059_v37 = vmul.f32 0.125, %v958_v28 }
 0x336   :  { %v977_v40 = vpop.f32.mrf.mxu3 }
 0x337   :  { %v1067_v33 = vadd.f32 %v1059_v37, %v4964_v15  ;;  %v1060_v41 = vmul.f32 0.125, %v977_v40 }
 0x339   :  { %v1077_v39 = vmul.f32 1.442695, %v1067_v33  ;;  %v1068_v48 = vadd.f32 %v1060_v41, %v4964_v15 }
 0x33b   :  { %4389 = vpow2.f32 %v1077_v39  ;;  %v1079_v49 = vmul.f32 1.442695, %v1068_v48 }
 0x33c   :  { %v960_v50 = vpop.f32.mrf.mxu2 }
 0x33d   :  { %4391 = vpow2.f32 %v1079_v49 }
 0x33e   :  { %v979_v54 = vpop.f32.mrf.mxu3  ;;  %4393 = vpow2.f32 %v1075_v51 }
 0x341   :  { %v4390_v55 = vpop.eup %4389 }
 0x342   :  { %v1096_v32 = vsel %vm1089_vm12, %v4390_v55, 0.0 }
 0x343   :  { %v4392_v38 = vpop.eup %4391  ;;  %1097 = vadd.xlane.f32.xlu2 %v1096_v32 }
 0x344   :  { %v1034_v23 = vpop.f32.mrf.mxu2  ;;  %v1099_v56 = vsel %vm1089_vm12, %v4392_v38, 0.0  ;;  %v4394_v61 = vpop.eup %4393 }
 0x345   :  { %v1063_v59 = vmul.f32 0.125, %v1034_v23  ;;  %1100 = vadd.xlane.f32.xlu1 %v1099_v56  ;;  %v1093_v9 = vsel %vm1089_vm12, %v4394_v61, 0.0 }
 0x346   :  { %v996_v62 = vpop.f32.mrf.mxu3 }
 0x347   :  { %v1071_v63 = vadd.f32 %v1063_v59, %v4964_v15  ;;  %v1061_v4 = vmul.f32 0.125, %v996_v62 }
 0x349   :  { %v1085_v17 = vmul.f32 1.442695, %v1071_v63  ;;  %v1069_v47 = vadd.f32 %v1061_v4, %v4964_v15 }
 0x34b   :  { %4395 = vpow2.f32 %v1085_v17  ;;  %v1081_v8 = vmul.f32 1.442695, %v1069_v47  ;;  %1094 = vadd.xlane.f32.xlu2 %v1093_v9 }
 0x34c   :  { %v1036_v14 = vpop.f32.mrf.mxu2 }
 0x34d   :  { %4397 = vpow2.f32 %v1081_v8 }
 0x34e   :  { %v998_v26 = vpop.f32.mrf.mxu3  ;;  %4399 = vpow2.f32 %v1083_v19 }
 0x351   :  { %v4396_v22 = vpop.eup %4395 }
 0x352   :  { %v1108_v7 = vsel %vm1089_vm12, %v4396_v22, 0.0 }
 0x353   :  { %v4398_v57 = vpop.eup %4397  ;;  %1109 = vadd.xlane.f32.xlu1 %v1108_v7 }
 0x354   :  { %v1102_v11 = vsel %vm1089_vm12, %v4398_v57, 0.0  ;;  %v4400_v30 = vpop.eup %4399 }
 0x355   :  { %1103 = vadd.xlane.f32.xlu2 %v1102_v11  ;;  %v1105_v35 = vsel %vm1089_vm12, %v4400_v30, 0.0 }
 0x356   :  { %v1053_v27 = vpop.f32.mrf.mxu3 }
 0x357   :  { %v1064_v31 = vmul.f32 0.125, %v1053_v27 }
 0x359   :  { %v1072_v34 = vadd.f32 %v1064_v31, %v4964_v15 }
 0x35b   :  { %v1087_v36 = vmul.f32 1.442695, %v1072_v34  ;;  %1106 = vadd.xlane.f32.xlu1 %v1105_v35 }
 0x35d   :  { %4401 = vpow2.f32 %v1087_v36 }
 0x35e   :  { %v1055_v43 = vpop.f32.mrf.mxu3 }
 0x363   :  { %v4402_v5 = vpop.eup %4401 }
 0x364   :  { %v1111_v12 = vsel %vm1089_vm12, %v4402_v5, 0.0 }
 0x365   :  { %1112 = vadd.xlane.f32.xlu0 %v1111_v12 }
 0x3a6   :  { %v1092_v44 = vpop.xlane.xlu0 %1091 }
 0x3a7   :  { %4403 = vrcp.f32 %v1092_v44 }
 0x3ad   :  { %v4404_v45 = vpop.eup %4403 }
 0x3ae   :  { %v1122_v46 = vmul.f32 %v4404_v45, %v4967_v53 }
 0x3b0   :  { %v1130_v13 = vpack.c.bf16 %v1122_v46, %v1122_v46 }
 0x3b2   :  { %3899 = vmatmul.msk.bf16.vlgmr.msrb.gmra.mxu0 %vm1089_vm12, %v1130_v13 }
 0x3b6   :  { %v1098_v16 = vpop.xlane.xlu2 %1097 }
 0x3b7   :  { %4405 = vrcp.f32 %v1098_v16 }
 0x3b8   :  { %v1101_v18 = vpop.xlane.xlu1 %1100 }
 0x3b9   :  { %4407 = vrcp.f32 %v1101_v18 }
 0x3bd   :  { %v4406_v52 = vpop.eup %4405 }
 0x3be   :  { %v1124_v21 = vmul.f32 %v4406_v52, %v4390_v55  ;;  %v1095_v0 = vpop.xlane.xlu2 %1094 }
 0x3bf   :  { %v4408_v58 = vpop.eup %4407  ;;  %4409 = vrcp.f32 %v1095_v0 }
 0x3c0   :  { %v1132_v6 = vpack.c.bf16 %v1124_v21, %v1124_v21  ;;  %v1125_v2 = vmul.f32 %v4408_v58, %v4392_v38 }
 0x3c2   :  { %v1133_v24 = vpack.c.bf16 %v1125_v2, %v1125_v2  ;;  %3901 = vmatmul.msk.bf16.vlgmr.msrb.gmra.mxu2 %vm1089_vm12, %v1132_v6 }
 0x3c4   :  { %3902 = vmatmul.msk.bf16.vlgmr.msra.gmra.mxu3 %vm1089_vm12, %v1133_v24 }
 0x3c5   :  { %v4410_v53 = vpop.eup %4409 }
 0x3c6   :  { %v1123_v20 = vmul.f32 %v4410_v53, %v4394_v61  ;;  %v1110_v28 = vpop.xlane.xlu1 %1109 }
 0x3c7   :  { %4411 = vrcp.f32 %v1110_v28 }
 0x3c8   :  { %v1131_v29 = vpack.c.bf16 %v1123_v20, %v1123_v20  ;;  %v1104_v37 = vpop.xlane.xlu2 %1103 }
 0x3c9   :  { %4413 = vrcp.f32 %v1104_v37 }
 0x3ca   :  { %3900 = vmatmul.msk.bf16.vlgmr.msra.gmra.mxu1 %vm1089_vm12, %v1131_v29 }
 0x3cd   :  { %v4412_v40 = vpop.eup %4411 }
 0x3ce   :  { %v1128_v33 = vmul.f32 %v4412_v40, %v4396_v22  ;;  %v1107_v41 = vpop.xlane.xlu1 %1106 }
 0x3cf   :  { %v4414_v1 = vpop.eup %4413  ;;  %4415 = vrcp.f32 %v1107_v41 }
 0x3d0   :  { %v1136_v39 = vpack.c.bf16 %v1128_v33, %v1128_v33  ;;  %v1126_v48 = vmul.f32 %v4414_v1, %v4398_v57 }
 0x3d2   :  { %v1134_v49 = vpack.c.bf16 %v1126_v48, %v1126_v48  ;;  %3905 = vmatmul.msk.bf16.vlgmr.msra.gmra.mxu2 %vm1089_vm12, %v1136_v39 }
 0x3d4   :  { %3903 = vmatmul.msk.bf16.vlgmr.msra.gmra.mxu0 %vm1089_vm12, %v1134_v49 }
 0x3d5   :  { %v4416_v50 = vpop.eup %4415 }
 0x3d6   :  { %v1127_v51 = vmul.f32 %v4416_v50, %v4400_v30 }
 0x3d8   :  { %v1135_v54 = vpack.c.bf16 %v1127_v51, %v1127_v51  ;;  %v1113_v55 = vpop.xlane.xlu0 %1112 }
 0x3d9   :  { %4417 = vrcp.f32 %v1113_v55 }
 0x3da   :  { %3904 = vmatmul.msk.bf16.vlgmr.msrb.gmra.mxu1 %vm1089_vm12, %v1135_v54 }
 0x3df   :  { %v4418_v32 = vpop.eup %4417 }
 0x3e0   :  { %v1129_v38 = vmul.f32 %v4418_v32, %v4402_v5 }
 0x3e2   :  { %v1137_v23 = vpack.c.bf16 %v1129_v38, %v1129_v38 }
 0x3e4   :  { %3906 = vmatmul.msk.bf16.vlgmr.msrb.gmra.mxu3 %vm1089_vm12, %v1137_v23 }
 0x42f   :  { %v1154_v56 = vpop.f32.mrf.mxu0 }
 0x430   :  { %v1294_v59 = vrot.slane %v1154_v56, 4 }
 0x437   :  { %v1156_v60 = vpop.f32.mrf.mxu0 }
 0x445   :  { %v1192_v62 = vpop.f32.mrf.mxu2 }
 0x446   :  { %v1291_v61 = vrot.slane %v1192_v62, 4  ;;  %v1295_v63 = vsel %vm230_vm8, %v1192_v62, %v1294_v59 }
 0x447   :  { %v1303_v4 = vperm.slane %v1295_v63, %v4648_v25  ;;  %v1173_v42 = vpop.f32.mrf.mxu1  ;;  %v1211_v17 = vpop.f32.mrf.mxu3 }
 0x448   :  { %v1293_v47 = vsel %vm230_vm8, %v1291_v61, %v1154_v56  ;;  %v1306_v9 = vrot.slane %v1173_v42, 4  ;;  %v1304_v8 = vrot.slane %v1211_v17, 4 }
 0x449   :  { %v1299_v14 = vperm.slane %v1293_v47, %v4648_v25  ;;  %v1330_v7 = vrot.slane %v1303_v4, 4 }
 0x44a   :  { %v1305_v19 = vsel %vm230_vm8, %v1304_v8, %v1173_v42  ;;  %v1307_v26 = vsel %vm230_vm8, %v1211_v17, %v1306_v9 }
 0x44b   :  { %v1318_v22 = vrot.slane %v1299_v14, 4  ;;  %v1311_v57 = vperm.slane %v1305_v19, %v4648_v25  ;;  %v1315_v11 = vperm.slane %v1307_v26, %v4648_v25 }
 0x44d   :  { %v1316_v27 = vrot.slane %v1311_v57, 4  ;;  %v1319_v30 = vsel %vm230_vm8, %v1311_v57, %v1318_v22  ;;  %v1328_v31 = vrot.slane %v1315_v11, 4  ;;  %v1331_v34 = vsel %vm230_vm8, %v1315_v11, %v1330_v7  ;;  %v1194_v35 = vpop.f32.mrf.mxu2 }
 0x44e   :  { %v1327_v36 = vperm.slane %v1319_v30, %v4675_v3  ;;  %v1339_v43 = vperm.slane %v1331_v34, %v4675_v3 }
 0x44f   :  { %v1317_v5 = vsel %vm230_vm8, %v1316_v27, %v1299_v14  ;;  %v1329_v12 = vsel %vm230_vm8, %v1328_v31, %v1303_v4  ;;  %v1175_v44 = vpop.f32.mrf.mxu1  ;;  %v1213_v45 = vpop.f32.mrf.mxu3 }
 0x450   :  { %v1323_v46 = vperm.slane %v1317_v5, %v4675_v3  ;;  %v1335_v13 = vperm.slane %v1329_v12, %v4675_v3  ;;  %v1342_v16 = vrot.slane %v1327_v36, 4  ;;  %v1346_v18 = vrot.slane %v1339_v43, 4 }
 0x451   :  { %v1230_v52 = vpop.f32.mrf.mxu0 }
 0x452   :  { %v1340_v21 = vrot.slane %v1323_v46, 4  ;;  %v1343_v0 = vsel %vm230_vm8, 0.0, %v1342_v16  ;;  %v1344_v58 = vrot.slane %v1335_v13, 4  ;;  %v1347_v6 = vsel %vm230_vm8, 0.0, %v1346_v18 }
 0x453   :  { %v1409_v2 = vrot.slane %v1343_v0, 4  ;;  %v1420_v24 = vrot.slane %v1347_v6, 4  ;;  %v1415_v28 = vsel %vm230_vm8, %v1346_v18, %v1335_v13  ;;  %v1404_v41 = vsel %vm230_vm8, %v1342_v16, %v1323_v46 }
 0x454   :  { %v1345_v53 = vsel %vm230_vm8, 0.0, %v1344_v58  ;;  %v1341_v20 = vsel %vm230_vm8, 0.0, %v1340_v21  ;;  %v1419_v48 = vperm.slane %v1415_v28, %v4648_v25  ;;  %v1408_v51 = vperm.slane %v1404_v41, %v4648_v25 }
 0x455   :  { %v1421_v29 = vsel %vm230_vm8, %v1420_v24, %v1345_v53  ;;  %v1268_v37 = vpop.f32.mrf.mxu2  ;;  %v1410_v40 = vsel %vm230_vm8, %v1409_v2, %v1341_v20  ;;  %v1350_v61 = vrot.slane %v1230_v52, 4 }
 0x456   :  { %v1425_v33 = vperm.slane %v1421_v29, %v4648_v25  ;;  %v1414_v39 = vperm.slane %v1410_v40, %v4648_v25  ;;  %v1348_v63 = vrot.slane %v1268_v37, 4  ;;  %v1440_v26 = vrot.slane %v1419_v48, 4 }
 0x457   :  { %v1249_v1 = vpop.f32.mrf.mxu1  ;;  %v1351_v4 = vsel %vm230_vm8, %v1268_v37, %v1350_v61  ;;  %v1428_v11 = vrot.slane %v1408_v51, 4 }
 0x458   :  { %v1438_v49 = vrot.slane %v1425_v33, 4  ;;  %v1426_v54 = vrot.slane %v1414_v39, 4  ;;  %v1349_v42 = vsel %vm230_vm8, %v1348_v63, %v1230_v52  ;;  %v1359_v17 = vperm.slane %v1351_v4, %v4648_v25 }
 0x459   :  { %v1232_v50 = vpop.f32.mrf.mxu0  ;;  %v1362_v47 = vrot.slane %v1249_v1, 4  ;;  %v1355_v9 = vperm.slane %v1349_v42, %v4648_v25  ;;  %v1441_v12 = vsel %vm230_vm8, %v1425_v33, %v1440_v26  ;;  %v1429_v13 = vsel %vm230_vm8, %v1414_v39, %v1428_v11 }
 0x45a   :  { %v1439_v55 = vsel %vm230_vm8, %v1438_v49, %v1419_v48  ;;  %v1427_v38 = vsel %vm230_vm8, %v1426_v54, %v1408_v51  ;;  %v1386_v22 = vrot.slane %v1359_v17, 4  ;;  %v1437_v24 = vperm.slane %v1429_v13, %v4675_v3 }
 0x45b   :  { %v5024_v32 = vperm.slane %v1439_v55, %v4675_v3  ;;  %v5028_v56 = vperm.slane %v1427_v38, %v4675_v3  ;;  %v1374_v27 = vrot.slane %v1355_v9, 4  ;;  %v1449_v53 = vperm.slane %v1441_v12, %v4675_v3  ;;  %v4268_v12 = vld [vmem:[%s5980_s2] sm:$0xff] }
 0x45d   :  { %v1270_v23 = vpop.f32.mrf.mxu2  ;;  %v1450_v60 = vrot.slane %v5024_v32, 4  ;;  %v1454_v38 = vrot.slane %v1449_v53, 4 }
 0x45f   :  { %v1251_v59 = vpop.f32.mrf.mxu1  ;;  %v5033_v62 = vsel %vm230_vm8, %v1450_v60, %v5028_v56  ;;  %v1456_v60 = vrot.slane %v1437_v24, 4 }
 0x467   :  { %v1287_v8 = vpop.f32.mrf.mxu3 }
 0x468   :  { %v1360_v14 = vrot.slane %v1287_v8, 4  ;;  %v1363_v19 = vsel %vm230_vm8, %v1287_v8, %v1362_v47 }
 0x469   :  { %v1371_v7 = vperm.slane %v1363_v19, %v4648_v25 }
 0x46a   :  { %v1361_v57 = vsel %vm230_vm8, %v1360_v14, %v1249_v1  ;;  %v1452_v14 = vrot.slane %v5028_v56, 4 }
 0x46b   :  { %v1367_v30 = vperm.slane %v1361_v57, %v4648_v25  ;;  %v1384_v31 = vrot.slane %v1371_v7, 4  ;;  %v1387_v34 = vsel %vm230_vm8, %v1371_v7, %v1386_v22  ;;  %v1455_v22 = vsel %vm230_vm8, %v1454_v38, %v1437_v24 }
 0x46c   :  { %v1395_v35 = vperm.slane %v1387_v34, %v4675_v3  ;;  %v1457_v57 = vsel %vm230_vm8, %v1449_v53, %v1456_v60  ;;  %v1453_v56 = vsel %vm230_vm8, %v5024_v32, %v1452_v14  ;;  %v4269_v32 = vld [vmem:[%s5980_s2 + $0x8] sm:$0xff]  ;;  %v4279_v14 = vld [vmem:[%s5981_s3 + $0x34] sm:$0xf0] }
 0x46d   :  { %v1372_v36 = vrot.slane %v1367_v30, 4  ;;  %v1375_v43 = vsel %vm230_vm8, %v1367_v30, %v1374_v27  ;;  %v1385_v5 = vsel %vm230_vm8, %v1384_v31, %v1359_v17 }
 0x46e   :  { %v1383_v44 = vperm.slane %v1375_v43, %v4675_v3  ;;  %v1391_v45 = vperm.slane %v1385_v5, %v4675_v3  ;;  %v1402_v46 = vrot.slane %v1395_v35, 4  ;;  %v4271_v43 = vld [vmem:[%s5980_s2 + $0x18] sm:$0xff]  ;;  %v4270_v5 = vld [vmem:[%s5980_s2 + $0x10] sm:$0xff] }
 0x46f   :  { %v1373_v16 = vsel %vm230_vm8, %v1372_v36, %v1355_v9  ;;  %v1289_v18 = vpop.f32.mrf.mxu3  ;;  %1585 = vmatpush.bf16.msrb.mxu0 %v4271_v43  ;;  %v4274_v43 = vld [vmem:[%s5981_s3 + $0x14] sm:$0xf] }
 0x470   :  { %v1379_v52 = vperm.slane %v1373_v16, %v4675_v3  ;;  %v1398_v21 = vrot.slane %v1383_v44, 4  ;;  %v1400_v0 = vrot.slane %v1391_v45, 4  ;;  %v1403_v58 = vsel %vm230_vm8, 0.0, %v1402_v46 }
 0x471   :  { %v1469_v6 = vsel %vm230_vm8, %v1402_v46, %v1391_v45  ;;  %v1474_v2 = vrot.slane %v1403_v58, 4 }
 0x472   :  { %v1396_v20 = vrot.slane %v1379_v52, 4  ;;  %v1399_v28 = vsel %vm230_vm8, 0.0, %v1398_v21  ;;  %v1401_v29 = vsel %vm230_vm8, 0.0, %v1400_v0  ;;  %v1458_v37 = vsel %vm230_vm8, %v1398_v21, %v1379_v52 }
 0x473   :  { %v1463_v40 = vrot.slane %v1399_v28, 4  ;;  %v1473_v33 = vperm.slane %v1469_v6, %v4648_v25  ;;  %v1475_v41 = vsel %vm230_vm8, %v1474_v2, %v1401_v29  ;;  %v1462_v1 = vperm.slane %v1458_v37, %v4648_v25  ;;  %1586 = vmatpush.bf16.msrb.mxu0 %v4270_v5  ;;  %v5110_v29 = vld [vmem:[%s5984_s6] sm:$0xff]  ;;  %v3936_v5 = vld [vmem:[%s5981_s3 + $0x18] sm:$0xf0] }
 0x474   :  { %v1479_v39 = vperm.slane %v1475_v41, %v4648_v25  ;;  %v1397_v48 = vsel %vm230_vm8, 0.0, %v1396_v20 }
 0x475   :  { %v1494_v49 = vrot.slane %v1473_v33, 4  ;;  %v1464_v50 = vsel %vm230_vm8, %v1463_v40, %v1397_v48  ;;  %v1482_v51 = vrot.slane %v1462_v1, 4 }
 0x476   :  { %v1468_v54 = vperm.slane %v1464_v50, %v4648_v25  ;;  %v1492_v55 = vrot.slane %v1479_v39, 4 }
 0x477   :  { %v1495_v23 = vsel %vm230_vm8, %v1479_v39, %v1494_v49  ;;  %1587 = vmatpush.bf16.msrb.mxu0 %v4269_v32  ;;  %v4469_v49 = vld [vmem:[%s5978_s0 + $0x8] sm:$0xff]  ;;  %v4287_v32 = vld [vmem:[%s5982_s4 + $0x38] sm:$0xff] }
 0x478   :  { %v1483_v59 = vsel %vm230_vm8, %v1468_v54, %v1482_v51  ;;  %v1503_v61 = vperm.slane %v1495_v23, %v4675_v3  ;;  %v1480_v63 = vrot.slane %v1468_v54, 4  ;;  %v1493_v4 = vsel %vm230_vm8, %v1492_v55, %v1473_v33  ;;  %v4468_v33 = vld [vmem:[%s5978_s0] sm:$0xff]  ;;  %1864 = vmatpush.bf16.msra.mxu3 %v4287_v32 }
 0x479   :  { %v1491_v42 = vperm.slane %v1483_v59, %v4675_v3  ;;  %v1499_v17 = vperm.slane %v1493_v4, %v4675_v3 }
 0x47a   :  { %v1508_v47 = vrot.slane %v1503_v61, 4  ;;  %v1481_v9 = vsel %vm230_vm8, %v1480_v63, %v1462_v1 }
 0x47b   :  { %v1510_v8 = vrot.slane %v1491_v42, 4  ;;  %v1487_v19 = vperm.slane %v1481_v9, %v4675_v3  ;;  %v1504_v26 = vrot.slane %v1499_v17, 4  ;;  %1588 = vmatpush.bf16.msrb.mxu0 %v4268_v12 }
 0x47c   :  { %v1509_v7 = vsel %vm230_vm8, %v1508_v47, %v1491_v42 }
 0x47d   :  { %v4355_v11 = vpack.i.bf16 %v1509_v7, %v1455_v22  ;;  %v1511_v27 = vsel %vm230_vm8, %v1503_v61, %v1510_v8  ;;  %v1506_v30 = vrot.slane %v1487_v19, 4  ;;  %v1505_v31 = vsel %vm230_vm8, %v1504_v26, %v1487_v19  ;;  %v3950_v8 = vld [vmem:[%s5981_s3 + $0x30] sm:$0xf]  ;;  %v4278_v26 = vld [vmem:[%s5981_s3 + $0x34] sm:$0xf] }
 0x47e   :  { %v4360_v34 = vpack.i.bf16 %v1511_v27, %v1457_v57  ;;  %v3951_v19 = vor.u32 %v4279_v14, %v3950_v8  ;;  %v3952_v22 = vld [vmem:[%s5981_s3 + $0x38] sm:$0xf0]  ;;  %v3942_v7 = vld [vmem:[%s5981_s3 + $0x20] sm:$0xf]  ;;  %v4276_v27 = vld [vmem:[%s5981_s3 + $0x24] sm:$0xf] }
 0x47f   :  { %4356 = vrot.lane.b32.xlu2 %v4355_v11, %s4505_s20  ;;  %v1507_v35 = vsel %vm230_vm8, %v1499_v17, %v1506_v30  ;;  %v3955_v57 = vor.u32 %v4278_v26, %v3952_v22  ;;  %v4277_v11 = vld [vmem:[%s5981_s3 + $0x24] sm:$0xf0]  ;;  %v3944_v30 = vld [vmem:[%s5981_s3 + $0x28] sm:$0xf0]  ;;  %v4291_v26 = vld [vmem:[%s5982_s4 + $0x58] sm:$0xff] }
 0x480   :  { %4361 = vrot.lane.b32.xlu1 %v4360_v34, %s4506_s21  ;;  %v4350_v36 = vpack.i.bf16 %v1507_v35, %v1453_v56  ;;  %1705 = vmatpush.bf16.msra.mxu1 %v3951_v19  ;;  %v3947_v34 = vor.u32 %v4276_v27, %v3944_v30  ;;  %v3934_v56 = vld [vmem:[%s5981_s3 + $0x10] sm:$0xf]  ;;  %v4275_v35 = vld [vmem:[%s5981_s3 + $0x14] sm:$0xf0]  ;;  %v4292_v19 = vld [vmem:[%s5982_s4 + $0x60] sm:$0xff] }
 0x481   :  { %1719 = vmatpush.bf16.msrb.mxu2 %v3955_v57  ;;  %v4281_v22 = vld [vmem:[%s5982_s4 + $0x8] sm:$0xff]  ;;  %v4280_v57 = vld [vmem:[%s5982_s4] sm:$0xff] }
 0x482   :  { %4351 = vrot.lane.b32.xlu0 %v4350_v36, %s4507_s22  ;;  %v4288_v27 = vld [vmem:[%s5982_s4 + $0x40] sm:$0xff] }
 0x485   :  { %1720 = vmatpush.bf16.msrb.mxu2 %v3947_v34  ;;  %v31_v34 = vld [vmem:[%s5984_s6 + $0x8] sm:$0xff] }
 0x4d9   :  { %v4357_v44 = vpop.permute.xlu2 %4356 }
 0x4da   :  { %v4359_v18 = vunpack.i.h.bf16 %v4357_v44  ;;  %v4358_v52 = vunpack.i.l.bf16 %v4357_v44  ;;  %v4295_v44 = vld [vmem:[%s5982_s4 + $0x78] sm:$0xff] }
 0x4db   :  { %1878 = vmatpush.bf16.msra.mxu0 %v4295_v44 }
 0x4f2   :  { %v4362_v45 = vpop.permute.xlu1 %4361 }
 0x4f3   :  { %v4364_v21 = vunpack.i.h.bf16 %v4362_v45  ;;  %v4363_v0 = vunpack.i.l.bf16 %v4362_v45  ;;  %v3935_v45 = vor.u32 %v4275_v35, %v3934_v56 }
 0x4f4   :  { %v4352_v46 = vpop.permute.xlu0 %4351 }
 0x4f5   :  { %v4354_v13 = vunpack.i.h.bf16 %v4352_v46  ;;  %v4353_v16 = vunpack.i.l.bf16 %v4352_v46  ;;  %v3926_v46 = vld [vmem:[%s5981_s3] sm:$0xf] }
 0x4f7   :  { %v1536_v58 = vsel %vm904_vm10, %v5033_v62, %v4353_v16  ;;  %v1537_v6 = vsel %vm904_vm10, %v1505_v31, %v4354_v13  ;;  %v1553_v62 = vperm.slane %v5110_v29, 2  ;;  %v3943_v31 = vor.u32 %v4277_v11, %v3942_v7  ;;  %v4286_v13 = vld [vmem:[%s5982_s4 + $0x30] sm:$0xff]  ;;  %v4289_v11 = vld [vmem:[%s5982_s4 + $0x48] sm:$0xff] }
 0x4f8   :  { %v1539_v2 = vsel %vm1538_vm13, %v1536_v58, %v4358_v52  ;;  %v1540_v24 = vsel %vm1538_vm13, %v1537_v6, %v4359_v18  ;;  %v3939_v52 = vor.u32 %v4274_v43, %v3936_v5  ;;  %v4272_v6 = vld [vmem:[%s5981_s3 + $0x4] sm:$0xf]  ;;  %1865 = vmatpush.bf16.msra.mxu3 %v4286_v13  ;;  %v4290_v7 = vld [vmem:[%s5982_s4 + $0x50] sm:$0xff]  ;;  %v1657_v43 = vperm.slane %v31_v34, 5 }
 0x4f9   :  { %v1542_v53 = vsel %vm1541_vm14, %v1539_v2, %v4363_v0  ;;  %v1543_v20 = vsel %vm1541_vm14, %v1540_v24, %v4364_v21  ;;  %1706 = vmatpush.bf16.msra.mxu1 %v3943_v31  ;;  %v4273_v21 = vld [vmem:[%s5981_s3 + $0x4] sm:$0xf0]  ;;  %v4294_v0 = vld [vmem:[%s5982_s4 + $0x70] sm:$0xff]  ;;  %v3928_v2 = vld [vmem:[%s5981_s3 + $0x8] sm:$0xf0]  ;;  %v1656_v31 = vperm.slane %v5110_v29, 5 }
 0x4fa   :  { %v1544_v28 = vpack.c.bf16 %v1543_v20, %v1542_v53  ;;  %v3927_v53 = vor.u32 %v4273_v21, %v3926_v46  ;;  %v4285_v20 = vld [vmem:[%s5982_s4 + $0x28] sm:$0xff]  ;;  %1721 = vmatpush.bf16.msrb.mxu2 %v3939_v52  ;;  %1879 = vmatpush.bf16.msra.mxu0 %v4294_v0  ;;  %v1767_v21 = vperm.slane %v5110_v29, 6 }
 0x4fc   :  { %3923 = vmatmul.msk.bf16.vlgmr.msrb.gmra.mxu0 %vm41_vm0, %v1544_v28  ;;  %v3931_v28 = vor.u32 %v4272_v6, %v3928_v2  ;;  %1866 = vmatpush.bf16.msra.mxu3 %v4285_v20 }
 0x4fd   :  { %1707 = vmatpush.bf16.msra.mxu1 %v3935_v45 }
 0x4fe   :  { %1722 = vmatpush.bf16.msrb.mxu2 %v3931_v28 }
 0x501   :  { %1708 = vmatpush.bf16.msra.mxu1 %v3927_v53 }
 0x579   :  { %v1590_v37 = vpop.f32.mrf.mxu0 }
 0x57a   :  { %v1591_v40 = vadd.f32 %v1590_v37, %v1553_v62 }
 0x57c   :  { %v5116_v41 = vadd.f32 %v4468_v33, %v1591_v40  ;;  %v4284_v33 = vld [vmem:[%s5982_s4 + $0x20] sm:$0xff] }
 0x57d   :  { %1867 = vmatpush.bf16.msra.mxu3 %v4284_v33 }
 0x57e   :  { %v1597_v1 = vsel %vm41_vm0, %v5116_v41, 0.0 }
 0x57f   :  { %1598 = vadd.xlane.f32.xlu0 %v1597_v1 }
 0x581   :  { %v1592_v39 = vpop.f32.mrf.mxu0 }
 0x582   :  { %v1593_v48 = vadd.f32 %v1592_v39, %v1553_v62  ;;  %v4293_v62 = vld [vmem:[%s5982_s4 + $0x68] sm:$0xff] }
 0x583   :  { %1880 = vmatpush.bf16.msra.mxu0 %v4293_v62 }
 0x584   :  { %v5123_v50 = vadd.f32 %v4469_v49, %v1593_v48 }
 0x586   :  { %v1600_v51 = vsel %vm41_vm0, %v5123_v50, 0.0 }
 0x587   :  { %1601 = vadd.xlane.f32.xlu2 %v1600_v51  ;;  %1881 = vmatpush.bf16.msra.mxu0 %v4292_v19  ;;  %v4300_v19 = vld [vmem:[%s5979_s1 + $0x64] sm:$0xf] }
 0x58b   :  { %1882 = vmatpush.bf16.msra.mxu0 %v4291_v26 }
 0x58f   :  { %1883 = vmatpush.bf16.msra.mxu0 %v4290_v7  ;;  %v4040_v7 = vld [vmem:[%s5979_s1 + $0x50] sm:$0xf] }
 0x593   :  { %1884 = vmatpush.bf16.msra.mxu0 %v4289_v11 }
 0x597   :  { %1885 = vmatpush.bf16.msra.mxu0 %v4288_v27  ;;  %v4298_v27 = vld [vmem:[%s5979_s1 + $0x54] sm:$0xf] }
 0x5f2   :  { %v1599_v54 = vpop.xlane.xlu0 %1598 }
 0x5f3   :  { %v1603_v55 = vmul.f32 %v1599_v54, %v4559_v10 }
 0x5f5   :  { %v5129_v38 = vsub.f32 %v5116_v41, %v1603_v55 }
 0x5f7   :  { %v1607_v23 = vmul.f32 %v5129_v38, %v5129_v38 }
 0x5f9   :  { %v1609_v60 = vsel %vm41_vm0, %v1607_v23, 0.0  ;;  %v1641_v23 = vperm.slane %v5110_v29, 3 }
 0x5fa   :  { %v1602_v59 = vpop.xlane.xlu2 %1601  ;;  %1610 = vadd.xlane.f32.xlu1 %v1609_v60 }
 0x5fb   :  { %v1604_v61 = vmul.f32 %v1602_v59, %v4559_v10 }
 0x5fd   :  { %v5136_v63 = vsub.f32 %v5123_v50, %v1604_v61 }
 0x5ff   :  { %v1608_v4 = vmul.f32 %v5136_v63, %v5136_v63 }
 0x601   :  { %v1612_v42 = vsel %vm41_vm0, %v1608_v4, 0.0  ;;  %v1644_v4 = vperm.slane %v5110_v29, 4 }
 0x602   :  { %1613 = vadd.xlane.f32.xlu0 %v1612_v42 }
 0x66d   :  { %v1611_v17 = vpop.xlane.xlu1 %1610 }
 0x66e   :  { %v1615_v47 = vmul.f32 %v1611_v17, %v4559_v10 }
 0x670   :  { %v5142_v9 = vadd.f32 1e-05, %v1615_v47 }
 0x672   :  { %4419 = vrsqrt.f32 %v5142_v9  ;;  %vm1625_vm1 = vweird.f32 %v5142_v9 }
 0x675   :  { %v1614_v36 = vpop.xlane.xlu0 %1613 }
 0x676   :  { %v1616_v12 = vmul.f32 %v1614_v36, %v4559_v10 }
 0x678   :  { %v4420_v16 = vpop.eup %4419  ;;  %v1618_v18 = vadd.f32 1e-05, %v1616_v12 }
 0x679   :  { %v1620_v58 = vmul.f32 %v4420_v16, %v5142_v9  ;;  %vm1626_vm15 = vweird.f32 %v4420_v16 }
 0x67a   :  { %4421 = vrsqrt.f32 %v1618_v18  ;;  %vm1627_vm2 = vmor %vm1625_vm1, %vm1626_vm15  ;;  %vm1635_vm4 = vweird.f32 %v1618_v18 }
 0x67b   :  { %v1621_v24 = vmul.f32 %v4420_v16, %v1620_v58 }
 0x67d   :  { %v1622_v37 = vmul.f32 0.5, %v1621_v24 }
 0x67f   :  { %v1623_v40 = vsub.f32 1.5, %v1622_v37 }
 0x680   :  { %v4422_v1 = vpop.eup %4421 }
 0x681   :  { %v1624_v39 = vmul.f32 %v4420_v16, %v1623_v40  ;;  %v1630_v48 = vmul.f32 %v4422_v1, %v1618_v18  ;;  %vm1636_vm3 = vweird.f32 %v4422_v1 }
 0x682   :  { %vm1637_vm5 = vmor %vm1635_vm4, %vm1636_vm3 }
 0x683   :  { %v1631_v49 = vmul.f32 %v4422_v1, %v1630_v48  ;;  %v1628_v51 = vsel %vm1627_vm2, %v4420_v16, %v1624_v39 }
 0x684   :  { %v1639_v60 = vmul.f32 %v1628_v51, %v5129_v38  ;;  %v4283_v38 = vld [vmem:[%s5982_s4 + $0x18] sm:$0xff] }
 0x685   :  { %v1632_v54 = vmul.f32 0.5, %v1631_v49  ;;  %1868 = vmatpush.bf16.msra.mxu3 %v4283_v38  ;;  %v4301_v38 = vld [vmem:[%s5979_s1 + $0x64] sm:$0xf0] }
 0x686   :  { %v1642_v42 = vmul.f32 %v1641_v23, %v1639_v60 }
 0x687   :  { %v1633_v55 = vsub.f32 1.5, %v1632_v54 }
 0x688   :  { %v1645_v9 = vadd.f32 %v1644_v4, %v1642_v42  ;;  %v4303_v42 = vld [vmem:[%s5979_s1 + $0x74] sm:$0xf0] }
 0x689   :  { %v1634_v59 = vmul.f32 %v4422_v1, %v1633_v55 }
 0x68b   :  { %v1638_v61 = vsel %vm1637_vm5, %v4422_v1, %v1634_v59 }
 0x68c   :  { %v1640_v17 = vmul.f32 %v1638_v61, %v5136_v63  ;;  %v4282_v63 = vld [vmem:[%s5982_s4 + $0x10] sm:$0xff] }
 0x68d   :  { %1869 = vmatpush.bf16.msra.mxu3 %v4282_v63  ;;  %v4050_v63 = vld [vmem:[%s5979_s1 + $0x68] sm:$0xf0] }
 0x68e   :  { %v1643_v47 = vmul.f32 %v1641_v23, %v1640_v17 }
 0x690   :  { %v1646_v8 = vadd.f32 %v1644_v4, %v1643_v47  ;;  %v4056_v4 = vld [vmem:[%s5979_s1 + $0x70] sm:$0xf]  ;;  %v4302_v47 = vld [vmem:[%s5979_s1 + $0x74] sm:$0xf] }
 0x691   :  { %1870 = vmatpush.bf16.msra.mxu3 %v4281_v22  ;;  %v4057_v17 = vor.u32 %v4303_v42, %v4056_v4  ;;  %v4053_v22 = vor.u32 %v4300_v19, %v4050_v63 }
 0x692   :  { %v1647_v14 = vpack.c.bf16 %v1646_v8, %v1645_v9  ;;  %v4058_v9 = vld [vmem:[%s5979_s1 + $0x78] sm:$0xf0]  ;;  %v4048_v8 = vld [vmem:[%s5979_s1 + $0x60] sm:$0xf] }
 0x693   :  { %2001 = vmatpush.bf16.msrb.mxu1 %v4057_v17  ;;  %v4049_v26 = vor.u32 %v4301_v38, %v4048_v8 }
 0x694   :  { %3956 = vmatmul.msk.bf16.vlgmr.msra.gmra.mxu1 %vm41_vm0, %v1647_v14  ;;  %3957 = vmatmul.msk.bf16.vlgmr.msrb.gmra.mxu2 %vm41_vm0, %v1647_v14  ;;  %v4061_v14 = vor.u32 %v4302_v47, %v4058_v9 }
 0x695   :  { %1871 = vmatpush.bf16.msra.mxu3 %v4280_v57  ;;  %v4299_v57 = vld [vmem:[%s5979_s1 + $0x54] sm:$0xf0] }
 0x696   :  { %2015 = vmatpush.bf16.msra.mxu2 %v4061_v14  ;;  %v4041_v34 = vor.u32 %v4299_v57, %v4040_v7 }
 0x697   :  { %2002 = vmatpush.bf16.msrb.mxu1 %v4049_v26 }
 0x69a   :  { %2016 = vmatpush.bf16.msra.mxu2 %v4053_v22 }
 0x69b   :  { %2003 = vmatpush.bf16.msrb.mxu1 %v4041_v34 }
 0x711   :  { %v1710_v30 = vpop.f32.mrf.mxu1 }
 0x712   :  { %v1711_v35 = vadd.f32 %v1710_v30, %v1656_v31  ;;  %v4042_v30 = vld [vmem:[%s5979_s1 + $0x58] sm:$0xf0] }
 0x714   :  { %v1729_v32 = vmax.f32 %v1711_v35, 0.0 }
 0x717   :  { %v1724_v56 = vpop.f32.mrf.mxu2 }
 0x718   :  { %v1725_v44 = vadd.f32 %v1724_v56, %v1657_v43 }
 0x719   :  { %v1712_v36 = vpop.f32.mrf.mxu1 }
 0x71a   :  { %v1713_v5 = vadd.f32 %v1712_v36, %v1656_v31  ;;  %v1730_v16 = vmax.f32 %v1725_v44, 0.0  ;;  %v4045_v36 = vor.u32 %v4298_v27, %v4042_v30  ;;  %v4034_v44 = vld [vmem:[%s5979_s1 + $0x48] sm:$0xf0] }
 0x71c   :  { %v1731_v12 = vmax.f32 %v1713_v5, 0.0  ;;  %v4297_v5 = vld [vmem:[%s5979_s1 + $0x44] sm:$0xf0]  ;;  %2017 = vmatpush.bf16.msra.mxu2 %v4045_v36 }
 0x71e   :  { %v1733_v45 = vpack.c.bf16 %v1731_v12, %v1729_v32  ;;  %v4296_v12 = vld [vmem:[%s5979_s1 + $0x44] sm:$0xf] }
 0x71f   :  { %v1726_v46 = vpop.f32.mrf.mxu2 }
 0x720   :  { %v1727_v13 = vadd.f32 %v1726_v46, %v1657_v43  ;;  %1872 = vmatmul.bf16.vlgmr.msra.gmra.mxu3 %v1733_v45  ;;  %v4032_v43 = vld [vmem:[%s5979_s1 + $0x40] sm:$0xf] }
 0x721   :  { %v4033_v46 = vor.u32 %v4297_v5, %v4032_v43 }
 0x722   :  { %v1732_v18 = vmax.f32 %v1727_v13, 0.0  ;;  %v4037_v13 = vor.u32 %v4296_v12, %v4034_v44 }
 0x723   :  { %2004 = vmatpush.bf16.msrb.mxu1 %v4033_v46 }
 0x724   :  { %v1734_v52 = vpack.c.bf16 %v1732_v18, %v1730_v16  ;;  %2018 = vmatpush.bf16.msra.mxu2 %v4037_v13 }
 0x726   :  { %1886 = vmatmul.bf16.vlgmr.msra.gmra.mxu0 %v1734_v52 }
 0x7a3   :  { %v1873_v0 = vpop.f32.mrf.mxu3  ;;  %v1887_v58 = vpop.f32.mrf.mxu0 }
 0x7a4   :  { %v1874_v6 = vadd.f32 %v1873_v0, %v1767_v21 }
 0x7a6   :  { %v1888_v2 = vadd.f32 %v1887_v58, %v1874_v6 }
 0x7a8   :  { %v5256_v24 = vadd.f32 %v1888_v2, %v5116_v41 }
 0x7aa   :  { %v1894_v53 = vsel %vm41_vm0, %v5256_v24, 0.0 }
 0x7ab   :  { %v1875_v20 = vpop.f32.mrf.mxu3  ;;  %1895 = vadd.xlane.f32.xlu2 %v1894_v53  ;;  %v1889_v62 = vpop.f32.mrf.mxu0 }
 0x7ac   :  { %v1876_v28 = vadd.f32 %v1875_v20, %v1767_v21  ;;  %v1938_v20 = vperm.slane %v5110_v29, 7 }
 0x7ae   :  { %v1890_v37 = vadd.f32 %v1889_v62, %v1876_v28  ;;  %v32_v62 = vld [vmem:[%s5984_s6 + $0x10] sm:$0xff] }
 0x7b0   :  { %v5261_v40 = vadd.f32 %v1890_v37, %v5123_v50 }
 0x7b2   :  { %v1897_v33 = vsel %vm41_vm0, %v5261_v40, 0.0 }
 0x7b3   :  { %1898 = vadd.xlane.f32.xlu0 %v1897_v33 }
 0x81e   :  { %v1896_v1 = vpop.xlane.xlu2 %1895 }
 0x81f   :  { %v1900_v39 = vmul.f32 %v1896_v1, %v4559_v10  ;;  %v1941_v1 = vperm.slane %v32_v62, 0 }
 0x821   :  { %v5267_v41 = vsub.f32 %v5256_v24, %v1900_v39 }
 0x823   :  { %v1904_v48 = vmul.f32 %v5267_v41, %v5267_v41 }
 0x825   :  { %v1906_v49 = vsel %vm41_vm0, %v1904_v48, 0.0 }
 0x826   :  { %v1899_v51 = vpop.xlane.xlu0 %1898  ;;  %1907 = vadd.xlane.f32.xlu1 %v1906_v49 }
 0x827   :  { %v1901_v50 = vmul.f32 %v1899_v51, %v4559_v10 }
 0x829   :  { %v5274_v54 = vsub.f32 %v5261_v40, %v1901_v50 }
 0x82b   :  { %v1905_v55 = vmul.f32 %v5274_v54, %v5274_v54 }
 0x82d   :  { %v1909_v23 = vsel %vm41_vm0, %v1905_v55, 0.0 }
 0x82e   :  { %1910 = vadd.xlane.f32.xlu2 %v1909_v23 }
 0x899   :  { %v1908_v60 = vpop.xlane.xlu1 %1907 }
 0x89a   :  { %v1912_v59 = vmul.f32 %v1908_v60, %v4559_v10 }
 0x89c   :  { %v1914_v61 = vadd.f32 1e-05, %v1912_v59 }
 0x89e   :  { %4423 = vrsqrt.f32 %v1914_v61  ;;  %vm1922_vm7 = vweird.f32 %v1914_v61 }
 0x8a1   :  { %v1911_v11 = vpop.xlane.xlu2 %1910 }
 0x8a2   :  { %v1913_v31 = vmul.f32 %v1911_v11, %v4559_v10 }
 0x8a4   :  { %v4424_v56 = vpop.eup %4423  ;;  %v1915_v35 = vadd.f32 1e-05, %v1913_v31 }
 0x8a5   :  { %v1917_v32 = vmul.f32 %v4424_v56, %v1914_v61  ;;  %vm1923_vm6 = vweird.f32 %v4424_v56 }
 0x8a6   :  { %4425 = vrsqrt.f32 %v1915_v35  ;;  %vm1924_vm11 = vmor %vm1922_vm7, %vm1923_vm6  ;;  %vm1932_vm1 = vweird.f32 %v1915_v35 }
 0x8a7   :  { %v1918_v45 = vmul.f32 %v4424_v56, %v1917_v32 }
 0x8a9   :  { %v1919_v16 = vmul.f32 0.5, %v1918_v45 }
 0x8ab   :  { %v1920_v18 = vsub.f32 1.5, %v1919_v16 }
 0x8ac   :  { %v4426_v52 = vpop.eup %4425 }
 0x8ad   :  { %v1921_v21 = vmul.f32 %v4424_v56, %v1920_v18  ;;  %v1927_v0 = vmul.f32 %v4426_v52, %v1915_v35  ;;  %vm1933_vm15 = vweird.f32 %v4426_v52 }
 0x8ae   :  { %vm1934_vm2 = vmor %vm1932_vm1, %vm1933_vm15 }
 0x8af   :  { %v1928_v58 = vmul.f32 %v4426_v52, %v1927_v0  ;;  %v1925_v6 = vsel %vm1924_vm11, %v4424_v56, %v1921_v21 }
 0x8b0   :  { %v1936_v28 = vmul.f32 %v1925_v6, %v5267_v41 }
 0x8b1   :  { %v1929_v2 = vmul.f32 0.5, %v1928_v58 }
 0x8b2   :  { %v1939_v39 = vmul.f32 %v1938_v20, %v1936_v28 }
 0x8b3   :  { %v1930_v53 = vsub.f32 1.5, %v1929_v2 }
 0x8b4   :  { %v1942_v51 = vadd.f32 %v1941_v1, %v1939_v39 }
 0x8b5   :  { %v1931_v37 = vmul.f32 %v4426_v52, %v1930_v53 }
 0x8b7   :  { %v1935_v33 = vsel %vm1934_vm2, %v4426_v52, %v1931_v37 }
 0x8b8   :  { %v1937_v48 = vmul.f32 %v1935_v33, %v5274_v54 }
 0x8ba   :  { %v1940_v49 = vmul.f32 %v1938_v20, %v1937_v48 }
 0x8bc   :  { %v1943_v50 = vadd.f32 %v1941_v1, %v1940_v49 }
 0x8be   :  { %v1944_v55 = vpack.c.bf16 %v1943_v50, %v1942_v51 }
 0x8c0   :  { %4062 = vmatmul.msk.bf16.vlgmr.msrb.gmra.mxu1 %vm41_vm0, %v1944_v55  ;;  %4063 = vmatmul.msk.bf16.vlgmr.msra.gmra.mxu2 %vm41_vm0, %v1944_v55 }
 0x93d   :  { %v2006_v29 = vpop.f32.mrf.mxu1 }
 0x943   :  { %v2020_v41 = vpop.f32.mrf.mxu2 }
 0x944   :  { %v2025_v23 = vpack.c.bf16 %v2020_v41, %v2006_v29 }
 0x945   :  { %v2008_v60 = vpop.f32.mrf.mxu1 }
 0x946   :  { %2037 = vrot.lane.b32.xlu2 %v2025_v23, %s4498_s16  ;;  %2033 = vrot.lane.b32.xlu1 %v2025_v23, %s4500_s18  ;;  %v2513_v4 = vrot.slane %v2025_v23, 4  ;;  %v2044_v47 = vshrl.u32 %v2025_v23, 16 }
 0x947   :  { %2029 = vrot.lane.b32.xlu0 %v2025_v23, %s4499_s17 }
 0x948   :  { %v2524_v9 = vshrl.u32 %v2513_v4, 16 }
 0x94b   :  { %v2022_v59 = vpop.f32.mrf.mxu2 }
 0x94c   :  { %v5340_v54 = vpack.c.bf16 %v2022_v59, %v2008_v60 }
 0x94e   :  { %2269 = vrot.lane.b32.xlu2 %v2025_v23, %s4501_s19  ;;  %2035 = vrot.lane.b32.xlu1 %v5340_v54, %s4500_s18 }
 0x94f   :  { %2031 = vrot.lane.b32.xlu0 %v5340_v54, %s4499_s17 }
 0x957   :  { %2039 = vrot.lane.b32.xlu0 %v5340_v54, %s4498_s16 }
 0x9a0   :  { %v2038_v61 = vpop.permute.xlu2 %2037 }
 0x9a1   :  { %2281 = vrot.lane.b32.xlu2 %v2038_v61, %s4501_s19  ;;  %v2519_v42 = vrot.slane %v2038_v61, 4  ;;  %v2051_v8 = vshrl.u32 %v2038_v61, 16 }
 0x9a3   :  { %v2531_v26 = vshrl.u32 %v2519_v42, 16 }
 0x9b8   :  { %v2034_v17 = vpop.permute.xlu1 %2033 }
 0x9b9   :  { %v2049_v14 = vpack.i.b16 %v2038_v61, %v2034_v17  ;;  %v2050_v38 = vshrl.u32 %v2034_v17, 16  ;;  %v2517_v19 = vrot.slane %v2034_v17, 4  ;;  %v2030_v63 = vpop.permute.xlu0 %2029  ;;  %2277 = vrot.lane.b32.xlu0 %v2034_v17, %s4501_s19 }
 0x9ba   :  { %v2043_v22 = vpack.i.b16 %v2030_v63, %v2025_v23  ;;  %v2045_v7 = vshrl.u32 %v2030_v63, 16  ;;  %v2515_v57 = vrot.slane %v2030_v63, 4  ;;  %2273 = vrot.lane.b32.xlu1 %v2030_v63, %s4501_s19 }
 0x9bb   :  { %v2052_v11 = vpack.i.b16 %v2051_v8, %v2050_v38  ;;  %v2074_v27 = vperm.slane %v2049_v14, %v4648_v25  ;;  %v2529_v30 = vpack.i.b16 %v2519_v42, %v2517_v19  ;;  %v2530_v31 = vshrl.u32 %v2517_v19, 16 }
 0x9bc   :  { %v2046_v34 = vpack.i.b16 %v2045_v7, %v2044_v47  ;;  %v2069_v56 = vperm.slane %v2043_v22, %v4648_v25  ;;  %v2523_v35 = vpack.i.b16 %v2515_v57, %v2513_v4  ;;  %v2525_v36 = vshrl.u32 %v2515_v57, 16 }
 0x9bd   :  { %v2075_v43 = vrot.slane %v2074_v27, 4  ;;  %v2100_v5 = vperm.slane %v2052_v11, %v4648_v25  ;;  %v2532_v32 = vpack.i.b16 %v2531_v26, %v2530_v31  ;;  %v2554_v12 = vperm.slane %v2529_v30, %v4648_v25 }
 0x9be   :  { %v2077_v44 = vrot.slane %v2069_v56, 4  ;;  %v2095_v45 = vperm.slane %v2046_v34, %v4648_v25  ;;  %v2526_v46 = vpack.i.b16 %v2525_v36, %v2524_v9  ;;  %v2549_v13 = vperm.slane %v2523_v35, %v4648_v25 }
 0x9bf   :  { %v2101_v16 = vrot.slane %v2100_v5, 4  ;;  %v2555_v18 = vrot.slane %v2554_v12, 4  ;;  %v2580_v52 = vperm.slane %v2532_v32, %v4648_v25  ;;  %v2076_v21 = vsel %vm230_vm8, %v2075_v43, %v2069_v56 }
 0x9c0   :  { %v2078_v0 = vsel %vm230_vm8, %v2074_v27, %v2077_v44  ;;  %v2082_v58 = vperm.slane %v2076_v21, %v4675_v3  ;;  %v2103_v6 = vrot.slane %v2095_v45, 4  ;;  %v2557_v2 = vrot.slane %v2549_v13, 4  ;;  %v5362_v53 = vpop.permute.xlu1 %2035 }
 0x9c1   :  { %v2086_v20 = vperm.slane %v2078_v0, %v4675_v3  ;;  %v2102_v28 = vsel %vm230_vm8, %v2101_v16, %v2095_v45  ;;  %v2556_v62 = vsel %vm230_vm8, %v2555_v18, %v2549_v13  ;;  %v5367_v37 = vpop.permute.xlu0 %2031  ;;  %2279 = vrot.lane.b32.xlu2 %v5362_v53, %s4501_s19  ;;  %v2581_v49 = vrot.slane %v2580_v52, 4 }
 0x9c2   :  { %v2087_v33 = vrot.slane %v2082_v58, 4  ;;  %v2104_v1 = vsel %vm230_vm8, %v2100_v5, %v2103_v6  ;;  %v2108_v39 = vperm.slane %v2102_v28, %v4675_v3  ;;  %v2558_v48 = vsel %vm230_vm8, %v2554_v12, %v2557_v2  ;;  %2271 = vrot.lane.b32.xlu1 %v5340_v54, %s4501_s19  ;;  %2275 = vrot.lane.b32.xlu0 %v5367_v37, %s4501_s19 }
 0x9c3   :  { %v2089_v51 = vrot.slane %v2086_v20, 4  ;;  %v2112_v50 = vperm.slane %v2104_v1, %v4675_v3  ;;  %v2575_v55 = vperm.slane %v2526_v46, %v4648_v25  ;;  %v2566_v11 = vperm.slane %v2558_v48, %v4675_v3 }
 0x9c4   :  { %v2113_v41 = vrot.slane %v2108_v39, 4  ;;  %v2088_v59 = vsel %vm230_vm8, 0, %v2087_v33  ;;  %v2562_v30 = vperm.slane %v2556_v62, %v4675_v3 }
 0x9c5   :  { %v2090_v29 = vsel %vm230_vm8, 0, %v2089_v51  ;;  %v2115_v23 = vrot.slane %v2112_v50, 4  ;;  %v2169_v60 = vsel %vm230_vm8, %v2089_v51, %v2082_v58  ;;  %v2582_v17 = vsel %vm230_vm8, %v2581_v49, %v2575_v55 }
 0x9c6   :  { %v2174_v61 = vrot.slane %v2090_v29, 4  ;;  %v2583_v47 = vrot.slane %v2575_v55, 4  ;;  %v2114_v14 = vsel %vm230_vm8, 0, %v2113_v41  ;;  %v2173_v7 = vperm.slane %v2169_v60, %v4648_v25 }
 0x9c7   :  { %v2116_v4 = vsel %vm230_vm8, 0, %v2115_v23  ;;  %v2188_v42 = vsel %vm230_vm8, %v2115_v23, %v2108_v39  ;;  %v2569_v27 = vrot.slane %v2566_v11, 4  ;;  %v2588_v36 = vperm.slane %v2582_v17, %v4675_v3 }
 0x9c8   :  { %v2175_v9 = vsel %vm230_vm8, %v2174_v61, %v2088_v59  ;;  %v2193_v8 = vrot.slane %v2116_v4, 4  ;;  %v2584_v19 = vsel %vm230_vm8, %v2580_v52, %v2583_v47  ;;  %v2192_v43 = vperm.slane %v2188_v42, %v4648_v25 }
 0x9c9   :  { %v2179_v38 = vperm.slane %v2175_v9, %v4648_v25  ;;  %v5390_v63 = vpop.permute.xlu0 %2039  ;;  %v2592_v31 = vperm.slane %v2584_v19, %v4675_v3  ;;  %v2570_v35 = vsel %vm230_vm8, 0, %v2569_v27  ;;  %v2567_v5 = vrot.slane %v2562_v30, 4 }
 0x9ca   :  { %v2194_v26 = vsel %vm230_vm8, %v2193_v8, %v2114_v14  ;;  %2283 = vrot.lane.b32.xlu1 %v5390_v63, %s4501_s19  ;;  %v2654_v44 = vrot.slane %v2570_v35, 4  ;;  %v2593_v13 = vrot.slane %v2588_v36, 4  ;;  %v2649_v0 = vsel %vm230_vm8, %v2569_v27, %v2562_v30 }
 0x9cb   :  { %v2180_v22 = vrot.slane %v2179_v38, 4  ;;  %v2198_v34 = vperm.slane %v2194_v26, %v4648_v25  ;;  %v2595_v12 = vrot.slane %v2592_v31, 4  ;;  %v2568_v21 = vsel %vm230_vm8, 0, %v2567_v5 }
 0x9cc   :  { %v2655_v28 = vsel %vm230_vm8, %v2654_v44, %v2568_v21  ;;  %v2594_v55 = vsel %vm230_vm8, 0, %v2593_v13  ;;  %v2653_v29 = vperm.slane %v2649_v0, %v4648_v25  ;;  %v2057_v35 = vshrl.u32 %v5367_v37, 16 }
 0x9cd   :  { %v2181_v57 = vsel %vm230_vm8, %v2180_v22, %v2173_v7  ;;  %v2199_v32 = vrot.slane %v2198_v34, 4  ;;  %v2596_v20 = vsel %vm230_vm8, 0, %v2595_v12  ;;  %v2659_v1 = vperm.slane %v2655_v28, %v4648_v25 }
 0x9ce   :  { %v5402_v56 = vperm.slane %v2181_v57, %v4675_v3  ;;  %v2668_v39 = vsel %vm230_vm8, %v2595_v12, %v2588_v36  ;;  %v2673_v50 = vrot.slane %v2596_v20, 4  ;;  %v2055_v34 = vpack.i.b16 %v5367_v37, %v5340_v54 }
 0x9cf   :  { %v2200_v45 = vsel %vm230_vm8, %v2199_v32, %v2192_v43  ;;  %v2660_v41 = vrot.slane %v2659_v1, 4  ;;  %v2672_v42 = vperm.slane %v2668_v39, %v4648_v25  ;;  %v2061_v36 = vpack.i.b16 %v5390_v63, %v5362_v53 }
 0x9d0   :  { %v2186_v46 = vrot.slane %v5402_v56, 4  ;;  %v5410_v16 = vperm.slane %v2200_v45, %v4675_v3  ;;  %v2248_v18 = vshrl.u32 %v5402_v56, 16  ;;  %v2674_v60 = vsel %vm230_vm8, %v2673_v50, %v2594_v55  ;;  %v2270_v55 = vpop.permute.xlu2 %2269 }
 0x9d1   :  { %v2661_v59 = vsel %vm230_vm8, %v2660_v41, %v2653_v29  ;;  %v2678_v61 = vperm.slane %v2674_v60, %v4648_v25  ;;  %v2056_v43 = vshrl.u32 %v5340_v54, 16  ;;  %v2063_v5 = vshrl.u32 %v5390_v63, 16 }
 0x9d2   :  { %v5414_v52 = vsel %vm230_vm8, 0, %v2186_v46  ;;  %v2247_v58 = vpack.i.b16 %v5410_v16, %v5402_v56  ;;  %v2249_v6 = vshrl.u32 %v5410_v16, 16  ;;  %v2205_v2 = vrot.slane %v5410_v16, 4 }
 0x9d3   :  { %v2254_v49 = vshrl.u32 %v5414_v52, 16  ;;  %v5443_v4 = vperm.slane %v2661_v59, %v4675_v3  ;;  %v2679_v17 = vrot.slane %v2678_v61, 4  ;;  %v2121_v32 = vperm.slane %v2055_v34, %v4648_v25 }
 0x9d4   :  { %v5424_v62 = vpack.i.b16 %v2249_v6, %v2248_v18  ;;  %v5427_v33 = vsel %vm230_vm8, 0, %v2205_v2  ;;  %v2062_v12 = vshrl.u32 %v5362_v53, 16  ;;  %v2058_v44 = vpack.i.b16 %v2057_v35, %v2056_v43 }
 0x9d5   :  { %v2253_v48 = vpack.i.b16 %v5427_v33, %v5414_v52  ;;  %v2255_v51 = vshrl.u32 %v5427_v33, 16  ;;  %v2666_v47 = vrot.slane %v5443_v4, 4  ;;  %v2680_v9 = vsel %vm230_vm8, %v2679_v17, %v2672_v42 }
 0x9d6   :  { %v5449_v8 = vperm.slane %v2680_v9, %v4675_v3  ;;  %v2728_v14 = vshrl.u32 %v5443_v4, 16  ;;  %v2516_v45 = vrot.slane %v5367_v37, 4  ;;  %v2126_v46 = vperm.slane %v2061_v36, %v4648_v25 }
 0x9d7   :  { %v5437_v23 = vpack.i.b16 %v2255_v51, %v2254_v49  ;;  %v5456_v26 = vsel %vm230_vm8, 0, %v2666_v47  ;;  %v2514_v13 = vrot.slane %v5340_v54, 4  ;;  %v2064_v18 = vpack.i.b16 %v2063_v5, %v2062_v12 }
 0x9d8   :  { %v2727_v38 = vpack.i.b16 %v5449_v8, %v5443_v4  ;;  %v2729_v19 = vshrl.u32 %v5449_v8, 16  ;;  %v2685_v22 = vrot.slane %v5449_v8, 4  ;;  %v2734_v27 = vshrl.u32 %v5456_v26, 16 }
 0x9d9   :  { %v2520_v21 = vrot.slane %v5390_v63, 4  ;;  %v2518_v0 = vrot.slane %v5362_v53, 4  ;;  %v2129_v6 = vrot.slane %v2121_v32, 4  ;;  %v2147_v2 = vperm.slane %v2058_v44, %v4648_v25 }
 0x9da   :  { %v5459_v7 = vpack.i.b16 %v2729_v19, %v2728_v14  ;;  %v5462_v57 = vsel %vm230_vm8, 0, %v2685_v22  ;;  %v2535_v20 = vpack.i.b16 %v2516_v45, %v2514_v13  ;;  %v2537_v28 = vshrl.u32 %v2516_v45, 16 }
 0x9db   :  { %v2733_v11 = vpack.i.b16 %v5462_v57, %v5456_v26  ;;  %v2735_v30 = vshrl.u32 %v5462_v57, 16  ;;  %v2127_v1 = vrot.slane %v2126_v46, 4  ;;  %v2130_v39 = vsel %vm230_vm8, %v2126_v46, %v2129_v6 }
 0x9dc   :  { %v2536_v49 = vshrl.u32 %v2514_v13, 16  ;;  %v2152_v37 = vperm.slane %v2064_v18, %v4648_v25  ;;  %v2541_v51 = vpack.i.b16 %v2520_v21, %v2518_v0  ;;  %v2543_v50 = vshrl.u32 %v2520_v21, 16 }
 0x9dd   :  { %v5468_v31 = vpack.i.b16 %v2735_v30, %v2734_v27  ;;  %v2542_v54 = vshrl.u32 %v2518_v0, 16  ;;  %v2155_v29 = vrot.slane %v2147_v2, 4  ;;  %v2601_v63 = vperm.slane %v2535_v20, %v4648_v25 }
 0x9de   :  { %v2538_v41 = vpack.i.b16 %v2537_v28, %v2536_v49  ;;  %v2138_v53 = vperm.slane %v2130_v39, %v4675_v3  ;;  %v2128_v60 = vsel %vm230_vm8, %v2127_v1, %v2121_v32  ;;  %v2153_v59 = vrot.slane %v2152_v37, 4 }
 0x9df   :  { %v2156_v61 = vsel %vm230_vm8, %v2152_v37, %v2155_v29  ;;  %v2544_v42 = vpack.i.b16 %v2543_v50, %v2542_v54  ;;  %v2606_v17 = vperm.slane %v2541_v51, %v4648_v25  ;;  %v2609_v47 = vrot.slane %v2601_v63, 4 }
 0x9e0   :  { %v2627_v9 = vperm.slane %v2538_v41, %v4648_v25  ;;  %v2134_v14 = vperm.slane %v2128_v60, %v4675_v3  ;;  %v2141_v19 = vrot.slane %v2138_v53, 4  ;;  %v2164_v22 = vperm.slane %v2156_v61, %v4675_v3 }
 0x9e1   :  { %v2154_v27 = vsel %vm230_vm8, %v2153_v59, %v2147_v2  ;;  %v2610_v30 = vsel %vm230_vm8, %v2606_v17, %v2609_v47  ;;  %v2632_v34 = vperm.slane %v2544_v42, %v4648_v25  ;;  %v2607_v35 = vrot.slane %v2606_v17, 4 }
 0x9e2   :  { %v2288_v43 = vshrl.u32 %v2270_v55, 16  ;;  %v2635_v5 = vrot.slane %v2627_v9, 4  ;;  %v2139_v32 = vrot.slane %v2134_v14, 4  ;;  %v2142_v12 = vsel %vm230_vm8, 0, %v2141_v19 }
 0x9e3   :  { %v2160_v44 = vperm.slane %v2154_v27, %v4675_v3  ;;  %v2167_v45 = vrot.slane %v2164_v22, 4  ;;  %v5501_v46 = vsel %vm230_vm8, %v2141_v19, %v2134_v14  ;;  %v2618_v13 = vperm.slane %v2610_v30, %v4675_v3 }
 0x9e4   :  { %v2636_v21 = vsel %vm230_vm8, %v2632_v34, %v2635_v5  ;;  %v2212_v28 = vrot.slane %v2142_v12, 4  ;;  %v2608_v1 = vsel %vm230_vm8, %v2607_v35, %v2601_v63  ;;  %v2140_v37 = vsel %vm230_vm8, 0, %v2139_v32 }
 0x9e5   :  { %v2633_v51 = vrot.slane %v2632_v34, 4  ;;  %v2168_v29 = vsel %vm230_vm8, 0, %v2167_v45  ;;  %v2644_v41 = vperm.slane %v2636_v21, %v4675_v3  ;;  %v2165_v59 = vrot.slane %v2160_v44, 4 }
 0x9e6   :  { %v5511_v61 = vrot.slane %v2618_v13, 4  ;;  %v2213_v63 = vsel %vm230_vm8, %v2212_v28, %v2140_v37  ;;  %v5516_v17 = vperm.slane %v2608_v1, %v4675_v3  ;;  %v2231_v19 = vrot.slane %v2168_v29, 4 }
 0x9e7   :  { %v2634_v22 = vsel %vm230_vm8, %v2633_v51, %v2627_v9  ;;  %v5521_v34 = vrot.slane %v2644_v41, 4  ;;  %v2166_v5 = vsel %vm230_vm8, 0, %v2165_v59  ;;  %v5540_v37 = vsel %vm230_vm8, %v2167_v45, %v2160_v44 }
 0x9e8   :  { %v5528_v32 = vsel %vm230_vm8, 0, %v5511_v61  ;;  %v5533_v21 = vperm.slane %v2634_v22, %v4675_v3  ;;  %v2619_v59 = vrot.slane %v5516_v17, 4  ;;  %v3004_v52 = vsel %vm1141_vm9, %v5459_v7, 0 }
 0x9e9   :  { %v2648_v51 = vsel %vm230_vm8, 0, %v5521_v34  ;;  %v3023_v33 = vsel %vm1141_vm9, %v2733_v11, 0 }
 0x9ea   :  { %v2711_v44 = vrot.slane %v2648_v51, 4 }
 0x9fb   :  { %v2282_v36 = vpop.permute.xlu2 %2281 }
 0x9fc   :  { %v2295_v0 = vshrl.u32 %v2282_v36, 16 }
 0xa2b   :  { %v2278_v18 = vpop.permute.xlu0 %2277 }
 0xa2c   :  { %v2274_v6 = vpop.permute.xlu1 %2273  ;;  %v2293_v2 = vpack.i.b16 %v2282_v36, %v2278_v18  ;;  %v2294_v20 = vshrl.u32 %v2278_v18, 16 }
 0xa2d   :  { %v2287_v39 = vpack.i.b16 %v2274_v6, %v2270_v55  ;;  %v2289_v49 = vshrl.u32 %v2274_v6, 16 }
 0xa2e   :  { %v2296_v50 = vpack.i.b16 %v2295_v0, %v2294_v20  ;;  %v2318_v54 = vperm.slane %v2293_v2, %v4648_v25 }
 0xa2f   :  { %v2290_v53 = vpack.i.b16 %v2289_v49, %v2288_v43  ;;  %v2313_v60 = vperm.slane %v2287_v39, %v4648_v25  ;;  %v2217_v49 = vperm.slane %v2213_v63, %v4648_v25 }
 0xa30   :  { %v2319_v42 = vrot.slane %v2318_v54, 4  ;;  %v2344_v55 = vperm.slane %v2296_v50, %v4648_v25 }
 0xa31   :  { %v2321_v47 = vrot.slane %v2313_v60, 4  ;;  %v2339_v14 = vperm.slane %v2290_v53, %v4648_v25 }
 0xa32   :  { %v2320_v27 = vsel %vm230_vm8, %v2319_v42, %v2313_v60  ;;  %v2345_v30 = vrot.slane %v2344_v55, 4  ;;  %v5546_v60 = vsel %vm230_vm8, %v2231_v19, %v2166_v5  ;;  %v2692_v42 = vrot.slane %v5528_v32, 4 }
 0xa33   :  { %v2347_v35 = vrot.slane %v2339_v14, 4  ;;  %v2322_v36 = vsel %vm230_vm8, %v2318_v54, %v2321_v47  ;;  %v2326_v43 = vperm.slane %v2320_v27, %v4675_v3 }
 0xa34   :  { %v2330_v12 = vperm.slane %v2322_v36, %v4675_v3  ;;  %v2346_v9 = vsel %vm230_vm8, %v2345_v30, %v2339_v14  ;;  %v2272_v13 = vpop.permute.xlu1 %2271  ;;  %v2276_v18 = vpop.permute.xlu0 %2275  ;;  %v2645_v14 = vrot.slane %v5533_v21, 4 }
 0xa35   :  { %v2348_v0 = vsel %vm230_vm8, %v2344_v55, %v2347_v35  ;;  %v2352_v6 = vperm.slane %v2346_v9, %v4675_v3  ;;  %v2300_v2 = vshrl.u32 %v2272_v13, 16  ;;  %v2331_v20 = vrot.slane %v2326_v43, 4  ;;  %v2280_v55 = vpop.permute.xlu2 %2279 }
 0xa36   :  { %v2333_v28 = vrot.slane %v2330_v12, 4  ;;  %v2356_v1 = vperm.slane %v2348_v0, %v4675_v3  ;;  %v2301_v39 = vshrl.u32 %v2276_v18, 16  ;;  %v2299_v50 = vpack.i.b16 %v2276_v18, %v2272_v13 }
 0xa37   :  { %v2357_v29 = vrot.slane %v2352_v6, 4  ;;  %v2332_v45 = vsel %vm230_vm8, 0, %v2331_v20  ;;  %v2306_v35 = vshrl.u32 %v2280_v55, 16 }
 0xa38   :  { %v2334_v54 = vsel %vm230_vm8, 0, %v2333_v28  ;;  %v2359_v41 = vrot.slane %v2356_v1, 4  ;;  %v2302_v53 = vpack.i.b16 %v2301_v39, %v2300_v2  ;;  %v2413_v22 = vsel %vm230_vm8, %v2333_v28, %v2326_v43 }
 0xa39   :  { %v2418_v63 = vrot.slane %v2334_v54, 4  ;;  %v2365_v19 = vperm.slane %v2299_v50, %v4648_v25  ;;  %v2358_v36 = vsel %vm230_vm8, 0, %v2357_v29  ;;  %v2417_v43 = vperm.slane %v2413_v22, %v4648_v25 }
 0xa3a   :  { %v2360_v47 = vsel %vm230_vm8, 0, %v2359_v41  ;;  %v2391_v5 = vperm.slane %v2302_v53, %v4648_v25  ;;  %v2432_v9 = vsel %vm230_vm8, %v2359_v41, %v2352_v6  ;;  %v5563_v28 = vrot.slane %v2217_v49, 4 }
 0xa3b   :  { %v2419_v27 = vsel %vm230_vm8, %v2418_v63, %v2332_v45  ;;  %v2437_v30 = vrot.slane %v2360_v47, 4  ;;  %v2373_v1 = vrot.slane %v2365_v19, 4  ;;  %v2646_v50 = vsel %vm230_vm8, 0, %v2645_v14 }
 0xa3c   :  { %v2284_v32 = vpop.permute.xlu1 %2283  ;;  %v2423_v12 = vperm.slane %v2419_v27, %v4648_v25  ;;  %v2399_v54 = vrot.slane %v2391_v5, 4  ;;  %v2436_v29 = vperm.slane %v2432_v9, %v4648_v25  ;;  %v2620_v22 = vsel %vm230_vm8, 0, %v2619_v59 }
 0xa3d   :  { %v2305_v13 = vpack.i.b16 %v2284_v32, %v2280_v55  ;;  %v2307_v18 = vshrl.u32 %v2284_v32, 16  ;;  %v2438_v0 = vsel %vm230_vm8, %v2437_v30, %v2358_v36  ;;  %v2712_v14 = vsel %vm230_vm8, %v2711_v44, %v2646_v50 }
 0xa3e   :  { %v2424_v2 = vrot.slane %v2423_v12, 4  ;;  %v2442_v20 = vperm.slane %v2438_v0, %v4648_v25  ;;  %v2693_v50 = vsel %vm230_vm8, %v2692_v42, %v2620_v22 }
 0xa3f   :  { %v2308_v39 = vpack.i.b16 %v2307_v18, %v2306_v35  ;;  %v2370_v51 = vperm.slane %v2305_v13, %v4648_v25 }
 0xa40   :  { %v2425_v6 = vsel %vm230_vm8, %v2424_v2, %v2417_v43  ;;  %v2443_v41 = vrot.slane %v2442_v20, 4 }
 0xa41   :  { %v2371_v53 = vrot.slane %v2370_v51, 4  ;;  %v2374_v55 = vsel %vm230_vm8, %v2370_v51, %v2373_v1  ;;  %v2396_v63 = vperm.slane %v2308_v39, %v4648_v25  ;;  %v2429_v49 = vperm.slane %v2425_v6, %v4675_v3 }
 0xa42   :  { %v2382_v45 = vperm.slane %v2374_v55, %v4675_v3  ;;  %v2444_v47 = vsel %vm230_vm8, %v2443_v41, %v2436_v29  ;;  %v2716_v29 = vperm.slane %v2712_v14, %v4648_v25  ;;  %v2236_v14 = vperm.slane %v5546_v60, %v4648_v25 }
 0xa43   :  { %v2372_v27 = vsel %vm230_vm8, %v2371_v53, %v2365_v19  ;;  %v2397_v30 = vrot.slane %v2396_v63, 4  ;;  %v2400_v35 = vsel %vm230_vm8, %v2396_v63, %v2399_v54  ;;  %v2448_v36 = vperm.slane %v2444_v47, %v4675_v3 }
 0xa44   :  { %v2378_v32 = vperm.slane %v2372_v27, %v4675_v3  ;;  %v2385_v12 = vrot.slane %v2382_v45, 4  ;;  %v2408_v9 = vperm.slane %v2400_v35, %v4675_v3  ;;  %v2492_v13 = vshrl.u32 %v2429_v49, 16 }
 0xa45   :  { %v2398_v18 = vsel %vm230_vm8, %v2397_v30, %v2391_v5  ;;  %v2491_v0 = vpack.i.b16 %v2448_v36, %v2429_v49  ;;  %v2493_v43 = vshrl.u32 %v2448_v36, 16  ;;  %v2430_v59 = vrot.slane %v2429_v49, 4 }
 0xa46   :  { %v2383_v2 = vrot.slane %v2378_v32, 4  ;;  %v2386_v44 = vsel %vm230_vm8, 0, %v2385_v12  ;;  %v2404_v19 = vperm.slane %v2398_v18, %v4675_v3  ;;  %v2411_v20 = vrot.slane %v2408_v9, 4 }
 0xa47   :  { %v2456_v1 = vrot.slane %v2386_v44, 4  ;;  %v2753_v39 = vsel %vm904_vm10, %v2491_v0, 0  ;;  %v2494_v51 = vpack.i.b16 %v2493_v43, %v2492_v13  ;;  %v2451_v41 = vsel %vm230_vm8, %v2385_v12, %v2378_v32 }
 0xa48   :  { %v2384_v54 = vsel %vm230_vm8, 0, %v2383_v2  ;;  %v2409_v6 = vrot.slane %v2404_v19, 4  ;;  %v2412_v5 = vsel %vm230_vm8, 0, %v2411_v20  ;;  %2762 = vmatpush.bf16.xpose.msra.mxu1 %v2753_v39  ;;  %v2431_v42 = vsel %vm230_vm8, 0, %v2430_v59 }
 0xa49   :  { %v2457_v53 = vsel %vm230_vm8, %v2456_v1, %v2384_v54  ;;  %v2475_v55 = vrot.slane %v2412_v5, 4  ;;  %v2772_v63 = vsel %vm904_vm10, %v2494_v51, 0  ;;  %v2449_v45 = vrot.slane %v2448_v36, 4 }
 0xa4a   :  { %v2410_v49 = vsel %vm230_vm8, 0, %v2409_v6  ;;  %2781 = vmatpush.bf16.xpose.msrb.mxu2 %v2772_v63  ;;  %v2461_v47 = vperm.slane %v2457_v53, %v4648_v25  ;;  %v2470_v22 = vsel %vm230_vm8, %v2411_v20, %v2404_v19  ;;  %v2697_v30 = vperm.slane %v2693_v50, %v4648_v25 }
 0xa4b   :  { %v2476_v27 = vsel %vm230_vm8, %v2475_v55, %v2410_v49  ;;  %v2455_v35 = vperm.slane %v2451_v41, %v4648_v25  ;;  %v2450_v32 = vsel %vm230_vm8, 0, %v2449_v45  ;;  %v2498_v36 = vshrl.u32 %v2431_v42, 16 }
 0xa4c   :  { %v2462_v12 = vrot.slane %v2461_v47, 4  ;;  %v2480_v9 = vperm.slane %v2476_v27, %v4648_v25  ;;  %v2497_v13 = vpack.i.b16 %v2450_v32, %v2431_v42  ;;  %v2499_v18 = vshrl.u32 %v2450_v32, 16 }
 0xa4d   :  { %v2706_v0 = vsel %vm230_vm8, %v5521_v34, %v5533_v21  ;;  %v2474_v60 = vperm.slane %v2470_v22, %v4648_v25  ;;  %v2717_v2 = vrot.slane %v2716_v29, 4  ;;  %v2687_v34 = vsel %vm230_vm8, %v5511_v61, %v5516_v17 }
 0xa4e   :  { %v2463_v43 = vsel %vm230_vm8, %v2462_v12, %v2455_v35  ;;  %v2481_v59 = vrot.slane %v2480_v9, 4  ;;  %v2791_v44 = vsel %vm904_vm10, %v2497_v13, 0  ;;  %v2500_v19 = vpack.i.b16 %v2499_v18, %v2498_v36 }
 0xa4f   :  { %4064 = vmatmul.msk.bf16.vlgmr.msra.gmra.mxu1 %vm904_vm10, %v2247_v58  ;;  %v2467_v20 = vperm.slane %v2463_v43, %v4675_v3  ;;  %2800 = vmatpush.bf16.xpose.msrb.mxu3 %v2791_v44  ;;  %v2237_v1 = vrot.slane %v2236_v14, 4  ;;  %v2698_v39 = vrot.slane %v2697_v30, 4  ;;  %v2710_v51 = vperm.slane %v2706_v0, %v4648_v25 }
 0xa50   :  { %v2482_v21 = vsel %vm230_vm8, %v2481_v59, %v2474_v60  ;;  %v2211_v50 = vperm.slane %v5501_v46, %v4648_v25  ;;  %v2810_v56 = vsel %vm904_vm10, %v2500_v19, 0  ;;  %v2230_v61 = vperm.slane %v5540_v37, %v4648_v25 }
 0xa51   :  { %4065 = vmatmul.msk.bf16.vlgmr.msrb.gmra.mxu2 %vm904_vm10, %v5424_v62  ;;  %v2486_v16 = vperm.slane %v2482_v21, %v4675_v3  ;;  %v2468_v58 = vrot.slane %v2467_v20, 4  ;;  %2819 = vmatpush.bf16.xpose.msrb.mxu0 %v2810_v56  ;;  %v2504_v17 = vshrl.u32 %v2467_v20, 16  ;;  %v2691_v54 = vperm.slane %v2687_v34, %v4648_v25 }
 0xa52   :  { %v2718_v6 = vsel %vm230_vm8, %v2717_v2, %v2710_v51  ;;  %v2219_v62 = vsel %vm230_vm8, %v5563_v28, %v2211_v50  ;;  %v2238_v53 = vsel %vm230_vm8, %v2237_v1, %v2230_v61  ;;  %v2985_v45 = vsel %vm1141_vm9, %v2727_v38, 0 }
 0xa53   :  { %v2503_v5 = vpack.i.b16 %v2486_v16, %v2467_v20  ;;  %v2505_v29 = vshrl.u32 %v2486_v16, 16  ;;  %v2469_v46 = vsel %vm230_vm8, 0, %v2468_v58  ;;  %v2487_v41 = vrot.slane %v2486_v16, 4 }
 0xa54   :  { %v2699_v55 = vsel %vm230_vm8, %v2698_v39, %v2691_v54  ;;  %v2722_v42 = vperm.slane %v2718_v6, %v4675_v3  ;;  %v2510_v22 = vshrl.u32 %v2469_v46, 16  ;;  %v2242_v14 = vperm.slane %v2238_v53, %v4675_v3 }
 0xa55   :  { %v2829_v37 = vsel %vm904_vm10, %v2503_v5, 0  ;;  %v2506_v63 = vpack.i.b16 %v2505_v29, %v2504_v17  ;;  %v2488_v49 = vsel %vm230_vm8, 0, %v2487_v41  ;;  %v2703_v30 = vperm.slane %v2699_v55, %v4675_v3 }
 0xa56   :  { %2838 = vmatpush.bf16.xpose.msrb.mxu1 %v2829_v37  ;;  %v2509_v47 = vpack.i.b16 %v2488_v49, %v2469_v46  ;;  %v2511_v28 = vshrl.u32 %v2488_v49, 16  ;;  %4066 = vmatmul.msk.bf16.vlgmr.msrb.gmra.mxu3 %vm904_vm10, %v2253_v48  ;;  %v2223_v48 = vperm.slane %v2219_v62, %v4675_v3  ;;  %v2741_v38 = vshrl.u32 %v2722_v42, 16 }
 0xa57   :  { %v2848_v27 = vsel %vm904_vm10, %v2506_v63, 0  ;;  %v2723_v32 = vrot.slane %v2722_v42, 4  ;;  %v2739_v12 = vpack.i.b16 %v2722_v42, %v2703_v30  ;;  %v2261_v9 = vshrl.u32 %v2242_v14, 16 }
 0xa58   :  { %2857 = vmatpush.bf16.xpose.msra.mxu2 %v2848_v27  ;;  %v2867_v4 = vsel %vm904_vm10, %v2509_v47, 0  ;;  %v2512_v8 = vpack.i.b16 %v2511_v28, %v2510_v22  ;;  %4067 = vmatmul.msk.bf16.vlgmr.msrb.gmra.mxu0 %vm904_vm10, %v5437_v23  ;;  %v3042_v23 = vsel %vm1141_vm9, %v5468_v31, 0  ;;  %v2740_v7 = vshrl.u32 %v2703_v30, 16 }
 0xa59   :  { %2876 = vmatpush.bf16.xpose.msra.mxu3 %v2867_v4  ;;  %v2243_v13 = vrot.slane %v2242_v14, 4  ;;  %v2704_v26 = vrot.slane %v2703_v30, 4  ;;  %v2259_v57 = vpack.i.b16 %v2242_v14, %v2223_v48  ;;  %v2260_v11 = vshrl.u32 %v2223_v48, 16 }
 0xa5a   :  { %v2886_v35 = vsel %vm904_vm10, %v2512_v8, 0  ;;  %v2742_v36 = vpack.i.b16 %v2741_v38, %v2740_v7  ;;  %v2224_v18 = vrot.slane %v2223_v48, 4  ;;  %v2724_v0 = vsel %vm230_vm8, 0, %v2723_v32 }
 0xa5b   :  { %2895 = vmatpush.bf16.xpose.msra.mxu0 %v2886_v35  ;;  %v3061_v43 = vsel %vm1141_vm9, %v2739_v12, 0  ;;  %v2262_v60 = vpack.i.b16 %v2261_v9, %v2260_v11  ;;  %v2244_v31 = vsel %vm230_vm8, 0, %v2243_v13  ;;  %v2705_v59 = vsel %vm230_vm8, 0, %v2704_v26 }
 0xa5c   :  { %v3080_v2 = vsel %vm1141_vm9, %v2742_v36, 0  ;;  %v2747_v44 = vshrl.u32 %v2724_v0, 16  ;;  %v2225_v19 = vsel %vm230_vm8, 0, %v2224_v18  ;;  %v2745_v20 = vpack.i.b16 %v2724_v0, %v2705_v59 }
 0xa5d   :  { %v2267_v34 = vshrl.u32 %v2244_v31, 16  ;;  %v2746_v21 = vshrl.u32 %v2705_v59, 16  ;;  %v2265_v1 = vpack.i.b16 %v2244_v31, %v2225_v19  ;;  %v2266_v39 = vshrl.u32 %v2225_v19, 16 }
 0xa5e   :  { %2994 = vmatpush.bf16.msra.mxu1 %v2985_v45  ;;  %v3099_v50 = vsel %vm1141_vm9, %v2745_v20, 0 }
 0xa5f   :  { %4068 = vmatmul.msk.bf16.vlgmr.msrb.gmra.mxu1 %vm904_vm10, %v2259_v57  ;;  %v2748_v51 = vpack.i.b16 %v2747_v44, %v2746_v21  ;;  %v2268_v56 = vpack.i.b16 %v2267_v34, %v2266_v39 }
 0xa60   :  { %3013 = vmatpush.bf16.msrb.mxu2 %v3004_v52 }
 0xa61   :  { %3032 = vmatpush.bf16.msrb.mxu3 %v3023_v33  ;;  %4069 = vmatmul.msk.bf16.vlgmr.msra.gmra.mxu2 %vm904_vm10, %v2262_v60  ;;  %v3118_v16 = vsel %vm1141_vm9, %v2748_v51, 0 }
 0xa62   :  { %3070 = vmatpush.bf16.msrb.mxu1 %v3061_v43 }
 0xa63   :  { %3051 = vmatpush.bf16.msrb.mxu0 %v3042_v23 }
 0xa64   :  { %3089 = vmatpush.bf16.msra.mxu2 %v3080_v2 }
 0xa66   :  { %4070 = vmatmul.msk.bf16.vlgmr.msra.gmra.mxu3 %vm904_vm10, %v2265_v1 }
 0xa67   :  { %3108 = vmatpush.bf16.msra.mxu3 %v3099_v50 }
 0xa68   :  { %4071 = vmatmul.msk.bf16.vlgmr.msra.gmra.mxu0 %vm904_vm10, %v2268_v56 }
 0xa69   :  { %3127 = vmatpush.bf16.msra.mxu0 %v3118_v16 }
 0xacc   :  { %v2764_v58 = vpop.f32.mrf.mxu1 }
 0xacd   :  { %v2901_v61 = vmul.f32 0.125, %v2764_v58 }
 0xacf   :  { %v2909_v17 = vadd.f32 %v2901_v61, %v4964_v15 }
 0xad1   :  { %v2917_v54 = vmul.f32 1.442695, %v2909_v17 }
 0xad3   :  { %4427 = vpow2.f32 %v2917_v54 }
 0xad4   :  { %v2766_v6 = vpop.f32.mrf.mxu1  ;;  %v2783_v5 = vpop.f32.mrf.mxu2 }
 0xad5   :  { %v2902_v29 = vmul.f32 0.125, %v2783_v5  ;;  %v2821_v46 = vpop.f32.mrf.mxu0 }
 0xad6   :  { %v2904_v63 = vmul.f32 0.125, %v2821_v46 }
 0xad7   :  { %v2910_v41 = vadd.f32 %v2902_v29, %v4964_v15 }
 0xad8   :  { %v2912_v28 = vadd.f32 %v2904_v63, %v4964_v15 }
 0xad9   :  { %v5675_v62 = vpop.eup %4427  ;;  %v2919_v53 = vmul.f32 1.442695, %v2910_v41  ;;  %v2802_v55 = vpop.f32.mrf.mxu3 }
 0xada   :  { %v2933_v37 = vsel %vm1089_vm12, %v5675_v62, 0.0  ;;  %v2903_v49 = vmul.f32 0.125, %v2802_v55  ;;  %v2923_v8 = vmul.f32 1.442695, %v2912_v28 }
 0xadb   :  { %4429 = vpow2.f32 %v2919_v53  ;;  %2934 = vadd.xlane.f32.xlu1 %v2933_v37 }
 0xadc   :  { %v2785_v42 = vpop.f32.mrf.mxu2  ;;  %v2840_v45 = vpop.f32.mrf.mxu1  ;;  %v2911_v47 = vadd.f32 %v2903_v49, %v4964_v15 }
 0xadd   :  { %v2823_v22 = vpop.f32.mrf.mxu0  ;;  %v2905_v52 = vmul.f32 0.125, %v2840_v45 }
 0xade   :  { %v2921_v27 = vmul.f32 1.442695, %v2911_v47 }
 0xadf   :  { %v2913_v23 = vadd.f32 %v2905_v52, %v4964_v15 }
 0xae0   :  { %4431 = vpow2.f32 %v2921_v27 }
 0xae1   :  { %v4430_v14 = vpop.eup %4429  ;;  %v2804_v30 = vpop.f32.mrf.mxu3  ;;  %4433 = vpow2.f32 %v2923_v8  ;;  %v2925_v26 = vmul.f32 1.442695, %v2913_v23 }
 0xae2   :  { %v2936_v4 = vsel %vm1089_vm12, %v4430_v14, 0.0 }
 0xae3   :  { %2937 = vadd.xlane.f32.xlu2 %v2936_v4 }
 0xae4   :  { %v2842_v33 = vpop.f32.mrf.mxu1  ;;  %v2859_v48 = vpop.f32.mrf.mxu2 }
 0xae5   :  { %v2906_v38 = vmul.f32 0.125, %v2859_v48  ;;  %v2897_v35 = vpop.f32.mrf.mxu0 }
 0xae6   :  { %v4432_v32 = vpop.eup %4431  ;;  %v2908_v57 = vmul.f32 0.125, %v2897_v35 }
 0xae7   :  { %v2914_v12 = vadd.f32 %v2906_v38, %v4964_v15  ;;  %v2939_v9 = vsel %vm1089_vm12, %v4432_v32, 0.0  ;;  %v4434_v18 = vpop.eup %4433 }
 0xae8   :  { %2940 = vadd.xlane.f32.xlu0 %v2939_v9  ;;  %v2916_v60 = vadd.f32 %v2908_v57, %v4964_v15  ;;  %v2942_v59 = vsel %vm1089_vm12, %v4434_v18, 0.0 }
 0xae9   :  { %v2927_v7 = vmul.f32 1.442695, %v2914_v12  ;;  %v2878_v13 = vpop.f32.mrf.mxu3 }
 0xaea   :  { %v2907_v11 = vmul.f32 0.125, %v2878_v13  ;;  %v2931_v20 = vmul.f32 1.442695, %v2916_v60 }
 0xaeb   :  { %4435 = vpow2.f32 %v2927_v7 }
 0xaec   :  { %v2861_v36 = vpop.f32.mrf.mxu2  ;;  %v2915_v0 = vadd.f32 %v2907_v11, %v4964_v15  ;;  %4437 = vpow2.f32 %v2925_v26 }
 0xaed   :  { %v2899_v43 = vpop.f32.mrf.mxu0 }
 0xaee   :  { %v2929_v31 = vmul.f32 1.442695, %v2915_v0 }
 0xaf0   :  { %4439 = vpow2.f32 %v2929_v31  ;;  %2943 = vadd.xlane.f32.xlu0 %v2942_v59 }
 0xaf1   :  { %v4436_v2 = vpop.eup %4435  ;;  %v2880_v44 = vpop.f32.mrf.mxu3  ;;  %4441 = vpow2.f32 %v2931_v20 }
 0xaf2   :  { %v2948_v19 = vsel %vm1089_vm12, %v4436_v2, 0.0  ;;  %v4438_v34 = vpop.eup %4437 }
 0xaf3   :  { %2949 = vadd.xlane.f32.xlu1 %v2948_v19  ;;  %v2945_v1 = vsel %vm1089_vm12, %v4438_v34, 0.0 }
 0xaf6   :  { %v4440_v21 = vpop.eup %4439 }
 0xaf7   :  { %v2951_v39 = vsel %vm1089_vm12, %v4440_v21, 0.0  ;;  %v4442_v15 = vpop.eup %4441 }
 0xaf8   :  { %2946 = vadd.xlane.f32.xlu0 %v2945_v1  ;;  %2952 = vadd.xlane.f32.xlu2 %v2951_v39  ;;  %v2954_v51 = vsel %vm1089_vm12, %v4442_v15, 0.0 }
 0xb00   :  { %2955 = vadd.xlane.f32.xlu2 %v2954_v51 }
 0xb4e   :  { %v2935_v50 = vpop.xlane.xlu1 %2934 }
 0xb4f   :  { %4443 = vrcp.f32 %v2935_v50 }
 0xb55   :  { %v4444_v56 = vpop.eup %4443 }
 0xb56   :  { %v2965_v16 = vmul.f32 %v4444_v56, %v5675_v62  ;;  %v2938_v58 = vpop.xlane.xlu2 %2937 }
 0xb57   :  { %4445 = vrcp.f32 %v2938_v58 }
 0xb58   :  { %v2973_v61 = vpack.c.bf16 %v2965_v16, %v2965_v16 }
 0xb5a   :  { %4072 = vmatmul.msk.bf16.vlgmr.msra.gmra.mxu1 %vm1089_vm12, %v2973_v61 }
 0xb5b   :  { %v2941_v17 = vpop.xlane.xlu0 %2940 }
 0xb5c   :  { %4447 = vrcp.f32 %v2941_v17 }
 0xb5d   :  { %v4446_v54 = vpop.eup %4445 }
 0xb5e   :  { %v2966_v6 = vmul.f32 %v4446_v54, %v4430_v14 }
 0xb60   :  { %v2974_v5 = vpack.c.bf16 %v2966_v6, %v2966_v6 }
 0xb62   :  { %4073 = vmatmul.msk.bf16.vlgmr.msrb.gmra.mxu2 %vm1089_vm12, %v2974_v5  ;;  %v4448_v29 = vpop.eup %4447 }
 0xb63   :  { %v2967_v46 = vmul.f32 %v4448_v29, %v4432_v32  ;;  %v2944_v41 = vpop.xlane.xlu0 %2943 }
 0xb64   :  { %4449 = vrcp.f32 %v2944_v41 }
 0xb65   :  { %v2975_v53 = vpack.c.bf16 %v2967_v46, %v2967_v46 }
 0xb66   :  { %v2950_v55 = vpop.xlane.xlu1 %2949 }
 0xb67   :  { %4451 = vrcp.f32 %v2950_v55  ;;  %4074 = vmatmul.msk.bf16.vlgmr.msrb.gmra.mxu3 %vm1089_vm12, %v2975_v53 }
 0xb6a   :  { %v4450_v62 = vpop.eup %4449 }
 0xb6b   :  { %v2968_v37 = vmul.f32 %v4450_v62, %v4434_v18  ;;  %v2947_v63 = vpop.xlane.xlu0 %2946  ;;  %v2953_v49 = vpop.xlane.xlu2 %2952 }
 0xb6c   :  { %4453 = vrcp.f32 %v2947_v63 }
 0xb6d   :  { %v4452_v42 = vpop.eup %4451  ;;  %v2976_v45 = vpack.c.bf16 %v2968_v37, %v2968_v37  ;;  %4455 = vrcp.f32 %v2953_v49 }
 0xb6e   :  { %v2970_v47 = vmul.f32 %v4452_v42, %v4436_v2 }
 0xb6f   :  { %4075 = vmatmul.msk.bf16.vlgmr.msrb.gmra.mxu0 %vm1089_vm12, %v2976_v45 }
 0xb70   :  { %v2978_v22 = vpack.c.bf16 %v2970_v47, %v2970_v47 }
 0xb72   :  { %4077 = vmatmul.msk.bf16.vlgmr.msra.gmra.mxu2 %vm1089_vm12, %v2978_v22  ;;  %v4454_v28 = vpop.eup %4453 }
 0xb73   :  { %v4456_v27 = vpop.eup %4455  ;;  %v2969_v14 = vmul.f32 %v4454_v28, %v4438_v34  ;;  %v2956_v30 = vpop.xlane.xlu2 %2955 }
 0xb74   :  { %v2971_v4 = vmul.f32 %v4456_v27, %v4440_v21  ;;  %4457 = vrcp.f32 %v2956_v30 }
 0xb75   :  { %v2977_v8 = vpack.c.bf16 %v2969_v14, %v2969_v14 }
 0xb76   :  { %v2979_v52 = vpack.c.bf16 %v2971_v4, %v2971_v4 }
 0xb77   :  { %4076 = vmatmul.msk.bf16.vlgmr.msrb.gmra.mxu1 %vm1089_vm12, %v2977_v8 }
 0xb78   :  { %4078 = vmatmul.msk.bf16.vlgmr.msra.gmra.mxu3 %vm1089_vm12, %v2979_v52 }
 0xb7a   :  { %v4458_v33 = vpop.eup %4457 }
 0xb7b   :  { %v2972_v48 = vmul.f32 %v4458_v33, %v4442_v15 }
 0xb7d   :  { %v2980_v38 = vpack.c.bf16 %v2972_v48, %v2972_v48 }
 0xb7f   :  { %4079 = vmatmul.msk.bf16.vlgmr.msra.gmra.mxu0 %vm1089_vm12, %v2980_v38 }
 0xbd7   :  { %v2996_v35 = vpop.f32.mrf.mxu1 }
 0xbd8   :  { %v3135_v12 = vrot.slane %v2996_v35, 4 }
 0xbdf   :  { %v2998_v32 = vpop.f32.mrf.mxu1 }
 0xbe5   :  { %v3015_v23 = vpop.f32.mrf.mxu2 }
 0xbe6   :  { %v3147_v9 = vrot.slane %v3015_v23, 4 }
 0xbea   :  { %v3034_v7 = vpop.f32.mrf.mxu3 }
 0xbeb   :  { %v3133_v13 = vrot.slane %v3034_v7, 4  ;;  %v3136_v26 = vsel %vm230_vm8, %v3034_v7, %v3135_v12 }
 0xbec   :  { %v3144_v57 = vperm.slane %v3136_v26, %v4648_v25  ;;  %v3053_v11 = vpop.f32.mrf.mxu0 }
 0xbed   :  { %v3017_v36 = vpop.f32.mrf.mxu2  ;;  %v3134_v18 = vsel %vm230_vm8, %v3133_v13, %v2996_v35  ;;  %v3145_v0 = vrot.slane %v3053_v11, 4  ;;  %v3148_v43 = vsel %vm230_vm8, %v3053_v11, %v3147_v9 }
 0xbee   :  { %v3140_v60 = vperm.slane %v3134_v18, %v4648_v25  ;;  %v3171_v31 = vrot.slane %v3144_v57, 4  ;;  %v3156_v59 = vperm.slane %v3148_v43, %v4648_v25 }
 0xbef   :  { %v3146_v2 = vsel %vm230_vm8, %v3145_v0, %v3015_v23 }
 0xbf0   :  { %v3159_v44 = vrot.slane %v3140_v60, 4  ;;  %v3152_v19 = vperm.slane %v3146_v2, %v4648_v25  ;;  %v3169_v20 = vrot.slane %v3156_v59, 4  ;;  %v3172_v34 = vsel %vm230_vm8, %v3156_v59, %v3171_v31 }
 0xbf1   :  { %v3180_v21 = vperm.slane %v3172_v34, %v4675_v3 }
 0xbf2   :  { %v3157_v1 = vrot.slane %v3152_v19, 4  ;;  %v3160_v39 = vsel %vm230_vm8, %v3152_v19, %v3159_v44  ;;  %v3170_v15 = vsel %vm230_vm8, %v3169_v20, %v3144_v57  ;;  %v3036_v51 = vpop.f32.mrf.mxu3 }
 0xbf3   :  { %v3168_v50 = vperm.slane %v3160_v39, %v4675_v3  ;;  %v3176_v56 = vperm.slane %v3170_v15, %v4675_v3  ;;  %v3187_v16 = vrot.slane %v3180_v21, 4 }
 0xbf4   :  { %v3158_v58 = vsel %vm230_vm8, %v3157_v1, %v3140_v60  ;;  %v3055_v61 = vpop.f32.mrf.mxu0  ;;  %v3072_v17 = vpop.f32.mrf.mxu1 }
 0xbf5   :  { %v3164_v54 = vperm.slane %v3158_v58, %v4675_v3  ;;  %v3183_v6 = vrot.slane %v3168_v50, 4  ;;  %v3185_v5 = vrot.slane %v3176_v56, 4  ;;  %v3188_v29 = vsel %vm230_vm8, 0.0, %v3187_v16  ;;  %v3091_v46 = vpop.f32.mrf.mxu2 }
 0xbf6   :  { %v3261_v41 = vrot.slane %v3188_v29, 4  ;;  %v3256_v37 = vsel %vm230_vm8, %v3187_v16, %v3176_v56  ;;  %v3203_v45 = vrot.slane %v3091_v46, 4  ;;  %v3191_v28 = vrot.slane %v3072_v17, 4 }
 0xbf7   :  { %v3181_v53 = vrot.slane %v3164_v54, 4  ;;  %v3184_v55 = vsel %vm230_vm8, 0.0, %v3183_v6  ;;  %v3186_v62 = vsel %vm230_vm8, 0.0, %v3185_v5  ;;  %v3260_v22 = vperm.slane %v3256_v37, %v4648_v25 }
 0xbf8   :  { %v3250_v63 = vrot.slane %v3184_v55, 4  ;;  %v3262_v49 = vsel %vm230_vm8, %v3261_v41, %v3186_v62  ;;  %v3245_v14 = vsel %vm230_vm8, %v3183_v6, %v3164_v54 }
 0xbf9   :  { %v3266_v42 = vperm.slane %v3262_v49, %v4648_v25  ;;  %v3182_v47 = vsel %vm230_vm8, 0.0, %v3181_v53  ;;  %v3281_v9 = vrot.slane %v3260_v22, 4  ;;  %v3249_v26 = vperm.slane %v3245_v14, %v4648_v25 }
 0xbfa   :  { %v3251_v27 = vsel %vm230_vm8, %v3250_v63, %v3182_v47 }
 0xbfb   :  { %v3110_v30 = vpop.f32.mrf.mxu3  ;;  %v3255_v4 = vperm.slane %v3251_v27, %v4648_v25  ;;  %v3279_v12 = vrot.slane %v3266_v42, 4  ;;  %v3282_v34 = vsel %vm230_vm8, %v3266_v42, %v3281_v9  ;;  %v3269_v15 = vrot.slane %v3249_v26, 4 }
 0xbfc   :  { %v3189_v8 = vrot.slane %v3110_v30, 4  ;;  %v3192_v52 = vsel %vm230_vm8, %v3110_v30, %v3191_v28  ;;  %v3074_v33 = vpop.f32.mrf.mxu1  ;;  %v3129_v48 = vpop.f32.mrf.mxu0  ;;  %v3290_v6 = vperm.slane %v3282_v34, %v4675_v3 }
 0xbfd   :  { %v3200_v38 = vperm.slane %v3192_v52, %v4648_v25  ;;  %v3201_v35 = vrot.slane %v3129_v48, 4  ;;  %v3204_v32 = vsel %vm230_vm8, %v3129_v48, %v3203_v45  ;;  %v3093_v23 = vpop.f32.mrf.mxu2  ;;  %v3267_v18 = vrot.slane %v3255_v4, 4 }
 0xbfe   :  { %v3190_v7 = vsel %vm230_vm8, %v3189_v8, %v3072_v17  ;;  %v3212_v13 = vperm.slane %v3204_v32, %v4648_v25  ;;  %v3280_v2 = vsel %vm230_vm8, %v3279_v12, %v3260_v22  ;;  %v3270_v42 = vsel %vm230_vm8, %v3255_v4, %v3269_v15  ;;  %v4305_v15 = vld [vmem:[%s5980_s2 + $0x28] sm:$0xff] }
 0xbff   :  { %v3196_v57 = vperm.slane %v3190_v7, %v4648_v25  ;;  %v3227_v11 = vrot.slane %v3200_v38, 4  ;;  %v3202_v36 = vsel %vm230_vm8, %v3201_v35, %v3091_v46  ;;  %v3268_v59 = vsel %vm230_vm8, %v3267_v18, %v3249_v26 }
 0xc00   :  { %v3208_v0 = vperm.slane %v3202_v36, %v4648_v25  ;;  %v3225_v43 = vrot.slane %v3212_v13, 4  ;;  %v3274_v51 = vperm.slane %v3268_v59, %v4675_v3  ;;  %v3286_v61 = vperm.slane %v3280_v2, %v4675_v3 }
 0xc01   :  { %v3215_v60 = vrot.slane %v3196_v57, 4  ;;  %v3228_v31 = vsel %vm230_vm8, %v3212_v13, %v3227_v11  ;;  %v3278_v8 = vperm.slane %v3270_v42, %v4675_v3  ;;  %v3295_v52 = vrot.slane %v3290_v6, 4 }
 0xc02   :  { %v3213_v44 = vrot.slane %v3208_v0, 4  ;;  %v3226_v19 = vsel %vm230_vm8, %v3225_v43, %v3200_v38  ;;  %v3236_v20 = vperm.slane %v3228_v31, %v4675_v3  ;;  %v3291_v41 = vrot.slane %v3286_v61, 4 }
 0xc03   :  { %v3216_v21 = vsel %vm230_vm8, %v3208_v0, %v3215_v60  ;;  %v3232_v1 = vperm.slane %v3226_v19, %v4675_v3  ;;  %v3112_v39 = vpop.f32.mrf.mxu3  ;;  %v3297_v26 = vrot.slane %v3278_v8, 4  ;;  %v3296_v11 = vsel %vm230_vm8, %v3295_v52, %v3278_v8 }
 0xc04   :  { %v3214_v50 = vsel %vm230_vm8, %v3213_v44, %v3196_v57  ;;  %v3224_v56 = vperm.slane %v3216_v21, %v4675_v3  ;;  %v3243_v16 = vrot.slane %v3236_v20, 4  ;;  %v3131_v58 = vpop.f32.mrf.mxu0  ;;  %v3292_v45 = vsel %vm230_vm8, %v3291_v41, %v3274_v51  ;;  %v4306_v39 = vld [vmem:[%s5980_s2 + $0x30] sm:$0xff] }
 0xc05   :  { %v3220_v17 = vperm.slane %v3214_v50, %v4675_v3  ;;  %v3241_v54 = vrot.slane %v3232_v1, 4  ;;  %v3298_v59 = vsel %vm230_vm8, %v3290_v6, %v3297_v26 }
 0xc06   :  { %v3239_v5 = vrot.slane %v3224_v56, 4  ;;  %v3244_v29 = vsel %vm230_vm8, 0.0, %v3243_v16  ;;  %v3310_v46 = vsel %vm230_vm8, %v3243_v16, %v3232_v1 }
 0xc07   :  { %v3237_v53 = vrot.slane %v3220_v17, 4  ;;  %v3242_v55 = vsel %vm230_vm8, 0.0, %v3241_v54  ;;  %v3314_v62 = vperm.slane %v3310_v46, %v4648_v25  ;;  %v3315_v37 = vrot.slane %v3244_v29, 4 }
 0xc08   :  { %v3240_v63 = vsel %vm230_vm8, 0.0, %v3239_v5  ;;  %v3299_v49 = vsel %vm230_vm8, %v3239_v5, %v3220_v17 }
 0xc09   :  { %v3304_v47 = vrot.slane %v3240_v63, 4  ;;  %v3316_v22 = vsel %vm230_vm8, %v3315_v37, %v3242_v55  ;;  %v3335_v28 = vrot.slane %v3314_v62, 4  ;;  %v3238_v27 = vsel %vm230_vm8, 0.0, %v3237_v53  ;;  %v5806_v63 = vld [vmem:[%s5984_s6 + $0x10] sm:$0xff] }
 0xc0a   :  { %v3320_v14 = vperm.slane %v3316_v22, %v4648_v25  ;;  %v3303_v30 = vperm.slane %v3299_v49, %v4648_v25  ;;  %v3393_v49 = vperm.slane %v5806_v63, 1 }
 0xc0b   :  { %v3305_v33 = vsel %vm230_vm8, %v3304_v47, %v3238_v27 }
 0xc0c   :  { %v3309_v48 = vperm.slane %v3305_v33, %v4648_v25  ;;  %v3323_v4 = vrot.slane %v3303_v30, 4  ;;  %v3336_v38 = vsel %vm230_vm8, %v3320_v14, %v3335_v28  ;;  %v3333_v35 = vrot.slane %v3320_v14, 4 }
 0xc0d   :  { %v3344_v32 = vperm.slane %v3336_v38, %v4675_v3  ;;  %v3293_v25 = vrot.slane %v3274_v51, 4  ;;  %v4304_v51 = vld [vmem:[%s5980_s2 + $0x20] sm:$0xff] }
 0xc0e   :  { %v3324_v23 = vsel %vm230_vm8, %v3309_v48, %v3323_v4  ;;  %v3321_v12 = vrot.slane %v3309_v48, 4  ;;  %v3334_v9 = vsel %vm230_vm8, %v3333_v35, %v3314_v62 }
 0xc0f   :  { %v3332_v7 = vperm.slane %v3324_v23, %v4675_v3  ;;  %v3349_v13 = vrot.slane %v3344_v32, 4  ;;  %v3340_v57 = vperm.slane %v3334_v9, %v4675_v3  ;;  %v3294_v34 = vsel %vm230_vm8, %v3286_v61, %v3293_v25  ;;  %v4131_v25 = vld [vmem:[%s5981_s3 + $0x60] sm:$0xf] }
 0xc10   :  { %v3322_v36 = vsel %vm230_vm8, %v3321_v12, %v3303_v30 }
 0xc11   :  { %v3350_v18 = vsel %vm230_vm8, %v3349_v13, %v3332_v7  ;;  %v3351_v0 = vrot.slane %v3332_v7, 4  ;;  %v3328_v43 = vperm.slane %v3322_v36, %v4675_v3  ;;  %v3345_v60 = vrot.slane %v3340_v57, 4  ;;  %v4307_v3 = vld [vmem:[%s5980_s2 + $0x38] sm:$0xff]  ;;  %v4139_v7 = vld [vmem:[%s5981_s3 + $0x70] sm:$0xf]  ;;  %s3845_s2 = sshll.u32 %s5985_s7, 4  ;;  %s3846_s2 = int_to_ptr.hbm [resolvable:$true] %s3845_s2 }
 0xc12   :  { %v4370_v31 = vpack.i.bf16 %v3350_v18, %v3296_v11  ;;  %3425 = vmatpush.bf16.msra.mxu1 %v4307_v3  ;;  %v4315_v13 = vld [vmem:[%s5981_s3 + $0x74] sm:$0xf0]  ;;  %v4141_v11 = vld [vmem:[%s5981_s3 + $0x78] sm:$0xf0]  ;;  %v4313_v18 = vld [vmem:[%s5981_s3 + $0x64] sm:$0xf0] }
 0xc13   :  { %v3352_v2 = vsel %vm230_vm8, %v3344_v32, %v3351_v0  ;;  %v3347_v44 = vrot.slane %v3328_v43, 4  ;;  %v3346_v19 = vsel %vm230_vm8, %v3345_v60, %v3328_v43  ;;  %v4140_v26 = vor.u32 %v4315_v13, %v4139_v7  ;;  %v4312_v0 = vld [vmem:[%s5981_s3 + $0x64] sm:$0xf]  ;;  %v4133_v43 = vld [vmem:[%s5981_s3 + $0x68] sm:$0xf0]  ;;  %v4327_v7 = vld [vmem:[%s5982_s4 + $0xd8] sm:$0xff] }
 0xc14   :  { %4371 = vrot.lane.b32.xlu0 %v4370_v31, %s4505_s20  ;;  %v4375_v20 = vpack.i.bf16 %v3352_v2, %v3298_v59  ;;  %v4132_v60 = vor.u32 %v4313_v18, %v4131_v25  ;;  %v4136_v31 = vor.u32 %v4312_v0, %v4133_v43  ;;  %v4123_v59 = vld [vmem:[%s5981_s3 + $0x50] sm:$0xf]  ;;  %v4311_v2 = vld [vmem:[%s5981_s3 + $0x54] sm:$0xf0]  ;;  %v4324_v25 = vld [vmem:[%s5982_s4 + $0xc0] sm:$0xff]  ;;  %v3497_v43 = vperm.slane %v5806_v63, 4 }
 0xc15   :  { %v3348_v21 = vsel %vm230_vm8, %v3340_v57, %v3347_v44  ;;  %v4314_v57 = vld [vmem:[%s5981_s3 + $0x74] sm:$0xf]  ;;  %3546 = vmatpush.bf16.msrb.mxu2 %v4140_v26  ;;  %v4124_v3 = vor.u32 %v4311_v2, %v4123_v59  ;;  %v4317_v26 = vld [vmem:[%s5982_s4 + $0x88] sm:$0xff]  ;;  %v33_v18 = vld [vmem:[%s5984_s6 + $0x18] sm:$0xff]  ;;  %s4508_s20 = smov [#allocation2]  }
 0xc16   :  { %4376 = vrot.lane.b32.xlu2 %v4375_v20, %s4506_s21  ;;  %v4365_v1 = vpack.i.bf16 %v3348_v21, %v3294_v34  ;;  %3426 = vmatpush.bf16.msra.mxu1 %v4306_v39  ;;  %v4144_v36 = vor.u32 %v4314_v57, %v4141_v11  ;;  %v4125_v20 = vld [vmem:[%s5981_s3 + $0x58] sm:$0xf0]  ;;  %v4115_v39 = vld [vmem:[%s5981_s3 + $0x40] sm:$0xf]  ;;  %v4326_v13 = vld [vmem:[%s5982_s4 + $0xd0] sm:$0xff]  ;;  %s3843_s11 = sshll.u32 %s4508_s20, 4  ;;  %s3844_s11 = int_to_ptr.vmem [resolvable:$true] %s3843_s11 }
 0xc17   :  { %v4323_v34 = vld [vmem:[%s5982_s4 + $0xb8] sm:$0xff]  ;;  %v4325_v57 = vld [vmem:[%s5982_s4 + $0xc8] sm:$0xff]  ;;  %v4316_v11 = vld [vmem:[%s5982_s4 + $0x80] sm:$0xff] }
 0xc18   :  { %4366 = vrot.lane.b32.xlu1 %v4365_v1, %s4507_s22  ;;  %3560 = vmatpush.bf16.msrb.mxu3 %v4144_v36  ;;  %v4331_v1 = vld [vmem:[%s5982_s4 + $0xf8] sm:$0xff]  ;;  %s4509_s22 = smov 128  }
 0xc19   :  { %3547 = vmatpush.bf16.msrb.mxu2 %v4132_v60  ;;  %3706 = vmatpush.bf16.msrb.mxu0 %v4323_v34  ;;  %v3498_v60 = vperm.slane %v33_v18, 4 }
 0xc1a   :  { %3427 = vmatpush.bf16.msra.mxu1 %v4305_v15  ;;  %v4322_v15 = vld [vmem:[%s5982_s4 + $0xb0] sm:$0xff] }
 0xc1c   :  { %3561 = vmatpush.bf16.msrb.mxu3 %v4136_v31 }
 0xc1d   :  { %3548 = vmatpush.bf16.msrb.mxu2 %v4124_v3  ;;  %3707 = vmatpush.bf16.msrb.mxu0 %v4322_v15 }
 0xc1e   :  { %3428 = vmatpush.bf16.msra.mxu1 %v4304_v51 }
 0xc22   :  { %3720 = vmatpush.bf16.msrb.mxu1 %v4331_v1 }
 0xc70   :  { %v4377_v56 = vpop.permute.xlu2 %4376 }
 0xc71   :  { %v4379_v6 = vunpack.i.h.bf16 %v4377_v56  ;;  %v4378_v5 = vunpack.i.l.bf16 %v4377_v56 }
 0xc86   :  { %v4372_v50 = vpop.permute.xlu0 %4371 }
 0xc87   :  { %v4374_v17 = vunpack.i.h.bf16 %v4372_v50  ;;  %v4373_v54 = vunpack.i.l.bf16 %v4372_v50 }
 0xc8a   :  { %v4367_v16 = vpop.permute.xlu1 %4366 }
 0xc8b   :  { %v4369_v58 = vunpack.i.h.bf16 %v4367_v16  ;;  %v4368_v61 = vunpack.i.l.bf16 %v4367_v16  ;;  %v4309_v16 = vld [vmem:[%s5981_s3 + $0x44] sm:$0xf0] }
 0xc8d   :  { %v3377_v29 = vsel %vm904_vm10, %v3292_v45, %v4368_v61  ;;  %v3378_v46 = vsel %vm904_vm10, %v3346_v19, %v4369_v58  ;;  %v4310_v19 = vld [vmem:[%s5981_s3 + $0x54] sm:$0xf] }
 0xc8e   :  { %v3379_v41 = vsel %vm1538_vm13, %v3377_v29, %v4373_v54  ;;  %v3380_v53 = vsel %vm1538_vm13, %v3378_v46, %v4374_v17  ;;  %v4128_v56 = vor.u32 %v4310_v19, %v4125_v20  ;;  %v4330_v58 = vld [vmem:[%s5982_s4 + $0xf0] sm:$0xff]  ;;  %v4308_v17 = vld [vmem:[%s5981_s3 + $0x44] sm:$0xf]  ;;  %v4117_v54 = vld [vmem:[%s5981_s3 + $0x48] sm:$0xf0] }
 0xc8f   :  { %v3381_v55 = vsel %vm1541_vm14, %v3379_v41, %v4378_v5  ;;  %v3382_v62 = vsel %vm1541_vm14, %v3380_v53, %v4379_v6  ;;  %v4116_v5 = vor.u32 %v4309_v16, %v4115_v39  ;;  %v4321_v29 = vld [vmem:[%s5982_s4 + $0xa8] sm:$0xff]  ;;  %v4120_v46 = vor.u32 %v4308_v17, %v4117_v54  ;;  %3721 = vmatpush.bf16.msrb.mxu1 %v4330_v58 }
 0xc90   :  { %v3383_v37 = vpack.c.bf16 %v3382_v62, %v3381_v55  ;;  %3562 = vmatpush.bf16.msrb.mxu3 %v4128_v56  ;;  %v4329_v41 = vld [vmem:[%s5982_s4 + $0xe8] sm:$0xff]  ;;  %3708 = vmatpush.bf16.msrb.mxu0 %v4321_v29  ;;  %v4320_v62 = vld [vmem:[%s5982_s4 + $0xa0] sm:$0xff] }
 0xc91   :  { %3549 = vmatpush.bf16.msrb.mxu2 %v4116_v5 }
 0xc92   :  { %4104 = vmatmul.msk.bf16.vlgmr.msra.gmra.mxu1 %vm41_vm0, %v3383_v37 }
 0xc93   :  { %3722 = vmatpush.bf16.msrb.mxu1 %v4329_v41 }
 0xc94   :  { %3563 = vmatpush.bf16.msrb.mxu3 %v4120_v46  ;;  %3709 = vmatpush.bf16.msrb.mxu0 %v4320_v62 }
 0xd0f   :  { %v3430_v42 = vpop.f32.mrf.mxu1 }
 0xd10   :  { %v3431_v45 = vadd.f32 %v3430_v42, %v3393_v49 }
 0xd12   :  { %v5810_v47 = vadd.f32 %v3431_v45, %v5256_v24 }
 0xd14   :  { %v3437_v22 = vsel %vm41_vm0, %v5810_v47, 0.0 }
 0xd15   :  { %3438 = vadd.xlane.f32.xlu0 %v3437_v22 }
 0xd17   :  { %v3432_v28 = vpop.f32.mrf.mxu1 }
 0xd18   :  { %v3433_v27 = vadd.f32 %v3432_v28, %v3393_v49  ;;  %v4328_v49 = vld [vmem:[%s5982_s4 + $0xe0] sm:$0xff] }
 0xd19   :  { %3723 = vmatpush.bf16.msrb.mxu1 %v4328_v49 }
 0xd1a   :  { %v5815_v14 = vadd.f32 %v3433_v27, %v5261_v40 }
 0xd1c   :  { %v3440_v30 = vsel %vm41_vm0, %v5815_v14, 0.0 }
 0xd1d   :  { %3441 = vadd.xlane.f32.xlu1 %v3440_v30  ;;  %3724 = vmatpush.bf16.msrb.mxu1 %v4327_v7 }
 0xd21   :  { %3725 = vmatpush.bf16.msrb.mxu1 %v4326_v13 }
 0xd25   :  { %3726 = vmatpush.bf16.msrb.mxu1 %v4325_v57 }
 0xd29   :  { %3727 = vmatpush.bf16.msrb.mxu1 %v4324_v25  ;;  %v3780_v25 = vperm.slane %v5806_v63, 6 }
 0xd88   :  { %v3439_v8 = vpop.xlane.xlu0 %3438 }
 0xd89   :  { %v3443_v52 = vmul.f32 %v3439_v8, %v4559_v10  ;;  %v3481_v8 = vperm.slane %v5806_v63, 2 }
 0xd8b   :  { %v5821_v33 = vsub.f32 %v5810_v47, %v3443_v52 }
 0xd8d   :  { %v3447_v24 = vmul.f32 %v5821_v33, %v5821_v33 }
 0xd8f   :  { %v3449_v48 = vsel %vm41_vm0, %v3447_v24, 0.0 }
 0xd90   :  { %v3442_v4 = vpop.xlane.xlu1 %3441  ;;  %3450 = vadd.xlane.f32.xlu2 %v3449_v48 }
 0xd91   :  { %v3444_v40 = vmul.f32 %v3442_v4, %v4559_v10  ;;  %v3484_v4 = vperm.slane %v5806_v63, 3 }
 0xd93   :  { %v5828_v38 = vsub.f32 %v5815_v14, %v3444_v40 }
 0xd95   :  { %v3448_v35 = vmul.f32 %v5828_v38, %v5828_v38 }
 0xd97   :  { %v3452_v32 = vsel %vm41_vm0, %v3448_v35, 0.0 }
 0xd98   :  { %3453 = vadd.xlane.f32.xlu0 %v3452_v32 }
 0xe03   :  { %v3451_v23 = vpop.xlane.xlu2 %3450 }
 0xe04   :  { %v3455_v12 = vmul.f32 %v3451_v23, %v4559_v10 }
 0xe06   :  { %v5834_v9 = vadd.f32 1e-05, %v3455_v12 }
 0xe08   :  { %4459 = vrsqrt.f32 %v5834_v9  ;;  %vm3465_vm9 = vweird.f32 %v5834_v9 }
 0xe0b   :  { %v3454_v44 = vpop.xlane.xlu0 %3453 }
 0xe0c   :  { %v3456_v21 = vmul.f32 %v3454_v44, %v4559_v10 }
 0xe0e   :  { %v4460_v51 = vpop.eup %4459  ;;  %v3458_v50 = vadd.f32 1e-05, %v3456_v21 }
 0xe0f   :  { %v3460_v61 = vmul.f32 %v4460_v51, %v5834_v9  ;;  %vm3466_vm8 = vweird.f32 %v4460_v51 }
 0xe10   :  { %4461 = vrsqrt.f32 %v3458_v50  ;;  %vm3467_vm10 = vmor %vm3465_vm9, %vm3466_vm8  ;;  %vm3475_vm13 = vweird.f32 %v3458_v50 }
 0xe11   :  { %v3461_v6 = vmul.f32 %v4460_v51, %v3460_v61 }
 0xe13   :  { %v3462_v53 = vmul.f32 0.5, %v3461_v6 }
 0xe15   :  { %v3463_v55 = vsub.f32 1.5, %v3462_v53 }
 0xe16   :  { %v4462_v37 = vpop.eup %4461 }
 0xe17   :  { %v3464_v42 = vmul.f32 %v4460_v51, %v3463_v55  ;;  %v3470_v45 = vmul.f32 %v4462_v37, %v3458_v50  ;;  %vm3476_vm12 = vweird.f32 %v4462_v37 }
 0xe18   :  { %vm3477_vm14 = vmor %vm3475_vm13, %vm3476_vm12 }
 0xe19   :  { %v3471_v22 = vmul.f32 %v4462_v37, %v3470_v45  ;;  %v3468_v28 = vsel %vm3467_vm10, %v4460_v51, %v3464_v42  ;;  %v3609_v51 = vperm.slane %v5806_v63, 5 }
 0xe1a   :  { %v3479_v52 = vmul.f32 %v3468_v28, %v5821_v33  ;;  %v4319_v33 = vld [vmem:[%s5982_s4 + $0x98] sm:$0xff] }
 0xe1b   :  { %v3472_v27 = vmul.f32 0.5, %v3471_v22  ;;  %3710 = vmatpush.bf16.msrb.mxu0 %v4319_v33 }
 0xe1c   :  { %v3482_v40 = vmul.f32 %v3481_v8, %v3479_v52  ;;  %v4334_v52 = vld [vmem:[%s5983_s5 + $0x10] sm:$0xff] }
 0xe1d   :  { %v3473_v30 = vsub.f32 1.5, %v3472_v27 }
 0xe1e   :  { %v3485_v23 = vadd.f32 %v3484_v4, %v3482_v40 }
 0xe1f   :  { %v3474_v24 = vmul.f32 %v4462_v37, %v3473_v30 }
 0xe21   :  { %v3478_v48 = vsel %vm3477_vm14, %v4462_v37, %v3474_v24 }
 0xe22   :  { %v3480_v35 = vmul.f32 %v3478_v48, %v5828_v38  ;;  %v4318_v38 = vld [vmem:[%s5982_s4 + $0x90] sm:$0xff] }
 0xe23   :  { %3711 = vmatpush.bf16.msrb.mxu0 %v4318_v38 }
 0xe24   :  { %v3483_v32 = vmul.f32 %v3481_v8, %v3480_v35  ;;  %v4335_v8 = vld [vmem:[%s5983_s5 + $0x18] sm:$0xff]  ;;  %v4333_v35 = vld [vmem:[%s5983_s5 + $0x8] sm:$0xff] }
 0xe25   :  { %3827 = vmatpush.bf16.msra.mxu2 %v4335_v8 }
 0xe26   :  { %v3486_v12 = vadd.f32 %v3484_v4, %v3483_v32 }
 0xe27   :  { %3712 = vmatpush.bf16.msrb.mxu0 %v4317_v26 }
 0xe28   :  { %v3487_v9 = vpack.c.bf16 %v3486_v12, %v3485_v23  ;;  %v4332_v12 = vld [vmem:[%s5983_s5] sm:$0xff] }
 0xe29   :  { %3828 = vmatpush.bf16.msra.mxu2 %v4334_v52 }
 0xe2a   :  { %4145 = vmatmul.msk.bf16.vlgmr.msrb.gmra.mxu2 %vm41_vm0, %v3487_v9  ;;  %4146 = vmatmul.msk.bf16.vlgmr.msrb.gmra.mxu3 %vm41_vm0, %v3487_v9 }
 0xe2b   :  { %3713 = vmatpush.bf16.msrb.mxu0 %v4316_v11 }
 0xe2d   :  { %3829 = vmatpush.bf16.msra.mxu2 %v4333_v35 }
 0xe31   :  { %3830 = vmatpush.bf16.msra.mxu2 %v4332_v12 }
 0xead   :  { %v3551_v36 = vpop.f32.mrf.mxu2  ;;  %v3565_v0 = vpop.f32.mrf.mxu3 }
 0xeae   :  { %v3552_v31 = vadd.f32 %v3551_v36, %v3497_v43  ;;  %v3566_v59 = vadd.f32 %v3565_v0, %v3498_v60 }
 0xeb0   :  { %v3570_v34 = vmax.f32 %v3552_v31, 0.0  ;;  %v3571_v21 = vmax.f32 %v3566_v59, 0.0 }
 0xeb5   :  { %v3553_v2 = vpop.f32.mrf.mxu2  ;;  %v3567_v44 = vpop.f32.mrf.mxu3 }
 0xeb6   :  { %v3554_v19 = vadd.f32 %v3553_v2, %v3497_v43  ;;  %v3568_v20 = vadd.f32 %v3567_v44, %v3498_v60  ;;  %v3783_v43 = vperm.slane %v5806_v63, 7 }
 0xeb8   :  { %v3572_v1 = vmax.f32 %v3554_v19, 0.0  ;;  %v3573_v3 = vmax.f32 %v3568_v20, 0.0  ;;  %v4380_v20 = vld [vmem:[%s5984_s6 + $0x20] ss:$0 sm:$0xff] }
 0xeba   :  { %v3574_v39 = vpack.c.bf16 %v3572_v1, %v3570_v34  ;;  %v3575_v15 = vpack.c.bf16 %v3573_v3, %v3571_v21 }
 0xebc   :  { %3714 = vmatmul.bf16.vlgmr.msrb.gmra.mxu0 %v3574_v39  ;;  %3728 = vmatmul.bf16.vlgmr.msrb.gmra.mxu1 %v3575_v15 }
 0xf39   :  { %v3715_v50 = vpop.f32.mrf.mxu0  ;;  %v3729_v56 = vpop.f32.mrf.mxu1 }
 0xf3a   :  { %v3716_v16 = vadd.f32 %v3715_v50, %v3609_v51 }
 0xf3c   :  { %v3730_v58 = vadd.f32 %v3729_v56, %v3716_v16 }
 0xf3e   :  { %v3734_v61 = vadd.f32 %v3730_v58, %v5810_v47 }
 0xf40   :  { %v3736_v17 = vsel %vm41_vm0, %v3734_v61, 0.0 }
 0xf41   :  { %v3717_v54 = vpop.f32.mrf.mxu0  ;;  %3737 = vadd.xlane.f32.xlu1 %v3736_v17  ;;  %v3731_v5 = vpop.f32.mrf.mxu1 }
 0xf42   :  { %v3718_v6 = vadd.f32 %v3717_v54, %v3609_v51 }
 0xf44   :  { %v3732_v29 = vadd.f32 %v3731_v5, %v3718_v6 }
 0xf46   :  { %v3735_v46 = vadd.f32 %v3732_v29, %v5815_v14 }
 0xf48   :  { %v3739_v41 = vsel %vm41_vm0, %v3735_v46, 0.0 }
 0xf49   :  { %3740 = vadd.xlane.f32.xlu2 %v3739_v41 }
 0xfb4   :  { %v3738_v53 = vpop.xlane.xlu1 %3737 }
 0xfb5   :  { %v3742_v55 = vmul.f32 %v3738_v53, %v4559_v10 }
 0xfb7   :  { %v3744_v62 = vsub.f32 %v3734_v61, %v3742_v55 }
 0xfb9   :  { %v3746_v37 = vmul.f32 %v3744_v62, %v3744_v62 }
 0xfbb   :  { %v3748_v49 = vsel %vm41_vm0, %v3746_v37, 0.0 }
 0xfbc   :  { %v3741_v47 = vpop.xlane.xlu2 %3740  ;;  %3749 = vadd.xlane.f32.xlu0 %v3748_v49 }
 0xfbd   :  { %v3743_v42 = vmul.f32 %v3741_v47, %v4559_v10 }
 0xfbf   :  { %v3745_v45 = vsub.f32 %v3735_v46, %v3743_v42 }
 0xfc1   :  { %v3747_v22 = vmul.f32 %v3745_v45, %v3745_v45 }
 0xfc3   :  { %v3751_v28 = vsel %vm41_vm0, %v3747_v22, 0.0 }
 0xfc4   :  { %3752 = vadd.xlane.f32.xlu1 %v3751_v28 }
0x102f   :  { %v3750_v14 = vpop.xlane.xlu0 %3749 }
0x1030   :  { %v3754_v27 = vmul.f32 %v3750_v14, %v4559_v10 }
0x1032   :  { %v3756_v30 = vadd.f32 1e-05, %v3754_v27 }
0x1034   :  { %4463 = vrsqrt.f32 %v3756_v30  ;;  %vm3764_vm4 = vweird.f32 %v3756_v30 }
0x1037   :  { %v3753_v24 = vpop.xlane.xlu1 %3752 }
0x1038   :  { %v3755_v48 = vmul.f32 %v3753_v24, %v4559_v10 }
0x103a   :  { %v4464_v4 = vpop.eup %4463  ;;  %v3757_v40 = vadd.f32 1e-05, %v3755_v48 }
0x103b   :  { %v3759_v32 = vmul.f32 %v4464_v4, %v3756_v30  ;;  %vm3765_vm3 = vweird.f32 %v4464_v4 }
0x103c   :  { %4465 = vrsqrt.f32 %v3757_v40  ;;  %vm3766_vm5 = vmor %vm3764_vm4, %vm3765_vm3  ;;  %vm3774_vm7 = vweird.f32 %v3757_v40 }
0x103d   :  { %v3760_v23 = vmul.f32 %v4464_v4, %v3759_v32 }
0x103f   :  { %v3761_v9 = vmul.f32 0.5, %v3760_v23 }
0x1041   :  { %v3762_v33 = vsub.f32 1.5, %v3761_v9 }
0x1042   :  { %v4466_v7 = vpop.eup %4465 }
0x1043   :  { %v3763_v10 = vmul.f32 %v4464_v4, %v3762_v33  ;;  %v3769_v38 = vmul.f32 %v4466_v7, %v3757_v40  ;;  %vm3775_vm6 = vweird.f32 %v4466_v7 }
0x1044   :  { %vm3776_vm11 = vmor %vm3774_vm7, %vm3775_vm6 }
0x1045   :  { %v3770_v13 = vmul.f32 %v4466_v7, %v3769_v38  ;;  %v3767_v26 = vsel %vm3766_vm5, %v4464_v4, %v3763_v10 }
0x1046   :  { %v3778_v36 = vmul.f32 %v3767_v26, %v3744_v62 }
0x1047   :  { %v3771_v57 = vmul.f32 0.5, %v3770_v13 }
0x1048   :  { %v3781_v60 = vmul.f32 %v3780_v25, %v3778_v36 }
0x1049   :  { %v3772_v11 = vsub.f32 1.5, %v3771_v57 }
0x104a   :  { %v3784_v2 = vadd.f32 %v3783_v43, %v3781_v60 }
0x104b   :  { %v3773_v18 = vmul.f32 %v4466_v7, %v3772_v11 }
0x104d   :  { %v3777_v0 = vsel %vm3776_vm11, %v4466_v7, %v3773_v18 }
0x104e   :  { %v3779_v31 = vmul.f32 %v3777_v0, %v3745_v45 }
0x1050   :  { %v3782_v59 = vmul.f32 %v3780_v25, %v3779_v31 }
0x1052   :  { %v3785_v44 = vadd.f32 %v3783_v43, %v3782_v59 }
0x1054   :  { %v3786_v19 = vpack.c.bf16 %v3785_v44, %v3784_v2 }
0x1056   :  { %4259 = vmatmul.msk.bf16.vlgmr.msra.gmra.mxu2 %vm41_vm0, %v3786_v19 }
0x10d9   :  { %v3832_v34 = vpop.f32.mrf.mxu2 }
0x10da   :  { %v3833_v21 = vadd.f32 %v4380_v20, %v3832_v34 }
0x10dc   :  { %3837 = vst [vmem:[#allocation2] sm:$0xff] %v3833_v21 }
0x10e1   :  { %v3834_v63 = vpop.f32.mrf.mxu2 }
0x10e2   :  { %v3835_v1 = vadd.f32 %v4380_v20, %v3834_v63 }
0x10e4   :  { %3838 = vst [vmem:[#allocation2 + $0x8] sm:$0xff] %v3835_v1 }
0x10e5   :  { %3851 = dma.vmem_to_hbm [thread:$0]  %s3844_s11, 256, %s3846_s2, [#allocation3], %s4509_s22, %s4509_s22, %s4510_s13  }
0x10e6   :  { %4495 = dma.done.wait [#allocation3], 256  }
0x10e7   :  { %4496 = vsyncadd [#allocation3], 4294967040 }
0x10e8   :  { %3856 = vsyncpa [#allocation3], 1 }

</bundles_post_ra>
